<compile_context>
chip_gen: v7x
topology: tpu7x:2x2x1
jax: 0.10.0
libtpu: 0.0.40
codegen_flags: <defaults>
</compile_context>

<pallas_src>
import jax
import jax.numpy as jnp
from jax import lax
from jax.experimental import pallas as pl
from jax.experimental.pallas import tpu as pltpu


# --------------------------------------------------------------------------
# Fused CoAttention kernel — one grid step processes one image pair.
# All refs are VMEM blocks; t1/t2/sa1/sa2/o1/o2 are (1, P, C)/(1, P, 1) views.
# --------------------------------------------------------------------------
def _coattention_kernel(t1_ref, t2_ref, sa1_ref, sa2_ref,
                        wq_ref, wk_ref, wv_ref, sv_ref, tv_ref,
                        wtop_ref, wbot_ref, so_ref, to_ref,
                        o1_ref, o2_ref):
    f32 = jnp.float32
    bf16 = jnp.bfloat16

    t1 = t1_ref[0]                                   # (P, C) f32
    t2 = t2_ref[0]
    t1b = t1.astype(bf16)
    t2b = t2.astype(bf16)

    # ---- 2-way pair softmax over the spatial-attention logits -> gates -----
    sa1 = sa1_ref[0]                                 # (P, 1) f32
    sa2 = sa2_ref[0]
    mg = jnp.maximum(sa1, sa2)
    e1 = jnp.exp(sa1 - mg)
    e2 = jnp.exp(sa2 - mg)
    ginv = pl.reciprocal(e1 + e2, approx=True)
    g1 = e1 * ginv                                   # (P, 1)
    g2 = e2 * ginv

    # ---- q / k / v 1x1 projections (kept in VMEM / vregs) ------------------
    q = jnp.dot(jnp.abs(t1 - t2).astype(bf16), wq_ref[...],
                preferred_element_type=f32)          # (P, Cq)
    k1 = jnp.dot(t1b, wk_ref[...], preferred_element_type=f32)
    k2 = jnp.dot(t2b, wk_ref[...], preferred_element_type=f32)
    sv = sv_ref[...]                                 # (1, C) folded-BN scale
    tv = tv_ref[...]                                 # (1, C) folded-BN shift
    v1 = jnp.maximum(jnp.dot(t1b, wv_ref[...],
                             preferred_element_type=f32) * sv + tv, 0.0)
    v2 = jnp.maximum(jnp.dot(t2b, wv_ref[...],
                             preferred_element_type=f32) * sv + tv, 0.0)

    # ---- co-attention: softmax over the [k1 ; k2] concat (never built) -----
    qb = q.astype(bf16)
    dn = (((1,), (1,)), ((), ()))                    # q @ k.T  (NT matmul)
    s1 = lax.dot_general(qb, k1.astype(bf16), dn, preferred_element_type=f32)
    s2 = lax.dot_general(qb, k2.astype(bf16), dn, preferred_element_type=f32)
    smax = jnp.maximum(jnp.max(s1, axis=-1, keepdims=True),
                       jnp.max(s2, axis=-1, keepdims=True))
    p1 = jnp.exp(s1 - smax)
    p2 = jnp.exp(s2 - smax)
    dinv = pl.reciprocal(jnp.sum(p1, axis=-1, keepdims=True)
                         + jnp.sum(p2, axis=-1, keepdims=True), approx=True)
    v_att = (jnp.dot(p1.astype(bf16), v1.astype(bf16),
                     preferred_element_type=f32)
             + jnp.dot(p2.astype(bf16), v2.astype(bf16),
                       preferred_element_type=f32)) * dinv        # (P, C)

    # ---- output 1x1 conv on [t, gate * v_att] without the channel concat ----
    wtop = wtop_ref[...]
    wbot = wbot_ref[...]
    so = so_ref[...]
    to = to_ref[...]
    y1 = (jnp.dot(t1b, wtop, preferred_element_type=f32)
          + jnp.dot((g1 * v_att).astype(bf16), wbot,
                    preferred_element_type=f32))
    y2 = (jnp.dot(t2b, wtop, preferred_element_type=f32)
          + jnp.dot((g2 * v_att).astype(bf16), wbot,
                    preferred_element_type=f32))
    o1_ref[0] = jnp.maximum(y1 * so + to, 0.0)
    o2_ref[0] = jnp.maximum(y2 * so + to, 0.0)


# --------------------------------------------------------------------------
# Full CoAttention forward (only layout glue + the tiny 3x3 conv is outside)
# --------------------------------------------------------------------------
def co_attention_forward(t_nchw, params):
    B, C, H, W = t_nchw.shape
    assert B % 2 == 0, "CoAttention expects an even batch (pairs of images)"
    B2 = B // 2
    P = H * W
    Cq = params["w_query"].shape[1]

    t_nhwc = jnp.transpose(t_nchw, (0, 2, 3, 1)).astype(jnp.float32)  # (B,H,W,C)

    # 3x3 (C -> 1) spatial-attention conv (same padding) — left to XLA.
    w_sa = params["w_sa"].reshape(3, 3, C, 1).astype(jnp.float32)     # HWIO
    sa = lax.conv_general_dilated(
        t_nhwc, w_sa, window_strides=(1, 1), padding="SAME",
        dimension_numbers=("NHWC", "HWIO", "NHWC"))
    sa = sa + params["b_sa"][0, 0]                                    # (B,H,W,1)

    t_flat = t_nhwc.reshape(B, P, C)
    sa_flat = sa.reshape(B, P, 1)

    bf16 = jnp.bfloat16
    wq = params["w_query"].astype(bf16)
    wk = params["w_key"].astype(bf16)
    wv = params["w_value"].astype(bf16)
    w_top = params["w_out"][:C].astype(bf16)          # multiplies t
    w_bot = params["w_out"][C:].astype(bf16)          # multiplies gate * v

    o1, o2 = pl.pallas_call(
        _coattention_kernel,
        out_shape=(
            jax.ShapeDtypeStruct((B2, P, C), jnp.float32),
            jax.ShapeDtypeStruct((B2, P, C), jnp.float32),
        ),
        grid=(B2,),
        in_specs=[
            # image i (first of the pair) and image i + B2 (second), flattened
            pl.BlockSpec((1, P, C), lambda i: (i, 0, 0)),
            pl.BlockSpec((1, P, C), lambda i: (i + B2, 0, 0)),
            pl.BlockSpec((1, P, 1), lambda i: (i, 0, 0)),       # sa logits 1
            pl.BlockSpec((1, P, 1), lambda i: (i + B2, 0, 0)),  # sa logits 2
            pl.BlockSpec((C, Cq), lambda i: (0, 0)),            # w_query
            pl.BlockSpec((C, Cq), lambda i: (0, 0)),            # w_key
            pl.BlockSpec((C, C), lambda i: (0, 0)),             # w_value
            pl.BlockSpec((1, C), lambda i: (0, 0)),             # BN scale (value)
            pl.BlockSpec((1, C), lambda i: (0, 0)),             # BN shift (value)
            pl.BlockSpec((C, C), lambda i: (0, 0)),             # w_out top half
            pl.BlockSpec((C, C), lambda i: (0, 0)),             # w_out bottom half
            pl.BlockSpec((1, C), lambda i: (0, 0)),             # BN scale (out)
            pl.BlockSpec((1, C), lambda i: (0, 0)),             # BN shift (out)
        ],
        out_specs=(
            pl.BlockSpec((1, P, C), lambda i: (i, 0, 0)),
            pl.BlockSpec((1, P, C), lambda i: (i, 0, 0)),
        ),
        compiler_params=pltpu.CompilerParams(
            dimension_semantics=("parallel",),
        ),
    )(t_flat, t_flat, sa_flat, sa_flat, wq, wk, wv,
      params["scale_value"], params["shift_value"], w_top, w_bot,
      params["scale_out"], params["shift_out"])

    out = jnp.concatenate([o1, o2], axis=0).reshape(B, H, W, C)
    return jnp.transpose(out, (0, 3, 1, 2))                     # (B, C, H, W)


# --------------------------------------------------------------------------
# Deterministic parameter init (shapes from the module's __init__)
# --------------------------------------------------------------------------
def init_params(key, C, ratio=4):
    Cq = C // ratio
    ks = jax.random.split(key, 8)
    eps = 1e-5

    def bn_fold(k, Co):
        ka, kb, kc, kd = jax.random.split(k, 4)
        gamma = 1.0 + 0.1 * jax.random.normal(ka, (Co,))
        beta = 0.1 * jax.random.normal(kb, (Co,))
        mean = 0.1 * jax.random.normal(kc, (Co,))
        var = 1.0 + 0.1 * jnp.abs(jax.random.normal(kd, (Co,)))
        scale = gamma / jnp.sqrt(var + eps)
        shift = beta - mean * scale
        return (scale.reshape(1, Co).astype(jnp.float32),
                shift.reshape(1, Co).astype(jnp.float32))

    scale_v, shift_v = bn_fold(ks[4], C)
    scale_o, shift_o = bn_fold(ks[5], C)
    return {
        # 1x1 conv weights stored as (Cin, Cout) matmul matrices
        "w_query": (0.1 * jax.random.normal(ks[0], (C, Cq))).astype(jnp.float32),
        "w_key":   (0.1 * jax.random.normal(ks[1], (C, Cq))).astype(jnp.float32),
        "w_value": (0.1 * jax.random.normal(ks[2], (C, C))).astype(jnp.float32),
        "w_out":   (0.1 * jax.random.normal(ks[3], (2 * C, C))).astype(jnp.float32),
        # 3x3 conv (C -> 1) weight as (3, 3, C), bias as (1, 1) scalar
        "w_sa":    (0.1 * jax.random.normal(ks[6], (3, 3, C))).astype(jnp.float32),
        "b_sa":    (0.1 * jax.random.normal(ks[7], (1, 1))).astype(jnp.float32),
        "scale_value": scale_v, "shift_value": shift_v,
        "scale_out": scale_o, "shift_out": shift_o,
    }


if __name__ == "__main__":
    # in_ch=32, ratio=4 -> Cq=8; batch of 2 image pairs, 16x16 spatial.
    B, C, H, W = 4, 32, 16, 16
    key = jax.random.PRNGKey(0)
    kx, kp = jax.random.split(key)
    t = jax.random.normal(kx, (B, C, H, W), dtype=jnp.float32)
    params = init_params(kp, C, ratio=4)

    fwd = jax.jit(lambda x: co_attention_forward(x, params))
    out = jax.block_until_ready(fwd(t))

    assert out.shape == (B, C, H, W)
    assert jnp.all(jnp.isfinite(out))
    print("KERNEL_OK")
</pallas_src>

<mosaic_0001>
module attributes {stable_mosaic.version = 11 : i64} {
  func.func @_coattention_kernel(%arg0: i32, %arg1: memref<1x256x32xf32, #tpu.memory_space<vmem>>, %arg2: memref<1x256x32xf32, #tpu.memory_space<vmem>>, %arg3: memref<1x256x1xf32, #tpu.memory_space<vmem>>, %arg4: memref<1x256x1xf32, #tpu.memory_space<vmem>>, %arg5: memref<32x8xbf16, #tpu.memory_space<vmem>>, %arg6: memref<32x8xbf16, #tpu.memory_space<vmem>>, %arg7: memref<32x32xbf16, #tpu.memory_space<vmem>>, %arg8: memref<1x32xf32, #tpu.memory_space<vmem>>, %arg9: memref<1x32xf32, #tpu.memory_space<vmem>>, %arg10: memref<32x32xbf16, #tpu.memory_space<vmem>>, %arg11: memref<32x32xbf16, #tpu.memory_space<vmem>>, %arg12: memref<1x32xf32, #tpu.memory_space<vmem>>, %arg13: memref<1x32xf32, #tpu.memory_space<vmem>>, %arg14: memref<1x256x32xf32, #tpu.memory_space<vmem>>, %arg15: memref<1x256x32xf32, #tpu.memory_space<vmem>>) attributes {dimension_semantics = [#tpu.dimension_semantics<parallel>], iteration_bounds = array<i64: 2>, scalar_prefetch = 0 : i64, scratch_operands = 0 : i64, tpu.core_type = #tpu.core_type<tc>, window_params = [{transform_indices = @transform_0, window_bounds = array<i64: 1, 256, 32>}, {transform_indices = @transform_1, window_bounds = array<i64: 1, 256, 32>}, {transform_indices = @transform_2, window_bounds = array<i64: 1, 256, 1>}, {transform_indices = @transform_3, window_bounds = array<i64: 1, 256, 1>}, {pipeline_mode = #tpu.pipeline_mode<synchronous>, transform_indices = @transform_4, window_bounds = array<i64: 32, 8>}, {pipeline_mode = #tpu.pipeline_mode<synchronous>, transform_indices = @transform_5, window_bounds = array<i64: 32, 8>}, {pipeline_mode = #tpu.pipeline_mode<synchronous>, transform_indices = @transform_6, window_bounds = array<i64: 32, 32>}, {pipeline_mode = #tpu.pipeline_mode<synchronous>, transform_indices = @transform_7, window_bounds = array<i64: 1, 32>}, {pipeline_mode = #tpu.pipeline_mode<synchronous>, transform_indices = @transform_8, window_bounds = array<i64: 1, 32>}, {pipeline_mode = #tpu.pipeline_mode<synchronous>, transform_indices = @transform_9, window_bounds = array<i64: 32, 32>}, {pipeline_mode = #tpu.pipeline_mode<synchronous>, transform_indices = @transform_10, window_bounds = array<i64: 32, 32>}, {pipeline_mode = #tpu.pipeline_mode<synchronous>, transform_indices = @transform_11, window_bounds = array<i64: 1, 32>}, {pipeline_mode = #tpu.pipeline_mode<synchronous>, transform_indices = @transform_12, window_bounds = array<i64: 1, 32>}, {transform_indices = @transform_13, window_bounds = array<i64: 1, 256, 32>}, {transform_indices = @transform_14, window_bounds = array<i64: 1, 256, 32>}]} {
    %c0 = arith.constant 0 : index
    %c0_0 = arith.constant 0 : index
    %c0_1 = arith.constant 0 : index
    %0 = vector.load %arg1[%c0, %c0_0, %c0_1] : memref<1x256x32xf32, #tpu.memory_space<vmem>>, vector<1x256x32xf32>
    %1 = vector.shape_cast %0 : vector<1x256x32xf32> to vector<256x32xf32>
    %c0_2 = arith.constant 0 : index
    %c0_3 = arith.constant 0 : index
    %c0_4 = arith.constant 0 : index
    %2 = vector.load %arg2[%c0_2, %c0_3, %c0_4] : memref<1x256x32xf32, #tpu.memory_space<vmem>>, vector<1x256x32xf32>
    %3 = vector.shape_cast %2 : vector<1x256x32xf32> to vector<256x32xf32>
    %4 = arith.truncf %1 : vector<256x32xf32> to vector<256x32xbf16>
    %5 = arith.truncf %3 : vector<256x32xf32> to vector<256x32xbf16>
    %c0_5 = arith.constant 0 : index
    %c0_6 = arith.constant 0 : index
    %c0_7 = arith.constant 0 : index
    %6 = vector.load %arg3[%c0_5, %c0_6, %c0_7] : memref<1x256x1xf32, #tpu.memory_space<vmem>>, vector<1x256x1xf32>
    %7 = vector.shape_cast %6 : vector<1x256x1xf32> to vector<256x1xf32>
    %c0_8 = arith.constant 0 : index
    %c0_9 = arith.constant 0 : index
    %c0_10 = arith.constant 0 : index
    %8 = vector.load %arg4[%c0_8, %c0_9, %c0_10] : memref<1x256x1xf32, #tpu.memory_space<vmem>>, vector<1x256x1xf32>
    %9 = vector.shape_cast %8 : vector<1x256x1xf32> to vector<256x1xf32>
    %10 = arith.maximumf %7, %9 : vector<256x1xf32>
    %11 = arith.subf %7, %10 : vector<256x1xf32>
    %12 = math.exp %11 : vector<256x1xf32>
    %13 = arith.subf %9, %10 : vector<256x1xf32>
    %14 = math.exp %13 : vector<256x1xf32>
    %15 = arith.addf %12, %14 : vector<256x1xf32>
    %16 = tpu.reciprocal %15 {approx = true} : vector<256x1xf32> -> vector<256x1xf32>
    %17 = arith.mulf %12, %16 : vector<256x1xf32>
    %18 = arith.mulf %14, %16 : vector<256x1xf32>
    %19 = arith.subf %1, %3 : vector<256x32xf32>
    %20 = math.absf %19 : vector<256x32xf32>
    %21 = arith.truncf %20 : vector<256x32xf32> to vector<256x32xbf16>
    %c0_11 = arith.constant 0 : index
    %c0_12 = arith.constant 0 : index
    %22 = vector.load %arg5[%c0_11, %c0_12] : memref<32x8xbf16, #tpu.memory_space<vmem>>, vector<32x8xbf16>
    %cst = arith.constant dense<0.000000e+00> : vector<256x8xf32>
    %23 = tpu.matmul %21, %22, %cst {dimension_numbers = #tpu.dot_dimension_numbers<[1], [0], [0], [1], [0, 0, 1, 1], [], []>} : vector<256x32xbf16>, vector<32x8xbf16>, vector<256x8xf32> -> vector<256x8xf32>
    %c0_13 = arith.constant 0 : index
    %c0_14 = arith.constant 0 : index
    %24 = vector.load %arg6[%c0_13, %c0_14] : memref<32x8xbf16, #tpu.memory_space<vmem>>, vector<32x8xbf16>
    %cst_15 = arith.constant dense<0.000000e+00> : vector<256x8xf32>
    %25 = tpu.matmul %4, %24, %cst_15 {dimension_numbers = #tpu.dot_dimension_numbers<[1], [0], [0], [1], [0, 0, 1, 1], [], []>} : vector<256x32xbf16>, vector<32x8xbf16>, vector<256x8xf32> -> vector<256x8xf32>
    %c0_16 = arith.constant 0 : index
    %c0_17 = arith.constant 0 : index
    %26 = vector.load %arg6[%c0_16, %c0_17] : memref<32x8xbf16, #tpu.memory_space<vmem>>, vector<32x8xbf16>
    %cst_18 = arith.constant dense<0.000000e+00> : vector<256x8xf32>
    %27 = tpu.matmul %5, %26, %cst_18 {dimension_numbers = #tpu.dot_dimension_numbers<[1], [0], [0], [1], [0, 0, 1, 1], [], []>} : vector<256x32xbf16>, vector<32x8xbf16>, vector<256x8xf32> -> vector<256x8xf32>
    %c0_19 = arith.constant 0 : index
    %c0_20 = arith.constant 0 : index
    %28 = vector.load %arg8[%c0_19, %c0_20] : memref<1x32xf32, #tpu.memory_space<vmem>>, vector<1x32xf32>
    %c0_21 = arith.constant 0 : index
    %c0_22 = arith.constant 0 : index
    %29 = vector.load %arg9[%c0_21, %c0_22] : memref<1x32xf32, #tpu.memory_space<vmem>>, vector<1x32xf32>
    %c0_23 = arith.constant 0 : index
    %c0_24 = arith.constant 0 : index
    %30 = vector.load %arg7[%c0_23, %c0_24] : memref<32x32xbf16, #tpu.memory_space<vmem>>, vector<32x32xbf16>
    %cst_25 = arith.constant dense<0.000000e+00> : vector<256x32xf32>
    %31 = tpu.matmul %4, %30, %cst_25 {dimension_numbers = #tpu.dot_dimension_numbers<[1], [0], [0], [1], [0, 0, 1, 1], [], []>} : vector<256x32xbf16>, vector<32x32xbf16>, vector<256x32xf32> -> vector<256x32xf32>
    %32 = vector.broadcast %28 : vector<1x32xf32> to vector<256x32xf32>
    %33 = arith.mulf %31, %32 : vector<256x32xf32>
    %34 = vector.broadcast %29 : vector<1x32xf32> to vector<256x32xf32>
    %35 = arith.addf %33, %34 : vector<256x32xf32>
    %cst_26 = arith.constant 0.000000e+00 : f32
    %36 = vector.broadcast %cst_26 : f32 to vector<256x32xf32>
    %37 = arith.maximumf %35, %36 : vector<256x32xf32>
    %c0_27 = arith.constant 0 : index
    %c0_28 = arith.constant 0 : index
    %38 = vector.load %arg7[%c0_27, %c0_28] : memref<32x32xbf16, #tpu.memory_space<vmem>>, vector<32x32xbf16>
    %cst_29 = arith.constant dense<0.000000e+00> : vector<256x32xf32>
    %39 = tpu.matmul %5, %38, %cst_29 {dimension_numbers = #tpu.dot_dimension_numbers<[1], [0], [0], [1], [0, 0, 1, 1], [], []>} : vector<256x32xbf16>, vector<32x32xbf16>, vector<256x32xf32> -> vector<256x32xf32>
    %40 = vector.broadcast %28 : vector<1x32xf32> to vector<256x32xf32>
    %41 = arith.mulf %39, %40 : vector<256x32xf32>
    %42 = vector.broadcast %29 : vector<1x32xf32> to vector<256x32xf32>
    %43 = arith.addf %41, %42 : vector<256x32xf32>
    %cst_30 = arith.constant 0.000000e+00 : f32
    %44 = vector.broadcast %cst_30 : f32 to vector<256x32xf32>
    %45 = arith.maximumf %43, %44 : vector<256x32xf32>
    %46 = arith.truncf %23 : vector<256x8xf32> to vector<256x8xbf16>
    %47 = arith.truncf %25 : vector<256x8xf32> to vector<256x8xbf16>
    %cst_31 = arith.constant dense<0.000000e+00> : vector<256x256xf32>
    %48 = tpu.matmul %46, %47, %cst_31 {dimension_numbers = #tpu.dot_dimension_numbers<[1], [1], [0], [0], [0, 0, 1, 0], [], []>} : vector<256x8xbf16>, vector<256x8xbf16>, vector<256x256xf32> -> vector<256x256xf32>
    %49 = arith.truncf %27 : vector<256x8xf32> to vector<256x8xbf16>
    %cst_32 = arith.constant dense<0.000000e+00> : vector<256x256xf32>
    %50 = tpu.matmul %46, %49, %cst_32 {dimension_numbers = #tpu.dot_dimension_numbers<[1], [1], [0], [0], [0, 0, 1, 0], [], []>} : vector<256x8xbf16>, vector<256x8xbf16>, vector<256x256xf32> -> vector<256x256xf32>
    %cst_33 = arith.constant dense<0xFF800000> : vector<256xf32>
    %51 = vector.multi_reduction <maximumf>, %48, %cst_33 [1] : vector<256x256xf32> to vector<256xf32>
    %52 = vector.shape_cast %51 : vector<256xf32> to vector<256x1xf32>
    %cst_34 = arith.constant dense<0xFF800000> : vector<256xf32>
    %53 = vector.multi_reduction <maximumf>, %50, %cst_34 [1] : vector<256x256xf32> to vector<256xf32>
    %54 = vector.shape_cast %53 : vector<256xf32> to vector<256x1xf32>
    %55 = arith.maximumf %52, %54 : vector<256x1xf32>
    %56 = vector.broadcast %55 : vector<256x1xf32> to vector<256x256xf32>
    %57 = arith.subf %48, %56 : vector<256x256xf32>
    %58 = math.exp %57 : vector<256x256xf32>
    %59 = vector.broadcast %55 : vector<256x1xf32> to vector<256x256xf32>
    %60 = arith.subf %50, %59 : vector<256x256xf32>
    %61 = math.exp %60 : vector<256x256xf32>
    %cst_35 = arith.constant dense<0.000000e+00> : vector<256xf32>
    %62 = vector.multi_reduction <add>, %58, %cst_35 [1] : vector<256x256xf32> to vector<256xf32>
    %63 = vector.shape_cast %62 : vector<256xf32> to vector<256x1xf32>
    %cst_36 = arith.constant dense<0.000000e+00> : vector<256xf32>
    %64 = vector.multi_reduction <add>, %61, %cst_36 [1] : vector<256x256xf32> to vector<256xf32>
    %65 = vector.shape_cast %64 : vector<256xf32> to vector<256x1xf32>
    %66 = arith.addf %63, %65 : vector<256x1xf32>
    %67 = tpu.reciprocal %66 {approx = true} : vector<256x1xf32> -> vector<256x1xf32>
    %68 = arith.truncf %58 : vector<256x256xf32> to vector<256x256xbf16>
    %69 = arith.truncf %37 : vector<256x32xf32> to vector<256x32xbf16>
    %cst_37 = arith.constant dense<0.000000e+00> : vector<256x32xf32>
    %70 = tpu.matmul %68, %69, %cst_37 {dimension_numbers = #tpu.dot_dimension_numbers<[1], [0], [0], [1], [0, 0, 1, 1], [], []>} : vector<256x256xbf16>, vector<256x32xbf16>, vector<256x32xf32> -> vector<256x32xf32>
    %71 = arith.truncf %61 : vector<256x256xf32> to vector<256x256xbf16>
    %72 = arith.truncf %45 : vector<256x32xf32> to vector<256x32xbf16>
    %cst_38 = arith.constant dense<0.000000e+00> : vector<256x32xf32>
    %73 = tpu.matmul %71, %72, %cst_38 {dimension_numbers = #tpu.dot_dimension_numbers<[1], [0], [0], [1], [0, 0, 1, 1], [], []>} : vector<256x256xbf16>, vector<256x32xbf16>, vector<256x32xf32> -> vector<256x32xf32>
    %74 = arith.addf %70, %73 : vector<256x32xf32>
    %75 = vector.broadcast %67 : vector<256x1xf32> to vector<256x32xf32>
    %76 = arith.mulf %74, %75 : vector<256x32xf32>
    %c0_39 = arith.constant 0 : index
    %c0_40 = arith.constant 0 : index
    %77 = vector.load %arg10[%c0_39, %c0_40] : memref<32x32xbf16, #tpu.memory_space<vmem>>, vector<32x32xbf16>
    %c0_41 = arith.constant 0 : index
    %c0_42 = arith.constant 0 : index
    %78 = vector.load %arg11[%c0_41, %c0_42] : memref<32x32xbf16, #tpu.memory_space<vmem>>, vector<32x32xbf16>
    %c0_43 = arith.constant 0 : index
    %c0_44 = arith.constant 0 : index
    %79 = vector.load %arg12[%c0_43, %c0_44] : memref<1x32xf32, #tpu.memory_space<vmem>>, vector<1x32xf32>
    %c0_45 = arith.constant 0 : index
    %c0_46 = arith.constant 0 : index
    %80 = vector.load %arg13[%c0_45, %c0_46] : memref<1x32xf32, #tpu.memory_space<vmem>>, vector<1x32xf32>
    %cst_47 = arith.constant dense<0.000000e+00> : vector<256x32xf32>
    %81 = tpu.matmul %4, %77, %cst_47 {dimension_numbers = #tpu.dot_dimension_numbers<[1], [0], [0], [1], [0, 0, 1, 1], [], []>} : vector<256x32xbf16>, vector<32x32xbf16>, vector<256x32xf32> -> vector<256x32xf32>
    %82 = vector.broadcast %17 : vector<256x1xf32> to vector<256x32xf32>
    %83 = arith.mulf %82, %76 : vector<256x32xf32>
    %84 = arith.truncf %83 : vector<256x32xf32> to vector<256x32xbf16>
    %cst_48 = arith.constant dense<0.000000e+00> : vector<256x32xf32>
    %85 = tpu.matmul %84, %78, %cst_48 {dimension_numbers = #tpu.dot_dimension_numbers<[1], [0], [0], [1], [0, 0, 1, 1], [], []>} : vector<256x32xbf16>, vector<32x32xbf16>, vector<256x32xf32> -> vector<256x32xf32>
    %86 = arith.addf %81, %85 : vector<256x32xf32>
    %cst_49 = arith.constant dense<0.000000e+00> : vector<256x32xf32>
    %87 = tpu.matmul %5, %77, %cst_49 {dimension_numbers = #tpu.dot_dimension_numbers<[1], [0], [0], [1], [0, 0, 1, 1], [], []>} : vector<256x32xbf16>, vector<32x32xbf16>, vector<256x32xf32> -> vector<256x32xf32>
    %88 = vector.broadcast %18 : vector<256x1xf32> to vector<256x32xf32>
    %89 = arith.mulf %88, %76 : vector<256x32xf32>
    %90 = arith.truncf %89 : vector<256x32xf32> to vector<256x32xbf16>
    %cst_50 = arith.constant dense<0.000000e+00> : vector<256x32xf32>
    %91 = tpu.matmul %90, %78, %cst_50 {dimension_numbers = #tpu.dot_dimension_numbers<[1], [0], [0], [1], [0, 0, 1, 1], [], []>} : vector<256x32xbf16>, vector<32x32xbf16>, vector<256x32xf32> -> vector<256x32xf32>
    %92 = arith.addf %87, %91 : vector<256x32xf32>
    %93 = vector.broadcast %79 : vector<1x32xf32> to vector<256x32xf32>
    %94 = arith.mulf %86, %93 : vector<256x32xf32>
    %95 = vector.broadcast %80 : vector<1x32xf32> to vector<256x32xf32>
    %96 = arith.addf %94, %95 : vector<256x32xf32>
    %cst_51 = arith.constant 0.000000e+00 : f32
    %97 = vector.broadcast %cst_51 : f32 to vector<256x32xf32>
    %98 = arith.maximumf %96, %97 : vector<256x32xf32>
    %c0_52 = arith.constant 0 : index
    %c0_53 = arith.constant 0 : index
    %c0_54 = arith.constant 0 : index
    %99 = vector.load %arg14[%c0_52, %c0_53, %c0_54] : memref<1x256x32xf32, #tpu.memory_space<vmem>>, vector<1x256x32xf32>
    %100 = vector.shape_cast %99 : vector<1x256x32xf32> to vector<256x32xf32>
    %101 = vector.shape_cast %98 : vector<256x32xf32> to vector<1x256x32xf32>
    tpu.vector_store %arg14[%c0_52, %c0_53, %c0_54], %101 {strides = array<i32>} : memref<1x256x32xf32, #tpu.memory_space<vmem>>, vector<1x256x32xf32>,
    %102 = vector.broadcast %79 : vector<1x32xf32> to vector<256x32xf32>
    %103 = arith.mulf %92, %102 : vector<256x32xf32>
    %104 = vector.broadcast %80 : vector<1x32xf32> to vector<256x32xf32>
    %105 = arith.addf %103, %104 : vector<256x32xf32>
    %cst_55 = arith.constant 0.000000e+00 : f32
    %106 = vector.broadcast %cst_55 : f32 to vector<256x32xf32>
    %107 = arith.maximumf %105, %106 : vector<256x32xf32>
    %c0_56 = arith.constant 0 : index
    %c0_57 = arith.constant 0 : index
    %c0_58 = arith.constant 0 : index
    %108 = vector.load %arg15[%c0_56, %c0_57, %c0_58] : memref<1x256x32xf32, #tpu.memory_space<vmem>>, vector<1x256x32xf32>
    %109 = vector.shape_cast %108 : vector<1x256x32xf32> to vector<256x32xf32>
    %110 = vector.shape_cast %107 : vector<256x32xf32> to vector<1x256x32xf32>
    tpu.vector_store %arg15[%c0_56, %c0_57, %c0_58], %110 {strides = array<i32>} : memref<1x256x32xf32, #tpu.memory_space<vmem>>, vector<1x256x32xf32>,
    return
  }
  func.func @transform_0(%arg0: i32) -> (i32, i32, i32) {
    %c0_i32 = arith.constant 0 : i32
    %c0_i32_0 = arith.constant 0 : i32
    %c0_i32_1 = arith.constant 0 : i32
    return %arg0, %c0_i32, %c0_i32_0 : i32, i32, i32
  }
  func.func @transform_1(%arg0: i32) -> (i32, i32, i32) {
    %c2_i32 = arith.constant 2 : i32
    %0 = arith.addi %arg0, %c2_i32 : i32
    %c0_i32 = arith.constant 0 : i32
    %c0_i32_0 = arith.constant 0 : i32
    %c0_i32_1 = arith.constant 0 : i32
    return %0, %c0_i32, %c0_i32_0 : i32, i32, i32
  }
  func.func @transform_2(%arg0: i32) -> (i32, i32, i32) {
    %c0_i32 = arith.constant 0 : i32
    %c0_i32_0 = arith.constant 0 : i32
    %c0_i32_1 = arith.constant 0 : i32
    return %arg0, %c0_i32, %c0_i32_0 : i32, i32, i32
  }
  func.func @transform_3(%arg0: i32) -> (i32, i32, i32) {
    %c2_i32 = arith.constant 2 : i32
    %0 = arith.addi %arg0, %c2_i32 : i32
    %c0_i32 = arith.constant 0 : i32
    %c0_i32_0 = arith.constant 0 : i32
    %c0_i32_1 = arith.constant 0 : i32
    return %0, %c0_i32, %c0_i32_0 : i32, i32, i32
  }
  func.func @transform_4(%arg0: i32) -> (i32, i32) {
    %c0_i32 = arith.constant 0 : i32
    %c0_i32_0 = arith.constant 0 : i32
    %c0_i32_1 = arith.constant 0 : i32
    return %c0_i32, %c0_i32_0 : i32, i32
  }
  func.func @transform_5(%arg0: i32) -> (i32, i32) {
    %c0_i32 = arith.constant 0 : i32
    %c0_i32_0 = arith.constant 0 : i32
    %c0_i32_1 = arith.constant 0 : i32
    return %c0_i32, %c0_i32_0 : i32, i32
  }
  func.func @transform_6(%arg0: i32) -> (i32, i32) {
    %c0_i32 = arith.constant 0 : i32
    %c0_i32_0 = arith.constant 0 : i32
    %c0_i32_1 = arith.constant 0 : i32
    return %c0_i32, %c0_i32_0 : i32, i32
  }
  func.func @transform_7(%arg0: i32) -> (i32, i32) {
    %c0_i32 = arith.constant 0 : i32
    %c0_i32_0 = arith.constant 0 : i32
    %c0_i32_1 = arith.constant 0 : i32
    return %c0_i32, %c0_i32_0 : i32, i32
  }
  func.func @transform_8(%arg0: i32) -> (i32, i32) {
    %c0_i32 = arith.constant 0 : i32
    %c0_i32_0 = arith.constant 0 : i32
    %c0_i32_1 = arith.constant 0 : i32
    return %c0_i32, %c0_i32_0 : i32, i32
  }
  func.func @transform_9(%arg0: i32) -> (i32, i32) {
    %c0_i32 = arith.constant 0 : i32
    %c0_i32_0 = arith.constant 0 : i32
    %c0_i32_1 = arith.constant 0 : i32
    return %c0_i32, %c0_i32_0 : i32, i32
  }
  func.func @transform_10(%arg0: i32) -> (i32, i32) {
    %c0_i32 = arith.constant 0 : i32
    %c0_i32_0 = arith.constant 0 : i32
    %c0_i32_1 = arith.constant 0 : i32
    return %c0_i32, %c0_i32_0 : i32, i32
  }
  func.func @transform_11(%arg0: i32) -> (i32, i32) {
    %c0_i32 = arith.constant 0 : i32
    %c0_i32_0 = arith.constant 0 : i32
    %c0_i32_1 = arith.constant 0 : i32
    return %c0_i32, %c0_i32_0 : i32, i32
  }
  func.func @transform_12(%arg0: i32) -> (i32, i32) {
    %c0_i32 = arith.constant 0 : i32
    %c0_i32_0 = arith.constant 0 : i32
    %c0_i32_1 = arith.constant 0 : i32
    return %c0_i32, %c0_i32_0 : i32, i32
  }
  func.func @transform_13(%arg0: i32) -> (i32, i32, i32) {
    %c0_i32 = arith.constant 0 : i32
    %c0_i32_0 = arith.constant 0 : i32
    %c0_i32_1 = arith.constant 0 : i32
    return %arg0, %c0_i32, %c0_i32_0 : i32, i32, i32
  }
  func.func @transform_14(%arg0: i32) -> (i32, i32, i32) {
    %c0_i32 = arith.constant 0 : i32
    %c0_i32_0 = arith.constant 0 : i32
    %c0_i32_1 = arith.constant 0 : i32
    return %arg0, %c0_i32, %c0_i32_0 : i32, i32, i32
  }
}

</mosaic_0001>

<bundles_post_ra>
// kernel: _lambda_.1
= control target key start
LH: loop header
LB: loop body
LE: loop exit
PB: predicated region body
PF: predicated region fallthrough
CT: control target
= control target key end

     0   :  { %s7549_s29 = smov 0   ;;  %s11004_s0 = inlined_call_operand.vmem [shape: f32[4,256,32], index: 0, kind: input, shape index: {}, may-alias: {0,1}]   ;;  %s11005_s1 = inlined_call_operand.vmem [shape: f32[4,256,32], index: 1, kind: input, shape index: {}, may-alias: {0,1}]   ;;  %s11006_s2 = inlined_call_operand.vmem [shape: f32[4,256,1], index: 2, kind: input, shape index: {}, may-alias: {2,3}]   ;;  %s11007_s3 = inlined_call_operand.vmem [shape: f32[4,256,1], index: 3, kind: input, shape index: {}, may-alias: {2,3}]   ;;  %s11008_s4 = inlined_call_operand.vmem [shape: bf16[32,8], index: 4, kind: input, shape index: {}]   ;;  %s11009_s5 = inlined_call_operand.vmem [shape: bf16[32,8], index: 5, kind: input, shape index: {}]   ;;  %s11010_s6 = inlined_call_operand.vmem [shape: bf16[32,32], index: 6, kind: input, shape index: {}]   ;;  %s11011_s7 = inlined_call_operand.vmem [shape: f32[1,32], index: 7, kind: input, shape index: {}]   ;;  %s11012_s8 = inlined_call_operand.vmem [shape: f32[1,32], index: 8, kind: input, shape index: {}]   ;;  %s11013_s9 = inlined_call_operand.vmem [shape: bf16[32,32], index: 9, kind: input, shape index: {}]   ;;  %s11014_s10 = inlined_call_operand.vmem [shape: bf16[32,32], index: 10, kind: input, shape index: {}]   ;;  %s11015_s11 = inlined_call_operand.vmem [shape: f32[1,32], index: 11, kind: input, shape index: {}]   ;;  %s11016_s12 = inlined_call_operand.vmem [shape: f32[1,32], index: 12, kind: input, shape index: {}]   ;;  %s11017_s13 = inlined_call_operand.vmem [shape: f32[2,256,32], index: 13, kind: output, shape index: {0}]   ;;  %s11018_s14 = inlined_call_operand.vmem [shape: f32[2,256,32], index: 14, kind: output, shape index: {1}]  }
   0x1 LB: > { %s7555_s30 = sadd.s32 4294967295, %s7471_s29   ;;  %p5831_p0 = scmp.ge.s32.totalorder %s7471_s29, 1  ;;  %s7471_s29 = sphi %s7549_s29, %s25_s29  }
   0x2   : > { %p453_p1 = scmp.lt.s32.totalorder %s7471_s29, 3 }
   0x4   : > { %p454_p2 = pnand %p5831_p0, %p453_p1 }
   0x6   : > { %457 = sbr.rel (%p454_p2) target bundleno = 1448 (0x5a8), region = 72 }
   0xd   : > { %v6943_v0 = vld [vmem:[%s11008_s4] sm:$0xff]   ;;  %p521_p3 = scmp.lt.s32.totalorder %s7555_s30, 3  ;;  %v6944_v1 = vld [vmem:[%s11008_s4 + $0x8] sm:$0xff]   ;;  %s526_s19 = sadd.s32 2, %s7555_s30  ;;  %vm1164_vm0 = vcmask 261120   ;;  %vm2384_vm1 = vcmask 64512  }
   0xe   : > { %6524 = vmatprep.subr.bf16.mxu0 %v6943_v0  ;;  %6848 = vmatprep.subr.bf16.mxu1 %v6943_v0  ;;  %p527_p4 = scmp.lt.s32.totalorder %s526_s19, 3  ;;  %v7574_v2 = vld [vmem:[%s11009_s5] sm:$0xff]   ;;  %v7697_v54 = vld [vmem:[%s11009_s5 + $0x8] sm:$0xff]   ;;  %p545_p5 = scmp.lt.s32.totalorder %s7555_s30, 1 }
   0xf   : > { %s7568_s20 = scalar_select %p521_p3, %s7555_s30, 3  ;;  %6525 = vmatpush3.bf16.msra.mxu0 %v6943_v0  ;;  %6850 = vmatpush3.bf16.msra.mxu1 %v6943_v0 }
  0x10   : > { %6526 = vmatprep.subr.bf16.mxu0 %v6944_v1  ;;  %6849 = vmatprep.subr.bf16.mxu1 %v6944_v1  ;;  %s11778_s19 = smov (!%p527_p4, %s526_s19), 3  ;;  %s11780_s30 = smov (!%p545_p5, %s7555_s30), 1 }
  0x11   : > { %s6036_s21 = sshll.u32 %s7568_s20, 8  ;;  %s6037_s27 = sshll.u32 %s11778_s19, 8 }
  0x12   : > { %s7581_s26 = scalar_lea.vmem %s11004_s0, %s6036_s21  ;;  %s7610_s16 = scalar_lea.vmem %s11005_s1, %s6037_s27 }
  0x13   : > { %v7586_v3 = vld [vmem:[%s7581_s26] sm:$0xff]  ;;  %6527 = vmatpush3.bf16.msra.mxu0 %v6944_v1  ;;  %6851 = vmatpush3.bf16.msra.mxu1 %v6944_v1  ;;  %v7589_v4 = vld [vmem:[%s7581_s26 + $0x8] sm:$0xff]  ;;  %v7599_v7 = vld [vmem:[%s7581_s26 + $0x10] sm:$0xff]  ;;  %s8099_s15 = scalar_lea.vmem %s11006_s2, %s6036_s21  ;;  %s8106_s18 = scalar_lea.vmem %s11007_s3, %s6037_s27 }
  0x14   : > { %v7592_v5 = vld [vmem:[%s7581_s26 + $0x80] sm:$0xff]  ;;  %v7595_v6 = vld [vmem:[%s7581_s26 + $0x88] sm:$0xff]  ;;  %v574_v8 = vld [vmem:[%s7581_s26 + $0x90] sm:$0xff]  ;;  %6560 = vmatprep.subr.bf16.mxu1 %v7574_v2  ;;  %6596 = vmatprep.subr.bf16.mxu0 %v7574_v2  ;;  %s6040_s21 = sshll.u32 %s11780_s30, 8 }
  0x15   : > { %11230 = vst [vmem:[#allocation2_spill] sm:$0xff] %v7592_v5  ;;  %11231 = vst [vmem:[#allocation3_spill] sm:$0xff] %v7595_v6  ;;  %v575_v9 = vld [vmem:[%s7581_s26 + $0x98] sm:$0xff]  ;;  %v576_v11 = vld [vmem:[%s7581_s26 + $0xa0] sm:$0xff]  ;;  %s10746_s22 = scalar_lea.vmem %s11017_s13, %s6040_s21  ;;  %s10751_s25 = scalar_lea.vmem %s11018_s14, %s6040_s21 }
  0x16   : > { %v7613_v10 = vld [vmem:[%s7581_s26 + $0x18] sm:$0xff]  ;;  %v577_v12 = vld [vmem:[%s7581_s26 + $0xa8] sm:$0xff]  ;;  %v7617_v13 = vpack.c.bf16 %v575_v9, %v574_v8  ;;  %v7620_v14 = vld [vmem:[%s7610_s16] sm:$0xff] }
  0x17   : > { %v7623_v15 = vld [vmem:[%s7610_s16 + $0x8] sm:$0xff]  ;;  %v7626_v16 = vld [vmem:[%s7610_s16 + $0x80] sm:$0xff]  ;;  %v7634_v19 = vpack.c.bf16 %v577_v12, %v576_v11  ;;  %v1068_v20 = vsub.f32 %v7586_v3, %v7620_v14  ;;  %v7646_v24 = vld [vmem:[%s7610_s16 + $0x10] sm:$0xff] }
  0x18   : > { %11232 = vst [vmem:[#allocation4_spill] sm:$0xff] %v7617_v13  ;;  %11233 = vst [vmem:[#allocation5_spill] sm:$0xff] %v7626_v16  ;;  %v7629_v17 = vld [vmem:[%s7581_s26 + $0x20] sm:$0xff]  ;;  %v7632_v18 = vld [vmem:[%s7581_s26 + $0x28] sm:$0xff]  ;;  %v1069_v21 = vsub.f32 %v7589_v4, %v7623_v15  ;;  %v1084_v23 = vsub.f32 %v7592_v5, %v7626_v16  ;;  %v1070_v27 = vsub.f32 %v7599_v7, %v7646_v24 }
  0x19   : > { %11234 = vst [vmem:[#allocation6_spill] sm:$0xff] %v7634_v19  ;;  %v7641_v22 = vld [vmem:[%s7610_s16 + $0x88] sm:$0xff]  ;;  %v7649_v25 = vld [vmem:[%s7610_s16 + $0x18] sm:$0xff]  ;;  %v7656_v28 = vld [vmem:[%s7610_s16 + $0x90] sm:$0xff]  ;;  %v1100_v31 = vand.u32 2147483647, %v1068_v20 }
  0x1a   : > { %11235 = vst [vmem:[#allocation7_spill] sm:$0xff] %v7641_v22  ;;  %v1085_v26 = vsub.f32 %v7595_v6, %v7641_v22  ;;  %v7659_v29 = vld [vmem:[%s7610_s16 + $0x98] sm:$0xff]  ;;  %v7662_v30 = vld [vmem:[%s7610_s16 + $0x20] sm:$0xff]  ;;  %v1101_v32 = vand.u32 2147483647, %v1069_v21  ;;  %v1071_v34 = vsub.f32 %v7613_v10, %v7649_v25  ;;  %v1086_v37 = vsub.f32 %v574_v8, %v7656_v28  ;;  %v7669_v39 = vld [vmem:[%s7610_s16 + $0x28] sm:$0xff] }
  0x1b   : > { %v1116_v33 = vand.u32 2147483647, %v1084_v23  ;;  %v1102_v36 = vand.u32 2147483647, %v1070_v27  ;;  %v1087_v38 = vsub.f32 %v575_v9, %v7659_v29  ;;  %v7672_v40 = vld [vmem:[%s7610_s16 + $0xa0] sm:$0xff]  ;;  %v1072_v43 = vsub.f32 %v7629_v17, %v7662_v30  ;;  %v7679_v45 = vld [vmem:[%s7610_s16 + $0xa8] sm:$0xff] }
  0x1c   : > { %v1117_v35 = vand.u32 2147483647, %v1085_v26  ;;  %v1132_v41 = vpack.c.bf16 %v1101_v32, %v1100_v31  ;;  %v1103_v42 = vand.u32 2147483647, %v1071_v34  ;;  %v1073_v44 = vsub.f32 %v7632_v18, %v7669_v39  ;;  %v7682_v46 = vld [vmem:[%s7581_s26 + $0x30] sm:$0xff]  ;;  %v7685_v47 = vld [vmem:[%s7581_s26 + $0x38] sm:$0xff] }
  0x1d   : > { %11236 = vst [vmem:[#allocation8_spill] sm:$0xff] %v7685_v47  ;;  %v1118_v49 = vand.u32 2147483647, %v1086_v37  ;;  %v1119_v50 = vand.u32 2147483647, %v1087_v38  ;;  %v1088_v51 = vsub.f32 %v576_v11, %v7672_v40  ;;  %v7689_v52 = vld [vmem:[%s7610_s16 + $0x30] sm:$0xff]  ;;  %v1089_v58 = vsub.f32 %v577_v12, %v7679_v45 }
  0x1e   : > { %v1140_v48 = vpack.c.bf16 %v1117_v35, %v1116_v33  ;;  %v7692_v53 = vld [vmem:[%s7610_s16 + $0x38] sm:$0xff]  ;;  %6528 = vmatprep.mubr.msk.bf16.mxu0 %vm1164_vm0, %v1132_v41  ;;  %v1133_v55 = vpack.c.bf16 %v1103_v42, %v1102_v36  ;;  %v1104_v56 = vand.u32 2147483647, %v1072_v43  ;;  %v1105_v57 = vand.u32 2147483647, %v1073_v44  ;;  %v7702_v59 = vld [vmem:[%s7581_s26 + $0xb0] sm:$0xff] }
  0x1f   : > { %v7705_v60 = vld [vmem:[%s7581_s26 + $0xb8] sm:$0xff]  ;;  %v1141_v61 = vpack.c.bf16 %v1119_v50, %v1118_v49  ;;  %v1120_v62 = vand.u32 2147483647, %v1088_v51  ;;  %v1074_v63 = vsub.f32 %v7682_v46, %v7689_v52  ;;  %v1075_v0 = vsub.f32 %v7685_v47, %v7692_v53  ;;  %v7713_v1 = vld [vmem:[%s7610_s16 + $0xb0] sm:$0xff]  ;;  %v7719_v9 = vld [vmem:[%s7581_s26 + $0x40] sm:$0xff] }
  0x20   : > { %6544 = vmatprep.mubr.msk.bf16.mxu1 %vm1164_vm0, %v1140_v48  ;;  %v7716_v8 = vld [vmem:[%s7610_s16 + $0xb8] sm:$0xff]  ;;  %11237 = vst [vmem:[#allocation9_spill] sm:$0xff] %v7719_v9  ;;  %6529 = vmatmul.mubr.msk.bf16.vlgmr.msra.gmra.mrb[0].mxu0 %vm1164_vm0, %v1133_v55  ;;  %v1134_v11 = vpack.c.bf16 %v1105_v57, %v1104_v56  ;;  %v1121_v12 = vand.u32 2147483647, %v1089_v58  ;;  %v1090_v20 = vsub.f32 %v7702_v59, %v7713_v1  ;;  %v7727_v23 = vld [vmem:[%s7581_s26 + $0x48] sm:$0xff]  ;;  %v7730_v26 = vld [vmem:[%s7610_s16 + $0x40] sm:$0xff] }
  0x21   : > { %v1091_v21 = vsub.f32 %v7705_v60, %v7716_v8  ;;  %11238 = vst [vmem:[#allocation10_spill] sm:$0xff] %v7727_v23  ;;  %11239 = vst [vmem:[#allocation11_spill] sm:$0xff] %v7730_v26  ;;  %v7733_v27 = vld [vmem:[%s7610_s16 + $0x48] sm:$0xff]  ;;  %v7738_v31 = vld [vmem:[%s11010_s6] sm:$0xff]   ;;  %6545 = vmatmul.mubr.msk.bf16.vlgmr.msra.gmra.mrb[0].mxu1 %vm1164_vm0, %v1141_v61  ;;  %6597 = vmatpush3.bf16.msra.mxu0 %v7574_v2  ;;  %v1106_v32 = vand.u32 2147483647, %v1074_v63  ;;  %v1076_v34 = vsub.f32 %v7719_v9, %v7730_v26 }
  0x22   : > { %11240 = vst [vmem:[#allocation12_spill] sm:$0xff] %v7733_v27  ;;  %v1107_v33 = vand.u32 2147483647, %v1075_v0  ;;  %v1077_v35 = vsub.f32 %v7727_v23, %v7733_v27  ;;  %v7747_v36 = vld [vmem:[%s7581_s26 + $0xc0] sm:$0xff]  ;;  %v7750_v37 = vld [vmem:[%s7581_s26 + $0xc8] sm:$0xff]  ;;  %6561 = vmatpush3.bf16.msra.mxu1 %v7574_v2  ;;  %6532 = vmatprep.mubr.msk.bf16.mxu0 %vm1164_vm0, %v1134_v11  ;;  %v1142_v38 = vpack.c.bf16 %v1121_v12, %v1120_v62  ;;  %v7763_v51 = vld [vmem:[%s7581_s26 + $0x50] sm:$0xff] }
  0x23   : > { %v1122_v41 = vand.u32 2147483647, %v1090_v20  ;;  %v1123_v42 = vand.u32 2147483647, %v1091_v21  ;;  %v7755_v43 = vld [vmem:[%s7610_s16 + $0xc0] sm:$0xff]  ;;  %v7758_v44 = vld [vmem:[%s7610_s16 + $0xc8] sm:$0xff]  ;;  %6562 = vmatprep.subr.bf16.mxu1 %v7697_v54  ;;  %6598 = vmatprep.subr.bf16.mxu0 %v7697_v54 }
  0x24   : > { %v1108_v48 = vand.u32 2147483647, %v1076_v34  ;;  %v1109_v49 = vand.u32 2147483647, %v1077_v35  ;;  %v1092_v50 = vsub.f32 %v7747_v36, %v7755_v43  ;;  %11241 = vst [vmem:[#allocation13_spill] sm:$0xff] %v7763_v51  ;;  %v7766_v2 = vld [vmem:[%s7581_s26 + $0x58] sm:$0xff]  ;;  %6548 = vmatprep.mubr.msk.bf16.mxu1 %vm1164_vm0, %v1142_v38  ;;  %v1135_v55 = vpack.c.bf16 %v1107_v33, %v1106_v32 }
  0x25   : > { %11242 = vst [vmem:[#allocation14_spill] sm:$0xff] %v7766_v2  ;;  %v1143_v56 = vpack.c.bf16 %v1123_v42, %v1122_v41  ;;  %v1093_v57 = vsub.f32 %v7750_v37, %v7758_v44  ;;  %v7774_v58 = vld [vmem:[%s7610_s16 + $0x50] sm:$0xff]  ;;  %v7777_v61 = vld [vmem:[%s7610_s16 + $0x58] sm:$0xff]  ;;  %6599 = vmatpush3.bf16.msra.mxu0 %v7697_v54  ;;  %v7799_v38 = vld [vmem:[%s7581_s26 + $0x60] sm:$0xff] }
  0x26   : > { %11243 = vst [vmem:[#allocation15_spill] sm:$0xff] %v7774_v58  ;;  %11244 = vst [vmem:[#allocation16_spill] sm:$0xff] %v7777_v61  ;;  %v7780_v62 = vld [vmem:[%s7581_s26 + $0xd0] sm:$0xff]  ;;  %v1136_v63 = vpack.c.bf16 %v1109_v49, %v1108_v48  ;;  %v1124_v0 = vand.u32 2147483647, %v1092_v50  ;;  %v1078_v11 = vsub.f32 %v7763_v51, %v7774_v58  ;;  %v1079_v12 = vsub.f32 %v7766_v2, %v7777_v61  ;;  %v583_v20 = vld [vmem:[%s7581_s26 + $0xd8] sm:$0xff] }
  0x27   : > { %v7788_v21 = vld [vmem:[%s7610_s16 + $0xd0] sm:$0xff]  ;;  %v7791_v32 = vld [vmem:[%s7610_s16 + $0xd8] sm:$0xff]  ;;  %v1125_v33 = vand.u32 2147483647, %v1093_v57  ;;  %6563 = vmatpush3.bf16.msra.mxu1 %v7697_v54  ;;  %11245 = vst [vmem:[#allocation17_spill] sm:$0xff] %v7799_v38  ;;  %v7802_v41 = vld [vmem:[%s7581_s26 + $0x68] sm:$0xff]  ;;  %6668 = vmatprep.subr.bf16.mxu0 %v7738_v31 }
  0x28   : > { %v1094_v34 = vsub.f32 %v7780_v62, %v7788_v21  ;;  %v1095_v35 = vsub.f32 %v583_v20, %v7791_v32  ;;  %11246 = vst [vmem:[#allocation18_spill] sm:$0xff] %v7802_v41  ;;  %v7805_v42 = vld [vmem:[%s7610_s16 + $0x60] sm:$0xff]  ;;  %v1110_v48 = vand.u32 2147483647, %v1078_v11  ;;  %v1111_v49 = vand.u32 2147483647, %v1079_v12  ;;  %6632 = vmatprep.subr.bf16.mxu1 %v7738_v31  ;;  %6533 = vmatmul.mubr.msk.bf16.gmra.mrb[4].mxu0 %vm1164_vm0, %v1135_v55 }
  0x29   : > { %11247 = vst [vmem:[#allocation19_spill] sm:$0xff] %v7805_v42  ;;  %v7809_v50 = vld [vmem:[%s7610_s16 + $0x68] sm:$0xff]  ;;  %v1080_v57 = vsub.f32 %v7799_v38, %v7805_v42  ;;  %v584_v54 = vld [vmem:[%s7581_s26 + $0xe0] sm:$0xff]  ;;  %v1144_v19 = vpack.c.bf16 %v1125_v33, %v1124_v0  ;;  %6549 = vmatmul.mubr.msk.bf16.gmra.mrb[4].mxu1 %vm1164_vm0, %v1143_v56  ;;  %6536 = vmatprep.mubr.msk.bf16.mxu0 %vm1164_vm0, %v1136_v63  ;;  %v7824_v33 = vld [vmem:[%s7581_s26 + $0x70] sm:$0xff] }
  0x2a   : > { %11248 = vst [vmem:[#allocation20_spill] sm:$0xff] %v7809_v50  ;;  %v1126_v13 = vand.u32 2147483647, %v1094_v34  ;;  %v1127_v6 = vand.u32 2147483647, %v1095_v35  ;;  %v1081_v11 = vsub.f32 %v7802_v41, %v7809_v50  ;;  %v585_v12 = vld [vmem:[%s7581_s26 + $0xe8] sm:$0xff]  ;;  %v1137_v61 = vpack.c.bf16 %v1111_v49, %v1110_v48 }
  0x2b   : > { %v616_v5 = vld [vmem:[%s7610_s16 + $0xe0] sm:$0xff]  ;;  %v1112_v22 = vand.u32 2147483647, %v1080_v57  ;;  %v617_v55 = vld [vmem:[%s7610_s16 + $0xe8] sm:$0xff]  ;;  %11249 = vst [vmem:[#allocation21_spill] sm:$0xff] %v7824_v33  ;;  %v7827_v34 = vld [vmem:[%s7581_s26 + $0x78] sm:$0xff]  ;;  %6552 = vmatprep.mubr.msk.bf16.mxu1 %vm1164_vm0, %v1144_v19 }
  0x2c   : > { %v1096_v0 = vsub.f32 %v584_v54, %v616_v5  ;;  %11250 = vst [vmem:[#allocation22_spill] sm:$0xff] %v7827_v34  ;;  %v1113_v35 = vand.u32 2147483647, %v1081_v11  ;;  %v1097_v16 = vsub.f32 %v585_v12, %v617_v55  ;;  %v7831_v41 = vld [vmem:[%s7610_s16 + $0x70] sm:$0xff]  ;;  %v7834_v38 = vld [vmem:[%s7610_s16 + $0x78] sm:$0xff]  ;;  %v1145_v11 = vpack.c.bf16 %v1127_v6, %v1126_v13  ;;  %v11297_v49 = vld [vmem:[#allocation2_spill] sm:$0xff] }
  0x2d   : > { %v586_v56 = vld [vmem:[%s7581_s26 + $0xf0] sm:$0xff]  ;;  %v1082_v63 = vsub.f32 %v7824_v33, %v7831_v41  ;;  %v1083_v57 = vsub.f32 %v7827_v34, %v7834_v38  ;;  %v587_v42 = vld [vmem:[%s7581_s26 + $0xf8] sm:$0xff]  ;;  %v7850_v33 = vpack.c.bf16 %v7705_v60, %v7702_v59  ;;  %v7854_v34 = vpack.c.bf16 %v7679_v45, %v7672_v40 }
  0x2e   : > { %v1128_v50 = vand.u32 2147483647, %v1096_v0  ;;  %v618_v2 = vld [vmem:[%s7610_s16 + $0xf0] sm:$0xff]  ;;  %v619_v51 = vld [vmem:[%s7610_s16 + $0xf8] sm:$0xff]  ;;  %v1129_v58 = vand.u32 2147483647, %v1097_v16  ;;  %v1138_v23 = vpack.c.bf16 %v1113_v35, %v1112_v22  ;;  %v7846_v0 = vpack.c.bf16 %v7659_v29, %v7656_v28 }
  0x2f   : > { %v1098_v19 = vsub.f32 %v586_v56, %v618_v2  ;;  %v1099_v9 = vsub.f32 %v587_v42, %v619_v51  ;;  %v1114_v26 = vand.u32 2147483647, %v1082_v63  ;;  %v1115_v47 = vand.u32 2147483647, %v1083_v57  ;;  %11252 = vst [vmem:[#allocation24_spill] sm:$0xff] %v7850_v33  ;;  %11253 = vst [vmem:[#allocation25_spill] sm:$0xff] %v7854_v34 }
  0x30   : > { %v1146_v27 = vpack.c.bf16 %v1129_v58, %v1128_v50  ;;  %11251 = vst [vmem:[#allocation23_spill] sm:$0xff] %v7846_v0  ;;  %6537 = vmatmul.mubr.msk.bf16.gmra.mrb[8].mxu0 %vm1164_vm0, %v1137_v61  ;;  %v7859_v13 = vpack.c.bf16 %v7716_v8, %v7713_v1  ;;  %v7863_v16 = vpack.c.bf16 %v7750_v37, %v7747_v36  ;;  %v11284_v37 = vld [vmem:[#allocation19_spill] sm:$0xff]  ;;  %v652_v57 = vld [vmem:[%s8099_s15] sm:$0xff] }
  0x31   : > { %v1130_v6 = vand.u32 2147483647, %v1098_v19  ;;  %v7866_v22 = vpack.c.bf16 %v583_v20, %v7780_v62  ;;  %6553 = vmatmul.mubr.msk.bf16.gmra.mrb[8].mxu1 %vm1164_vm0, %v1145_v11  ;;  %6540 = vmatprep.mubr.msk.bf16.mxu0 %vm1164_vm0, %v1138_v23  ;;  %v1131_v28 = vand.u32 2147483647, %v1099_v9  ;;  %v7872_v29 = vpack.c.bf16 %v7758_v44, %v7755_v43  ;;  %v11285_v43 = vld [vmem:[#allocation20_spill] sm:$0xff]  ;;  %v11291_v62 = vld [vmem:[#allocation5_spill] sm:$0xff] }
  0x32   : > { %11254 = vst [vmem:[#allocation26_spill] sm:$0xff] %v7859_v13  ;;  %11255 = vst [vmem:[#allocation27_spill] sm:$0xff] %v7863_v16  ;;  %v7876_v40 = vpack.c.bf16 %v7791_v32, %v7788_v21  ;;  %v7878_v45 = vpack.c.bf16 %v585_v12, %v584_v54  ;;  %6556 = vmatprep.mubr.msk.bf16.mxu1 %vm1164_vm0, %v1146_v27  ;;  %v7881_v59 = vpack.c.bf16 %v587_v42, %v586_v56  ;;  %v11282_v27 = vld [vmem:[#allocation14_spill] sm:$0xff]  ;;  %v11292_v20 = vld [vmem:[#allocation7_spill] sm:$0xff] }
  0x33   : > { %11256 = vst [vmem:[#allocation28_spill] sm:$0xff] %v7866_v22  ;;  %11257 = vst [vmem:[#allocation29_spill] sm:$0xff] %v7872_v29  ;;  %v7883_v60 = vpack.c.bf16 %v617_v55, %v616_v5  ;;  %v7885_v1 = vpack.c.bf16 %v619_v51, %v618_v2  ;;  %v1139_v8 = vpack.c.bf16 %v1115_v47, %v1114_v26  ;;  %v11281_v26 = vld [vmem:[#allocation13_spill] sm:$0xff]  ;;  %v11288_v2 = vld [vmem:[#allocation18_spill] sm:$0xff] }
  0x34   : > { %11258 = vst [vmem:[#allocation30_spill] sm:$0xff] %v7876_v40  ;;  %11259 = vst [vmem:[#allocation31_spill] sm:$0xff] %v7878_v45  ;;  %v7889_v9 = vpack.c.bf16 %v7623_v15, %v7620_v14  ;;  %v1147_v23 = vpack.c.bf16 %v1131_v28, %v1130_v6  ;;  %v7893_v36 = vpack.c.bf16 %v7589_v4, %v7586_v3  ;;  %v6948_v15 = vld [vmem:[%s11010_s6 + $0x8] sm:$0xff]   ;;  %v11287_v51 = vld [vmem:[#allocation17_spill] sm:$0xff] }
  0x35   : > { %11260 = vst [vmem:[#allocation32_spill] sm:$0xff] %v7881_v59  ;;  %11261 = vst [vmem:[#allocation33_spill] sm:$0xff] %v7883_v60  ;;  %v7903_v5 = vpack.c.bf16 %v7649_v25, %v7646_v24  ;;  %v7907_v14 = vpack.c.bf16 %v7613_v10, %v7599_v7  ;;  %v7911_v3 = vpack.c.bf16 %v7669_v39, %v7662_v30  ;;  %v11270_v10 = vld [vmem:[#allocation8_spill] sm:$0xff]  ;;  %v11275_v30 = vld [vmem:[#allocation9_spill] sm:$0xff] }
  0x36   : > { %11262 = vst [vmem:[#allocation34_spill] sm:$0xff] %v7885_v1  ;;  %11263 = vst [vmem:[#allocation35_spill] sm:$0xff] %v7889_v9  ;;  %v7915_v4 = vpack.c.bf16 %v7632_v18, %v7629_v17  ;;  %v7932_v7 = vpack.c.bf16 %v7692_v53, %v7689_v52  ;;  %v7936_v17 = vpack.c.bf16 %v11270_v10, %v7682_v46  ;;  %v11272_v18 = vld [vmem:[#allocation11_spill] sm:$0xff]  ;;  %v11273_v24 = vld [vmem:[#allocation12_spill] sm:$0xff] }
  0x37   : > { %11264 = vst [vmem:[#allocation36_spill] sm:$0xff] %v7893_v36  ;;  %11265 = vst [vmem:[#allocation37_spill] sm:$0xff] %v7903_v5  ;;  %v7940_v25 = vpack.c.bf16 %v11273_v24, %v11272_v18  ;;  %v11276_v39 = vld [vmem:[#allocation10_spill] sm:$0xff]  ;;  %v11278_v46 = vld [vmem:[#allocation15_spill] sm:$0xff]  ;;  %v7964_v44 = vpack.c.bf16 %v11285_v43, %v11284_v37  ;;  %v7968_v58 = vpack.c.bf16 %v11288_v2, %v11287_v51 }
  0x38   : > { %6541 = vmatmul.mubr.msk.bf16.gmra.mrb[12].mxu0 %vm1164_vm0, %v1139_v8  ;;  %11266 = vst [vmem:[#allocation38_spill] sm:$0xff] %v7907_v14  ;;  %11267 = vst [vmem:[#allocation39_spill] sm:$0xff] %v7911_v3  ;;  %v7944_v47 = vpack.c.bf16 %v11276_v39, %v11275_v30  ;;  %v11279_v52 = vld [vmem:[#allocation16_spill] sm:$0xff]  ;;  %v7980_v61 = vpack.c.bf16 %v7834_v38, %v7831_v41  ;;  %v7984_v21 = vpack.c.bf16 %v11292_v20, %v11291_v62  ;;  %v11294_v32 = vld [vmem:[#allocation21_spill] sm:$0xff] }
  0x39   : > { %6557 = vmatmul.mubr.msk.bf16.gmra.mrb[12].mxu1 %vm1164_vm0, %v1147_v23  ;;  %6600 = vmatprep.mubr.msk.bf16.mxu0 %vm1164_vm0, %v7889_v9  ;;  %11268 = vst [vmem:[#allocation40_spill] sm:$0xff] %v7915_v4  ;;  %11269 = vst [vmem:[#allocation41_spill] sm:$0xff] %v7932_v7  ;;  %v7956_v53 = vpack.c.bf16 %v11279_v52, %v11278_v46  ;;  %v11295_v42 = vld [vmem:[#allocation22_spill] sm:$0xff]  ;;  %v11298_v50 = vld [vmem:[#allocation3_spill] sm:$0xff] }
  0x3a   : > { %6564 = vmatprep.mubr.msk.bf16.mxu1 %vm1164_vm0, %v7893_v36  ;;  %11271 = vst [vmem:[#allocation8_spill] sm:$0xff] %v7936_v17  ;;  %11274 = vst [vmem:[#allocation11_spill] sm:$0xff] %v7940_v25  ;;  %v7988_v48 = vpack.c.bf16 %v11295_v42, %v11294_v32  ;;  %v7992_v54 = vpack.c.bf16 %v11298_v50, %v11297_v49  ;;  %v11300_v38 = vld [vmem:[#allocation4_spill] sm:$0xff]  ;;  %v11301_v41 = vld [vmem:[#allocation6_spill] sm:$0xff] }
  0x3b   : > { %11277 = vst [vmem:[#allocation12_spill] sm:$0xff] %v7944_v47  ;;  %11280 = vst [vmem:[#allocation9_spill] sm:$0xff] %v7956_v53  ;;  %v653_v12 = vld [vmem:[%s8099_s15 + $0x8] sm:$0xff]  ;;  %v684_v19 = vld [vmem:[%s8106_s18] sm:$0xff] }
  0x3c   : > { %11286 = vst [vmem:[#allocation15_spill] sm:$0xff] %v7964_v44  ;;  %11289 = vst [vmem:[#allocation16_spill] sm:$0xff] %v7968_v58  ;;  %v685_v55 = vld [vmem:[%s8106_s18 + $0x8] sm:$0xff]  ;;  %v716_v28 = vmax.f32 %v652_v57, %v684_v19  ;;  %v654_v18 = vld [vmem:[%s8099_s15 + $0x10] sm:$0xff] }
  0x3d   : > { %11290 = vst [vmem:[#allocation13_spill] sm:$0xff] %v7980_v61  ;;  %11293 = vst [vmem:[#allocation14_spill] sm:$0xff] %v7984_v21  ;;  %v717_v35 = vmax.f32 %v653_v12, %v685_v55  ;;  %v686_v24 = vld [vmem:[%s8106_s18 + $0x10] sm:$0xff]  ;;  %v655_v52 = vld [vmem:[%s8099_s15 + $0x18] sm:$0xff] }
  0x3e   : > { %11296 = vst [vmem:[#allocation19_spill] sm:$0xff] %v7988_v48  ;;  %11299 = vst [vmem:[#allocation20_spill] sm:$0xff] %v7992_v54  ;;  %v748_v8 = vsub.f32 %v652_v57, %v716_v28  ;;  %v844_v23 = vsub.f32 %v684_v19, %v716_v28  ;;  %v718_v30 = vmax.f32 %v654_v18, %v686_v24 }
  0x3f   : > { %v749_v56 = vsub.f32 %v653_v12, %v717_v35  ;;  %v845_v63 = vsub.f32 %v685_v55, %v717_v35 }
  0x40   : > { %6601 = vmatmul.mubr.msk.bf16.vlgmr.msra.gmra.mrb[16].mxu0 %vm1164_vm0, %v7903_v5  ;;  %v876_v10 = vmul.f32 1.442695, %v844_v23  ;;  %v750_v39 = vsub.f32 %v654_v18, %v718_v30  ;;  %v846_v46 = vsub.f32 %v686_v24, %v718_v30  ;;  %v657_v18 = vld [vmem:[%s8099_s15 + $0x28] sm:$0xff] }
  0x41   : > { %6565 = vmatmul.mubr.msk.bf16.vlgmr.msra.gmra.mrb[16].mxu1 %vm1164_vm0, %v7907_v14  ;;  %6604 = vmatprep.mubr.msk.bf16.mxu0 %vm1164_vm0, %v7911_v3  ;;  %v782_v11 = vmul.f32 1.442695, %v749_v56  ;;  %v878_v6 = vmul.f32 1.442695, %v845_v63  ;;  %v689_v24 = vld [vmem:[%s8106_s18 + $0x28] sm:$0xff] }
  0x42   : > { %6568 = vmatprep.mubr.msk.bf16.mxu1 %vm1164_vm0, %v7915_v4  ;;  %6633 = vmatpush3.bf16.msra.mxu1 %v7738_v31  ;;  %v784_v37 = vmul.f32 1.442695, %v750_v39  ;;  %v880_v43 = vmul.f32 1.442695, %v846_v46  ;;  %v721_v46 = vmax.f32 %v657_v18, %v689_v24 }
  0x43   : > { %6669 = vmatpush3.bf16.msra.mxu0 %v7738_v31  ;;  %6634 = vmatprep.subr.bf16.mxu1 %v6948_v15  ;;  %v7960_v31 = vpack.c.bf16 %v11282_v27, %v11281_v26  ;;  %6953 = vpow2.f32 %v782_v11  ;;  %v687_v26 = vld [vmem:[%s8106_s18 + $0x18] sm:$0xff] }
  0x44   : > { %6670 = vmatprep.subr.bf16.mxu0 %v6948_v15  ;;  %6955 = vpow2.f32 %v878_v6  ;;  %v719_v51 = vmax.f32 %v655_v52, %v687_v26 }
  0x45   : > { %11283 = vst [vmem:[#allocation10_spill] sm:$0xff] %v7960_v31 }
  0x46   : > { %6635 = vmatpush3.bf16.msra.mxu1 %v6948_v15  ;;  %v751_v20 = vsub.f32 %v655_v52, %v719_v51  ;;  %v847_v32 = vsub.f32 %v687_v26, %v719_v51 }
  0x47   : > { %6671 = vmatpush3.bf16.msra.mxu0 %v6948_v15  ;;  %v780_v15 = vmul.f32 1.442695, %v748_v8 }
  0x48   : > { %6605 = vmatmul.mubr.msk.bf16.gmra.mrb[20].mxu0 %vm1164_vm0, %v7932_v7  ;;  %v786_v50 = vmul.f32 1.442695, %v751_v20  ;;  %v882_v12 = vmul.f32 1.442695, %v847_v32 }
  0x49   : > { %6569 = vmatmul.mubr.msk.bf16.gmra.mrb[20].mxu1 %vm1164_vm0, %v7936_v17  ;;  %6608 = vmatprep.mubr.msk.bf16.mxu0 %vm1164_vm0, %v7940_v25  ;;  %6957 = vpow2.f32 %v780_v15 }
  0x4a   : > { %6572 = vmatprep.mubr.msk.bf16.mxu1 %vm1164_vm0, %v7944_v47  ;;  %6959 = vpow2.f32 %v876_v10 }
  0x4b   : > { %6961 = vpow2.f32 %v784_v37 }
  0x4c   : > { %6963 = vpow2.f32 %v880_v43  ;;  %v7473_v43 = vmov 0  }
  0x4d   : > { %v6954_v27 = vpop.eup %6953  ;;  %6942 = vset.pattern.permute.xlu1 %v7473_v43  ;;  %6941 = vset.pattern.permute.xlu0 %v7473_v43 }
  0x4e   : > { %v8116_v2 = vpop.eup %6955 }
  0x4f   : > { %v941_v62 = vadd.f32 %v8116_v2, %v6954_v27 }
  0x50   : > { %6609 = vmatmul.mubr.msk.bf16.gmra.mrb[24].mxu0 %vm1164_vm0, %v7956_v53 }
  0x51   : > { %6573 = vmatmul.mubr.msk.bf16.gmra.mrb[24].mxu1 %vm1164_vm0, %v7960_v31  ;;  %6612 = vmatprep.mubr.msk.bf16.mxu0 %vm1164_vm0, %v7964_v44  ;;  %6965 = vrcp.f32 %v941_v62 }
  0x52   : > { %6576 = vmatprep.mubr.msk.bf16.mxu1 %vm1164_vm0, %v7968_v58  ;;  %6967 = vpow2.f32 %v786_v50  ;;  %v849_v50 = vsub.f32 %v689_v24, %v721_v46 }
  0x53   : > { %v8119_v42 = vpop.eup %6957  ;;  %6969 = vpow2.f32 %v882_v12 }
  0x54   : > { %v6960_v55 = vpop.eup %6959 }
  0x55   : > { %v940_v19 = vadd.f32 %v6960_v55, %v8119_v42  ;;  %v8136_v30 = vpop.eup %6961 }
  0x56   : > { %v8138_v52 = vpop.eup %6963 }
  0x57   : > { %6971 = vrcp.f32 %v940_v19  ;;  %v942_v32 = vadd.f32 %v8138_v52, %v8136_v30  ;;  %v688_v19 = vld [vmem:[%s8106_s18 + $0x20] sm:$0xff] }
  0x58   : > { %6613 = vmatmul.mubr.msk.bf16.gmra.mrb[28].mxu0 %vm1164_vm0, %v7980_v61 }
  0x59   : > { %6577 = vmatmul.mubr.msk.bf16.gmra.mrb[28].mxu1 %vm1164_vm0, %v7988_v48  ;;  %6616 = vmatprep.mubr.msk.bf16.mxu0 %vm1164_vm0, %v7984_v21  ;;  %6973 = vrcp.f32 %v942_v32  ;;  %v658_v32 = vld [vmem:[%s8099_s15 + $0x30] sm:$0xff] }
  0x5a   : > { %6580 = vmatprep.mubr.msk.bf16.mxu1 %vm1164_vm0, %v7992_v54 }
  0x5b   : > { %v6966_v51 = vpop.eup %6965 }
  0x60   : > { %6617 = vmatmul.mubr.msk.bf16.gmra.mrb[32].mxu0 %vm1164_vm0, %v7846_v0 }
  0x61   : > { %6581 = vmatmul.mubr.msk.bf16.gmra.mrb[32].mxu1 %vm1164_vm0, %v11300_v38  ;;  %6620 = vmatprep.mubr.msk.bf16.mxu0 %vm1164_vm0, %v7854_v34 }
  0x62   : > { %6584 = vmatprep.mubr.msk.bf16.mxu1 %vm1164_vm0, %v11301_v41 }
  0x68   : > { %6621 = vmatmul.mubr.msk.bf16.gmra.mrb[36].mxu0 %vm1164_vm0, %v7859_v13 }
  0x69   : > { %6585 = vmatmul.mubr.msk.bf16.gmra.mrb[36].mxu1 %vm1164_vm0, %v7850_v33  ;;  %6624 = vmatprep.mubr.msk.bf16.mxu0 %vm1164_vm0, %v7872_v29 }
  0x6a   : > { %6588 = vmatprep.mubr.msk.bf16.mxu1 %vm1164_vm0, %v7863_v16 }
  0x70   : > { %6625 = vmatmul.mubr.msk.bf16.gmra.mrb[40].mxu0 %vm1164_vm0, %v7876_v40 }
  0x71   : > { %6589 = vmatmul.mubr.msk.bf16.gmra.mrb[40].mxu1 %vm1164_vm0, %v7866_v22  ;;  %6628 = vmatprep.mubr.msk.bf16.mxu0 %vm1164_vm0, %v7883_v60 }
  0x72   : > { %6592 = vmatprep.mubr.msk.bf16.mxu1 %vm1164_vm0, %v7878_v45 }
  0x78   : > { %6629 = vmatmul.mubr.msk.bf16.gmra.mrb[44].mxu0 %vm1164_vm0, %v7885_v1 }
  0x79   : > { %6593 = vmatmul.mubr.msk.bf16.gmra.mrb[44].mxu1 %vm1164_vm0, %v7881_v59  ;;  %6672 = vmatprep.mubr.msk.bf16.mxu0 %vm1164_vm0, %v7889_v9 }
  0x7a   : > { %6636 = vmatprep.mubr.msk.bf16.mxu1 %vm1164_vm0, %v7893_v36 }
  0x80   : > { %6673 = vmatmul.mubr.msk.bf16.vlgmr.msra.gmra.mrb[48].mxu0 %vm1164_vm0, %v7903_v5 }
  0x81   : > { %6637 = vmatmul.mubr.msk.bf16.vlgmr.msra.gmra.mrb[48].mxu1 %vm1164_vm0, %v7907_v14  ;;  %6676 = vmatprep.mubr.msk.bf16.mxu0 %vm1164_vm0, %v7911_v3  ;;  %v698_v3 = vld [vmem:[%s8106_s18 + $0x70] sm:$0xff] }
  0x82   : > { %6640 = vmatprep.mubr.msk.bf16.mxu1 %vm1164_vm0, %v7915_v4 }
  0x88   : > { %6677 = vmatmul.mubr.msk.bf16.gmra.mrb[52].mxu0 %vm1164_vm0, %v7932_v7 }
  0x89   : > { %6641 = vmatmul.mubr.msk.bf16.gmra.mrb[52].mxu1 %vm1164_vm0, %v7936_v17  ;;  %6680 = vmatprep.mubr.msk.bf16.mxu0 %vm1164_vm0, %v7940_v25 }
  0x8a   : > { %6644 = vmatprep.mubr.msk.bf16.mxu1 %vm1164_vm0, %v7944_v47 }
  0x90   : > { %6681 = vmatmul.mubr.msk.bf16.gmra.mrb[56].mxu0 %vm1164_vm0, %v7956_v53 }
  0x91   : > { %6645 = vmatmul.mubr.msk.bf16.gmra.mrb[56].mxu1 %vm1164_vm0, %v7960_v31  ;;  %6684 = vmatprep.mubr.msk.bf16.mxu0 %vm1164_vm0, %v7964_v44  ;;  %v664_v44 = vld [vmem:[%s8099_s15 + $0x60] sm:$0xff] }
  0x92   : > { %6648 = vmatprep.mubr.msk.bf16.mxu1 %vm1164_vm0, %v7968_v58 }
  0x98   : > { %6685 = vmatmul.mubr.msk.bf16.gmra.mrb[60].mxu0 %vm1164_vm0, %v7980_v61 }
  0x99   : > { %6649 = vmatmul.mubr.msk.bf16.gmra.mrb[60].mxu1 %vm1164_vm0, %v7988_v48  ;;  %6688 = vmatprep.mubr.msk.bf16.mxu0 %vm1164_vm0, %v7984_v21 }
  0x9a   : > { %6652 = vmatprep.mubr.msk.bf16.mxu1 %vm1164_vm0, %v7992_v54 }
  0xa0   : > { %6689 = vmatmul.mubr.msk.bf16.gmra.mrb[64].mxu0 %vm1164_vm0, %v7846_v0 }
  0xa1   : > { %6653 = vmatmul.mubr.msk.bf16.gmra.mrb[64].mxu1 %vm1164_vm0, %v11300_v38  ;;  %6692 = vmatprep.mubr.msk.bf16.mxu0 %vm1164_vm0, %v7854_v34 }
  0xa2   : > { %6656 = vmatprep.mubr.msk.bf16.mxu1 %vm1164_vm0, %v11301_v41 }
  0xa8   : > { %6693 = vmatmul.mubr.msk.bf16.gmra.mrb[68].mxu0 %vm1164_vm0, %v7859_v13 }
  0xa9   : > { %6657 = vmatmul.mubr.msk.bf16.gmra.mrb[68].mxu1 %vm1164_vm0, %v7850_v33  ;;  %6696 = vmatprep.mubr.msk.bf16.mxu0 %vm1164_vm0, %v7872_v29  ;;  %v692_v29 = vld [vmem:[%s8106_s18 + $0x40] sm:$0xff] }
  0xaa   : > { %6660 = vmatprep.mubr.msk.bf16.mxu1 %vm1164_vm0, %v7863_v16 }
  0xb0   : > { %6697 = vmatmul.mubr.msk.bf16.gmra.mrb[72].mxu0 %vm1164_vm0, %v7876_v40 }
  0xb1   : > { %6661 = vmatmul.mubr.msk.bf16.gmra.mrb[72].mxu1 %vm1164_vm0, %v7866_v22  ;;  %6700 = vmatprep.mubr.msk.bf16.mxu0 %vm1164_vm0, %v7883_v60 }
  0xb2   : > { %6664 = vmatprep.mubr.msk.bf16.mxu1 %vm1164_vm0, %v7878_v45 }
  0xb8   : > { %6701 = vmatmul.mubr.msk.bf16.gmra.mrb[76].mxu0 %vm1164_vm0, %v7885_v1 }
  0xb9   : > { %6665 = vmatmul.mubr.msk.bf16.gmra.mrb[76].mxu1 %vm1164_vm0, %v7881_v59 }
  0xf3   : > { %v6530_v49 = vpop.f32.mrb[0].mxu0 }
  0xf4   : > { %v6546_v35 = vpop.f32.mrb[0].mxu1  ;;  %v1247_v56 = vpop.f32.mrb[1].mxu0 }
  0xf5   : > { %v1311_v63 = vpop.f32.mrb[1].mxu1  ;;  %v6531_v57 = vpop.f32.mrb[2].mxu0 }
  0xf6   : > { %v8122_v11 = vpack.c.bf16 %v6531_v57, %v6530_v49  ;;  %v6547_v6 = vpop.f32.mrb[2].mxu1  ;;  %v1250_v28 = vpop.f32.mrb[3].mxu0  ;;  %v753_v49 = vsub.f32 %v657_v18, %v721_v46  ;;  %v656_v57 = vld [vmem:[%s8099_s15 + $0x20] sm:$0xff] }
  0xf7   : > { %v8124_v8 = vpack.c.bf16 %v6547_v6, %v6546_v35  ;;  %v8126_v23 = vpack.c.bf16 %v1250_v28, %v1247_v56  ;;  %v1314_v15 = vpop.f32.mrb[3].mxu1  ;;  %v8146_v6 = vpop.eup %6967 }
  0xf8   : > { %11302 = vst [vmem:[#allocation17_spill] sm:$0xff] %v8122_v11  ;;  %v8128_v10 = vpack.c.bf16 %v1314_v15, %v1311_v63  ;;  %v1005_v63 = vmul.f32 %v6966_v51, %v6954_v27  ;;  %v790_v1 = vmul.f32 1.442695, %v753_v49  ;;  %v8152_v18 = vpop.eup %6969  ;;  %v720_v27 = vmax.f32 %v656_v57, %v688_v19  ;;  %v690_v49 = vld [vmem:[%s8106_s18 + $0x30] sm:$0xff] }
  0xf9   : > { %11303 = vst [vmem:[#allocation18_spill] sm:$0xff] %v8124_v8  ;;  %11304 = vst [vmem:[#allocation5_spill] sm:$0xff] %v8126_v23  ;;  %6148 = vmatprep.mubr.msk.bf16.mxu1 %vm2384_vm1, %v8126_v23  ;;  %6196 = vmatprep.mubr.msk.bf16.mxu0 %vm2384_vm1, %v8126_v23  ;;  %v8156_v46 = vpop.eup %6971  ;;  %v700_v8 = vld [vmem:[%s8106_s18 + $0x80] sm:$0xff] }
  0xfa   : > { %11305 = vst [vmem:[#allocation7_spill] sm:$0xff] %v8128_v10  ;;  %4262 = vperm.xlu1 %6942, %v1005_v63   ;;  %6975 = vpow2.f32 %v790_v1 }
  0xfb   : > { %v6534_v39 = vpop.f32.mrb[4].mxu0 }
  0xfc   : > { %v6550_v26 = vpop.f32.mrb[4].mxu1  ;;  %v1263_v37 = vpop.f32.mrb[5].mxu0 }
  0xfd   : > { %v1327_v62 = vpop.f32.mrb[5].mxu1  ;;  %v6535_v20 = vpop.f32.mrb[6].mxu0 }
  0xfe   : > { %v8142_v12 = vpack.c.bf16 %v6535_v20, %v6534_v39  ;;  %v6551_v35 = vpop.f32.mrb[6].mxu1  ;;  %v1266_v56 = vpop.f32.mrb[7].mxu0  ;;  %v886_v39 = vmul.f32 1.442695, %v849_v50  ;;  %v752_v20 = vsub.f32 %v656_v57, %v720_v27  ;;  %v1037_v50 = vmul.f32 %v6966_v51, %v8116_v2 }
  0xff   : > { %v8148_v28 = vpack.c.bf16 %v6551_v35, %v6550_v26  ;;  %v8150_v15 = vpack.c.bf16 %v1266_v56, %v1263_v37  ;;  %v1330_v43 = vpop.f32.mrb[7].mxu1  ;;  %v943_v26 = vadd.f32 %v8152_v18, %v8146_v6  ;;  %v1036_v37 = vmul.f32 %v8156_v46, %v6960_v55 }
 0x100   : > { %11306 = vst [vmem:[#allocation21_spill] sm:$0xff] %v8142_v12  ;;  %v8154_v24 = vpack.c.bf16 %v1330_v43, %v1327_v62  ;;  %6977 = vpow2.f32 %v886_v39  ;;  %v848_v35 = vsub.f32 %v688_v19, %v720_v27  ;;  %v722_v62 = vmax.f32 %v658_v32, %v690_v49 }
 0x101   : > { %11307 = vst [vmem:[#allocation22_spill] sm:$0xff] %v8148_v28  ;;  %11308 = vst [vmem:[#allocation2_spill] sm:$0xff] %v8150_v15  ;;  %6979 = vrcp.f32 %v943_v26  ;;  %4859 = vperm.xlu1 %6942, %v1036_v37   ;;  %v788_v59 = vmul.f32 1.442695, %v752_v20  ;;  %v6974_v20 = vpop.eup %6973 }
 0x102   : > { %11309 = vst [vmem:[#allocation3_spill] sm:$0xff] %v8154_v24  ;;  %v884_v60 = vmul.f32 1.442695, %v848_v35  ;;  %v754_v1 = vsub.f32 %v658_v32, %v722_v62  ;;  %v850_v22 = vsub.f32 %v690_v49, %v722_v62  ;;  %v661_v35 = vld [vmem:[%s8099_s15 + $0x48] sm:$0xff]  ;;  %v668_v24 = vld [vmem:[%s8099_s15 + $0x80] sm:$0xff] }
 0x103   : > { %v6538_v56 = vpop.f32.mrb[8].mxu0  ;;  %6981 = vpow2.f32 %v788_v59  ;;  %v693_v32 = vld [vmem:[%s8106_s18 + $0x48] sm:$0xff] }
 0x104   : > { %v6554_v43 = vpop.f32.mrb[8].mxu1  ;;  %v1279_v63 = vpop.f32.mrb[9].mxu0  ;;  %6983 = vpow2.f32 %v884_v60  ;;  %v792_v2 = vmul.f32 1.442695, %v754_v1  ;;  %v888_v37 = vmul.f32 1.442695, %v850_v22 }
 0x105   : > { %v1343_v45 = vpop.f32.mrb[9].mxu1  ;;  %v6539_v40 = vpop.f32.mrb[10].mxu0  ;;  %4864 = vperm.xlu1 %6942, %v1037_v50  }
 0x106   : > { %v8164_v55 = vpack.c.bf16 %v6539_v40, %v6538_v56  ;;  %v6555_v57 = vpop.f32.mrb[10].mxu1  ;;  %v1282_v19 = vpop.f32.mrb[11].mxu0  ;;  %6985 = vpow2.f32 %v792_v2  ;;  %v1006_v40 = vmul.f32 %v6974_v20, %v8136_v30  ;;  %v725_v56 = vmax.f32 %v661_v35, %v693_v32 }
 0x107   : > { %v8166_v39 = vpack.c.bf16 %v6555_v57, %v6554_v43  ;;  %v8168_v27 = vpack.c.bf16 %v1282_v19, %v1279_v63  ;;  %v1346_v26 = vpop.f32.mrb[11].mxu1  ;;  %6987 = vpow2.f32 %v888_v37  ;;  %v8175_v49 = vpop.eup %6975  ;;  %v660_v37 = vld [vmem:[%s8099_s15 + $0x40] sm:$0xff] }
 0x108   : > { %11310 = vst [vmem:[#allocation42_spill] sm:$0xff] %v8164_v55  ;;  %v8170_v51 = vpack.c.bf16 %v1346_v26, %v1343_v45  ;;  %v757_v50 = vsub.f32 %v661_v35, %v725_v56  ;;  %v853_v1 = vsub.f32 %v693_v32, %v725_v56 }
 0x109   : > { %11311 = vst [vmem:[#allocation43_spill] sm:$0xff] %v8166_v39  ;;  %11312 = vst [vmem:[#allocation44_spill] sm:$0xff] %v8168_v27  ;;  %4267 = vperm.xlu1 %6942, %v1006_v40   ;;  %v732_v27 = vmax.f32 %v668_v24, %v700_v8 }
 0x10a   : > { %11313 = vst [vmem:[#allocation45_spill] sm:$0xff] %v8170_v51  ;;  %v8177_v62 = vpop.eup %6977  ;;  %v798_v33 = vmul.f32 1.442695, %v757_v50  ;;  %v894_v32 = vmul.f32 1.442695, %v853_v1  ;;  %v694_v50 = vld [vmem:[%s8106_s18 + $0x50] sm:$0xff] }
 0x10b   : > { %v6542_v59 = vpop.f32.mrb[12].mxu0  ;;  %11314 = vst [vmem:[#allocation46_spill] sm:$0xff] %v8177_v62  ;;  %v6980_v43 = vpop.eup %6979  ;;  %v945_v30 = vadd.f32 %v8177_v62, %v8175_v49  ;;  %v764_v15 = vsub.f32 %v668_v24, %v732_v27 }
 0x10c   : > { %v6558_v60 = vpop.f32.mrb[12].mxu1  ;;  %v1295_v45 = vpop.f32.mrb[13].mxu0  ;;  %v1007_v2 = vmul.f32 %v6980_v43, %v8146_v6  ;;  %v1038_v6 = vmul.f32 %v6974_v20, %v8138_v52 }
 0x10d   : > { %v1359_v22 = vpop.f32.mrb[13].mxu1  ;;  %v6543_v63 = vpop.f32.mrb[14].mxu0  ;;  %6989 = vrcp.f32 %v945_v30  ;;  %v662_v30 = vld [vmem:[%s8099_s15 + $0x50] sm:$0xff] }
 0x10e   : > { %v8181_v57 = vpack.c.bf16 %v6543_v63, %v6542_v59  ;;  %v6559_v19 = vpop.f32.mrb[14].mxu1  ;;  %v1298_v26 = vpop.f32.mrb[15].mxu0  ;;  %4272 = vperm.xlu1 %6942, %v1007_v2   ;;  %v724_v59 = vmax.f32 %v660_v37, %v692_v29  ;;  %6991 = vpow2.f32 %v798_v33  ;;  %v1039_v33 = vmul.f32 %v6980_v43, %v8152_v18  ;;  %v697_v18 = vld [vmem:[%s8106_s18 + $0x68] sm:$0xff] }
 0x10f   : > { %v8186_v16 = vpack.c.bf16 %v6559_v19, %v6558_v60  ;;  %v8188_v13 = vpack.c.bf16 %v1298_v26, %v1295_v45  ;;  %v1362_v40 = vpop.f32.mrb[15].mxu1  ;;  %v8190_v34 = vpop.eup %6981  ;;  %6993 = vpow2.f32 %v894_v32  ;;  %v726_v26 = vmax.f32 %v662_v30, %v694_v50 }
 0x110   : > { %11315 = vst [vmem:[#allocation47_spill] sm:$0xff] %v8181_v57  ;;  %v8192_v35 = vpack.c.bf16 %v1362_v40, %v1359_v22  ;;  %v8194_v56 = vpop.eup %6983  ;;  %v756_v45 = vsub.f32 %v660_v37, %v724_v59  ;;  %v852_v63 = vsub.f32 %v692_v29, %v724_v59  ;;  %v860_v57 = vsub.f32 %v700_v8, %v732_v27 }
 0x111   : > { %11316 = vst [vmem:[#allocation48_spill] sm:$0xff] %v8186_v16  ;;  %11317 = vst [vmem:[#allocation49_spill] sm:$0xff] %v8188_v13  ;;  %v944_v60 = vadd.f32 %v8194_v56, %v8190_v34  ;;  %v8201_v19 = vpop.eup %6985  ;;  %v758_v59 = vsub.f32 %v662_v30, %v726_v26  ;;  %v854_v41 = vsub.f32 %v694_v50, %v726_v26 }
 0x112   : > { %11318 = vst [vmem:[#allocation50_spill] sm:$0xff] %v8192_v35  ;;  %v8205_v1 = vpop.eup %6987  ;;  %4869 = vperm.xlu1 %6942, %v1038_v6   ;;  %v796_v52 = vmul.f32 1.442695, %v756_v45  ;;  %v892_v20 = vmul.f32 1.442695, %v852_v63 }
 0x113   : > { %v8203_v22 = vpop.f32.mrb[16].mxu0  ;;  %6995 = vrcp.f32 %v944_v60  ;;  %v946_v32 = vadd.f32 %v8205_v1, %v8201_v19  ;;  %v800_v45 = vmul.f32 1.442695, %v758_v59  ;;  %v896_v30 = vmul.f32 1.442695, %v854_v41 }
 0x114   : > { %v8207_v2 = vpop.f32.mrb[16].mxu1  ;;  %v8209_v40 = vpop.f32.mrb[17].mxu0  ;;  %6997 = vpow2.f32 %v796_v52  ;;  %v665_v52 = vld [vmem:[%s8099_s15 + $0x68] sm:$0xff] }
 0x115   : > { %v8212_v29 = vpop.f32.mrb[17].mxu1  ;;  %v8214_v37 = vpop.f32.mrb[18].mxu0  ;;  %6999 = vrcp.f32 %v946_v32  ;;  %v729_v59 = vmax.f32 %v665_v52, %v697_v18 }
 0x116   : > { %v8218_v0 = vpop.f32.mrb[18].mxu1  ;;  %v8222_v6 = vpop.f32.mrb[19].mxu0  ;;  %4874 = vperm.xlu1 %6942, %v1039_v33   ;;  %7001 = vpow2.f32 %v892_v20 }
 0x117   : > { %v8226_v43 = vpop.f32.mrb[19].mxu1  ;;  %v8232_v50 = vpop.eup %6989  ;;  %7003 = vpow2.f32 %v800_v45  ;;  %v857_v60 = vsub.f32 %v697_v18, %v729_v59  ;;  %v666_v18 = vld [vmem:[%s8099_s15 + $0x70] sm:$0xff] }
 0x118   : > { %11319 = vst [vmem:[#allocation51_spill] sm:$0xff] %v8232_v50  ;;  %v1009_v26 = vmul.f32 %v8232_v50, %v8175_v49  ;;  %7005 = vpow2.f32 %v896_v30  ;;  %v8238_v38 = vpop.eup %6991  ;;  %v761_v30 = vsub.f32 %v665_v52, %v729_v59 }
 0x119   : > { %v8242_v63 = vpop.eup %6993  ;;  %v902_v25 = vmul.f32 1.442695, %v857_v60 }
 0x11a   : > { %11320 = vst [vmem:[#allocation52_spill] sm:$0xff] %v8242_v63  ;;  %4282 = vperm.xlu1 %6942, %v1009_v26   ;;  %v949_v45 = vadd.f32 %v8242_v63, %v8238_v38  ;;  %v696_v26 = vld [vmem:[%s8106_s18 + $0x60] sm:$0xff]  ;;  %v806_v31 = vmul.f32 1.442695, %v761_v30  ;;  %v908_v63 = vmul.f32 1.442695, %v860_v57 }
 0x11b   : > { %v8240_v32 = vpop.f32.mrb[20].mxu0  ;;  %v728_v58 = vmax.f32 %v664_v44, %v696_v26 }
 0x11c   : > { %v8244_v33 = vpop.f32.mrb[20].mxu1  ;;  %v8246_v41 = vpop.f32.mrb[21].mxu0  ;;  %7007 = vrcp.f32 %v949_v45 }
 0x11d   : > { %v8248_v20 = vpop.f32.mrb[21].mxu1  ;;  %v8250_v49 = vpop.f32.mrb[22].mxu0  ;;  %7009 = vpow2.f32 %v806_v31  ;;  %v760_v30 = vsub.f32 %v664_v44, %v728_v58  ;;  %v856_v5 = vsub.f32 %v696_v26, %v728_v58 }
 0x11e   : > { %v8254_v21 = vpop.eup %6995  ;;  %v8256_v54 = vpop.f32.mrb[22].mxu1  ;;  %7011 = vpow2.f32 %v902_v25 }
 0x11f   : > { %v8260_v48 = vpop.f32.mrb[23].mxu0  ;;  %v8266_v53 = vpop.f32.mrb[23].mxu1  ;;  %v1040_v52 = vmul.f32 %v8254_v21, %v8194_v56  ;;  %v804_v44 = vmul.f32 1.442695, %v760_v30  ;;  %v900_v58 = vmul.f32 1.442695, %v856_v5 }
 0x120   : > { %v8272_v59 = vpop.eup %6997 }
 0x121   : > { %11321 = vst [vmem:[#allocation53_spill] sm:$0xff] %v8272_v59  ;;  %v7000_v47 = vpop.eup %6999  ;;  %4879 = vperm.xlu1 %6942, %v1040_v52  }
 0x122   : > { %v8276_v7 = vpop.eup %7001  ;;  %v1010_v17 = vmul.f32 %v7000_v47, %v8201_v19  ;;  %v730_v19 = vmax.f32 %v666_v18, %v698_v3  ;;  %v1042_v9 = vmul.f32 %v7000_v47, %v8205_v1 }
 0x123   : > { %v8281_v4 = vpop.eup %7003  ;;  %v8283_v56 = vpop.f32.mrb[24].mxu0  ;;  %v948_v45 = vadd.f32 %v8276_v7, %v8272_v59 }
 0x124   : > { %v8287_v60 = vpop.eup %7005  ;;  %v8289_v52 = vpop.f32.mrb[24].mxu1  ;;  %v762_v26 = vsub.f32 %v666_v18, %v730_v19  ;;  %v858_v39 = vsub.f32 %v698_v3, %v730_v19  ;;  %v669_v18 = vld [vmem:[%s8099_s15 + $0x88] sm:$0xff] }
 0x125   : > { %v8291_v61 = vpop.f32.mrb[25].mxu0  ;;  %v8293_v31 = vpop.f32.mrb[25].mxu1  ;;  %4287 = vperm.xlu1 %6942, %v1010_v17   ;;  %7013 = vrcp.f32 %v948_v45  ;;  %v950_v25 = vadd.f32 %v8287_v60, %v8281_v4  ;;  %v701_v19 = vld [vmem:[%s8106_s18 + $0x88] sm:$0xff] }
 0x126   : > { %v8295_v14 = vpop.f32.mrb[26].mxu0  ;;  %v8300_v36 = vpop.f32.mrb[26].mxu1  ;;  %v808_v30 = vmul.f32 1.442695, %v762_v26  ;;  %v904_v5 = vmul.f32 1.442695, %v858_v39 }
 0x127   : > { %v8304_v35 = vpop.f32.mrb[27].mxu0  ;;  %v8308_v47 = vpop.f32.mrb[27].mxu1  ;;  %7015 = vrcp.f32 %v950_v25  ;;  %v733_v25 = vmax.f32 %v669_v18, %v701_v19 }
 0x128   : > { %7017 = vpow2.f32 %v804_v44  ;;  %v8314_v16 = vpop.eup %7007 }
 0x129   : > { %11322 = vst [vmem:[#allocation54_spill] sm:$0xff] %v8314_v16  ;;  %4889 = vperm.xlu1 %6942, %v1042_v9   ;;  %7019 = vpow2.f32 %v900_v58  ;;  %v1013_v3 = vmul.f32 %v8314_v16, %v8238_v38  ;;  %v8322_v45 = vpop.eup %7009  ;;  %v765_v58 = vsub.f32 %v669_v18, %v733_v25 }
 0x12a   : > { %7021 = vpow2.f32 %v808_v30  ;;  %v8328_v9 = vpop.eup %7011  ;;  %v861_v30 = vsub.f32 %v701_v19, %v733_v25  ;;  %v702_v19 = vld [vmem:[%s8106_s18 + $0x90] sm:$0xff] }
 0x12b   : > { %v8320_v17 = vpop.f32.mrb[28].mxu0  ;;  %7023 = vpow2.f32 %v904_v5  ;;  %11325 = vst [vmem:[#allocation57_spill] sm:$0xff] %v8328_v9  ;;  %v953_v28 = vadd.f32 %v8328_v9, %v8322_v45  ;;  %v814_v25 = vmul.f32 1.442695, %v765_v58  ;;  %v670_v9 = vld [vmem:[%s8099_s15 + $0x90] sm:$0xff] }
 0x12c   : > { %11323 = vst [vmem:[#allocation55_spill] sm:$0xff] %v8320_v17  ;;  %v8324_v44 = vpop.f32.mrb[28].mxu1  ;;  %v8326_v26 = vpop.f32.mrb[29].mxu0  ;;  %v910_v5 = vmul.f32 1.442695, %v861_v30  ;;  %v734_v11 = vmax.f32 %v670_v9, %v702_v19 }
 0x12d   : > { %11324 = vst [vmem:[#allocation56_spill] sm:$0xff] %v8324_v44  ;;  %v8330_v39 = vpop.f32.mrb[29].mxu1  ;;  %v8332_v38 = vpop.f32.mrb[30].mxu0  ;;  %4302 = vperm.xlu1 %6942, %v1013_v3   ;;  %7025 = vrcp.f32 %v953_v28 }
 0x12e   : > { %11326 = vst [vmem:[#allocation58_spill] sm:$0xff] %v8332_v38  ;;  %v8334_v1 = vpop.f32.mrb[30].mxu1  ;;  %v8338_v51 = vpop.f32.mrb[31].mxu0  ;;  %7027 = vpow2.f32 %v814_v25  ;;  %v862_v59 = vsub.f32 %v702_v19, %v734_v11 }
 0x12f   : > { %11327 = vst [vmem:[#allocation59_spill] sm:$0xff] %v8334_v1  ;;  %v8344_v10 = vpop.eup %7013  ;;  %v8348_v18 = vpop.f32.mrb[31].mxu1  ;;  %7029 = vpow2.f32 %v910_v5  ;;  %v812_v5 = vmul.f32 1.442695, %v764_v15 }
 0x130   : > { %11328 = vst [vmem:[#allocation60_spill] sm:$0xff] %v8344_v10  ;;  %v1044_v13 = vmul.f32 %v8344_v10, %v8276_v7  ;;  %v766_v10 = vsub.f32 %v670_v9, %v734_v11  ;;  %v912_v15 = vmul.f32 1.442695, %v862_v59  ;;  %v11330_v11 = vpack.c.bf16 %v8222_v6, %v8209_v40 }
 0x131   : > { %v7016_v55 = vpop.eup %7015 }
 0x132   : > { %v8356_v12 = vpop.eup %7017  ;;  %4899 = vperm.xlu1 %6942, %v1044_v13   ;;  %v1014_v3 = vmul.f32 %v7016_v55, %v8281_v4  ;;  %v1046_v62 = vmul.f32 %v7016_v55, %v8287_v60  ;;  %v2691_v57 = vsel %vm2384_vm1, %v11330_v11, 0 }
 0x133   : > { %11329 = vst [vmem:[#allocation61_spill] sm:$0xff] %v8356_v12  ;;  %v8361_v58 = vpop.eup %7019  ;;  %v6618_v30 = vpop.f32.mrb[32].mxu0 }
 0x134   : > { %v8363_v23 = vpop.eup %7021  ;;  %v6582_v7 = vpop.f32.mrb[32].mxu1  ;;  %v952_v25 = vadd.f32 %v8361_v58, %v8356_v12  ;;  %v816_v12 = vmul.f32 1.442695, %v766_v10 }
 0x135   : > { %v1745_v28 = vpop.f32.mrb[33].mxu0  ;;  %v8367_v16 = vpop.eup %7023 }
 0x136   : > { %v1536_v13 = vpop.f32.mrb[33].mxu1  ;;  %v6619_v4 = vpop.f32.mrb[34].mxu0  ;;  %4307 = vperm.xlu1 %6942, %v1014_v3   ;;  %7031 = vrcp.f32 %v952_v25  ;;  %v954_v8 = vadd.f32 %v8367_v16, %v8363_v23 }
 0x137   : > { %v6583_v44 = vpop.f32.mrb[34].mxu1  ;;  %v2683_v1 = vpack.c.bf16 %v6619_v4, %v6618_v30  ;;  %v1748_v24 = vpop.f32.mrb[35].mxu0  ;;  %7033 = vpow2.f32 %v812_v5  ;;  %v11335_v4 = vpack.c.bf16 %v8218_v0, %v8207_v2 }
 0x138   : > { %v2377_v27 = vpack.c.bf16 %v6583_v44, %v6582_v7  ;;  %v1539_v17 = vpop.f32.mrb[35].mxu1  ;;  %v2682_v38 = vpack.c.bf16 %v1748_v24, %v1745_v28  ;;  %7035 = vrcp.f32 %v954_v8  ;;  %v8377_v9 = vpop.eup %7025  ;;  %v11331_v44 = vpack.c.bf16 %v8226_v43, %v8212_v29 }
 0x139   : > { %v2376_v50 = vpack.c.bf16 %v1539_v17, %v1536_v13  ;;  %7037 = vpow2.f32 %v908_v63  ;;  %v8384_v55 = vpop.eup %7027  ;;  %v1017_v29 = vmul.f32 %v8377_v9, %v8322_v45  ;;  %v11334_v45 = vpack.c.bf16 %v8214_v37, %v8203_v22 }
 0x13a   : > { %6924 = vmatprep.subr.msk.bf16.mxu0 %vm2384_vm1, %v2682_v38  ;;  %v2434_v10 = vsel %vm2384_vm1, %v11331_v44, 0  ;;  %7039 = vpow2.f32 %v816_v12  ;;  %v8387_v6 = vpop.eup %7029  ;;  %4909 = vperm.xlu1 %6942, %v1046_v62   ;;  %v2437_v5 = vsel %vm2384_vm1, %v11335_v4, 0 }
 0x13b   : > { %6916 = vmatprep.subr.msk.bf16.mxu1 %vm2384_vm1, %v2376_v50  ;;  %6181 = vmatpush3.bf16.xpose.msra.mxu0 %v2691_v57  ;;  %v6622_v40 = vpop.f32.mrb[36].mxu0  ;;  %7041 = vpow2.f32 %v912_v15  ;;  %11332 = vst [vmem:[#allocation62_spill] sm:$0xff] %v8387_v6  ;;  %v957_v12 = vadd.f32 %v8387_v6, %v8384_v55  ;;  %v2694_v28 = vsel %vm2384_vm1, %v11334_v45, 0 }
 0x13c   : > { %6133 = vmatpush3.bf16.xpose.msra.mxu1 %v2434_v10  ;;  %6925 = vmatprep.subr.msk.bf16.mxu0 %vm2384_vm1, %v2683_v1  ;;  %v6586_v63 = vpop.f32.mrb[36].mxu1  ;;  %v1761_v59 = vpop.f32.mrb[37].mxu0 }
 0x13d   : > { %6917 = vmatprep.subr.msk.bf16.mxu1 %vm2384_vm1, %v2377_v27  ;;  %v1552_v43 = vpop.f32.mrb[37].mxu1  ;;  %v6623_v50 = vpop.f32.mrb[38].mxu0  ;;  %7043 = vrcp.f32 %v957_v12  ;;  %v11337_v12 = vpack.c.bf16 %v8260_v48, %v8246_v41 }
 0x13e   : > { %v6587_v60 = vpop.f32.mrb[38].mxu1  ;;  %v2685_v17 = vpack.c.bf16 %v6623_v50, %v6622_v40  ;;  %v1764_v1 = vpop.f32.mrb[39].mxu0  ;;  %4322 = vperm.xlu1 %6942, %v1017_v29  }
 0x13f   : > { %v2379_v38 = vpack.c.bf16 %v6587_v60, %v6586_v63  ;;  %v1555_v3 = vpop.f32.mrb[39].mxu1  ;;  %v2684_v19 = vpack.c.bf16 %v1764_v1, %v1761_v59  ;;  %v2697_v60 = vsel %vm2384_vm1, %v11337_v12, 0  ;;  %v11338_v1 = vpack.c.bf16 %v8266_v53, %v8248_v20 }
 0x140   : > { %v8394_v30 = vpop.eup %7031  ;;  %v2378_v7 = vpack.c.bf16 %v1555_v3, %v1552_v43 }
 0x141   : > { %v8396_v62 = vpop.eup %7033  ;;  %v1048_v25 = vmul.f32 %v8394_v30, %v8361_v58  ;;  %v2440_v3 = vsel %vm2384_vm1, %v11338_v1, 0  ;;  %v11346_v1 = vpack.c.bf16 %v8338_v51, %v8326_v26 }
 0x142   : > { %11333 = vst [vmem:[#allocation63_spill] sm:$0xff] %v8396_v62  ;;  %v7036_v13 = vpop.eup %7035 }
 0x143   : > { %6183 = vmatpush3.bf16.xpose.msra.mxu0 %v2694_v28  ;;  %v7038_v24 = vpop.eup %7037  ;;  %v8409_v8 = vpop.f32.mrb[40].mxu0  ;;  %4919 = vperm.xlu1 %6942, %v1048_v25   ;;  %v1018_v58 = vmul.f32 %v7036_v13, %v8363_v23  ;;  %v1050_v50 = vmul.f32 %v7036_v13, %v8367_v16 }
 0x144   : > { %6135 = vmatpush3.bf16.xpose.msra.mxu1 %v2437_v5  ;;  %6926 = vmatprep.subr.msk.bf16.mxu0 %vm2384_vm1, %v2684_v19  ;;  %v7040_v27 = vpop.eup %7039  ;;  %v8412_v22 = vpop.f32.mrb[40].mxu1  ;;  %v956_v0 = vadd.f32 %v7038_v24, %v8396_v62  ;;  %v659_v5 = vld [vmem:[%s8099_s15 + $0x38] sm:$0xff] }
 0x145   : > { %6918 = vmatprep.subr.msk.bf16.mxu1 %vm2384_vm1, %v2378_v7  ;;  %v1777_v37 = vpop.f32.mrb[41].mxu0  ;;  %v7042_v2 = vpop.eup %7041 }
 0x146   : > { %v1568_v15 = vpop.f32.mrb[41].mxu1  ;;  %v6627_v11 = vpop.f32.mrb[42].mxu0  ;;  %7045 = vrcp.f32 %v956_v0  ;;  %v958_v40 = vadd.f32 %v7042_v2, %v7040_v27 }
 0x147   : > { %v6591_v57 = vpop.f32.mrb[42].mxu1  ;;  %v2687_v44 = vpack.c.bf16 %v6627_v11, %v8409_v8  ;;  %v1780_v10 = vpop.f32.mrb[43].mxu0  ;;  %4327 = vperm.xlu1 %6942, %v1018_v58   ;;  %v11340_v8 = vpack.c.bf16 %v8250_v49, %v8240_v32 }
 0x148   : > { %v2381_v63 = vpack.c.bf16 %v6591_v57, %v8412_v22  ;;  %v1571_v59 = vpop.f32.mrb[43].mxu1  ;;  %v2686_v29 = vpack.c.bf16 %v1780_v10, %v1777_v37  ;;  %7047 = vrcp.f32 %v958_v40  ;;  %v8419_v23 = vpop.eup %7043 }
 0x149   : > { %v2380_v43 = vpack.c.bf16 %v1571_v59, %v1568_v15  ;;  %11336 = vst [vmem:[#allocation64_spill] sm:$0xff] %v8419_v23  ;;  %v1021_v41 = vmul.f32 %v8419_v23, %v8384_v55  ;;  %v691_v55 = vld [vmem:[%s8106_s18 + $0x38] sm:$0xff]  ;;  %v2700_v22 = vsel %vm2384_vm1, %v11340_v8, 0  ;;  %v11341_v15 = vpack.c.bf16 %v8256_v54, %v8244_v33 }
 0x14a   : > { %v723_v58 = vmax.f32 %v659_v5, %v691_v55  ;;  %v11342_v54 = vpack.c.bf16 %v8304_v35, %v8291_v61  ;;  %v11343_v59 = vpack.c.bf16 %v8308_v47, %v8293_v31  ;;  %v11344_v61 = vpack.c.bf16 %v8295_v14, %v8283_v56 }
 0x14b   : > { %6185 = vmatpush3.bf16.xpose.msra.mxu0 %v2697_v60  ;;  %v8430_v19 = vpop.f32.mrb[44].mxu0  ;;  %4929 = vperm.xlu1 %6942, %v1050_v50   ;;  %v2443_v11 = vsel %vm2384_vm1, %v11341_v15, 0  ;;  %v11345_v31 = vpack.c.bf16 %v8300_v36, %v8289_v52  ;;  %v1008_v60 = vmul.f32 %v8254_v21, %v8190_v34  ;;  %v11348_v34 = vld [vmem:[#allocation46_spill] sm:$0xff]  ;;  %v11349_v21 = vld [vmem:[#allocation51_spill] sm:$0xff] }
 0x14c   : > { %6137 = vmatpush3.bf16.xpose.msra.mxu1 %v2440_v3  ;;  %6927 = vmatprep.subr.msk.bf16.mxu0 %vm2384_vm1, %v2685_v17  ;;  %v8433_v16 = vpop.f32.mrb[44].mxu1  ;;  %v1793_v48 = vpop.f32.mrb[45].mxu0  ;;  %v755_v57 = vsub.f32 %v659_v5, %v723_v58  ;;  %v851_v49 = vsub.f32 %v691_v55, %v723_v58  ;;  %v2703_v33 = vsel %vm2384_vm1, %v11342_v54, 0  ;;  %v2706_v35 = vsel %vm2384_vm1, %v11344_v61, 0 }
 0x14d   : > { %6919 = vmatprep.subr.msk.bf16.mxu1 %vm2384_vm1, %v2379_v38  ;;  %v1584_v53 = vpop.f32.mrb[45].mxu1  ;;  %v8437_v20 = vpop.f32.mrb[46].mxu0  ;;  %v2449_v47 = vsel %vm2384_vm1, %v11345_v31, 0 }
 0x14e   : > { %v8439_v7 = vpop.f32.mrb[46].mxu1  ;;  %v2689_v17 = vpack.c.bf16 %v8437_v20, %v8430_v19  ;;  %v1796_v45 = vpop.f32.mrb[47].mxu0  ;;  %v890_v10 = vmul.f32 1.442695, %v851_v49  ;;  %v11358_v49 = vld [vmem:[#allocation61_spill] sm:$0xff] }
 0x14f   : > { %v2383_v38 = vpack.c.bf16 %v8439_v7, %v8433_v16  ;;  %v1587_v28 = vpop.f32.mrb[47].mxu1  ;;  %v2688_v25 = vpack.c.bf16 %v1796_v45, %v1793_v48  ;;  %4342 = vperm.xlu1 %6942, %v1021_v41   ;;  %v1041_v48 = vmul.f32 %v11349_v21, %v11348_v34  ;;  %v11350_v41 = vld [vmem:[#allocation58_spill] sm:$0xff]  ;;  %v11353_v45 = vld [vmem:[#allocation59_spill] sm:$0xff] }
 0x150   : > { %v8445_v13 = vpop.eup %7045  ;;  %v2382_v4 = vpack.c.bf16 %v1587_v28, %v1584_v53  ;;  %v11351_v53 = vld [vmem:[#allocation55_spill] sm:$0xff]  ;;  %v11354_v28 = vld [vmem:[#allocation56_spill] sm:$0xff] }
 0x151   : > { %11339 = vst [vmem:[#allocation65_spill] sm:$0xff] %v8445_v13  ;;  %v1052_v37 = vmul.f32 %v8445_v13, %v7038_v24  ;;  %v794_v24 = vmul.f32 1.442695, %v755_v57  ;;  %v11352_v19 = vpack.c.bf16 %v11350_v41, %v11351_v53  ;;  %v11357_v57 = vld [vmem:[#allocation60_spill] sm:$0xff]  ;;  %v11361_v41 = vld [vmem:[#allocation5_spill] sm:$0xff] }
 0x152   : > { %v7048_v0 = vpop.eup %7047 }
 0x153   : > { %6187 = vmatpush3.bf16.xpose.msra.mxu0 %v2700_v22  ;;  %4939 = vperm.xlu1 %6942, %v1052_v37   ;;  %v1022_v32 = vmul.f32 %v7048_v0, %v7040_v27  ;;  %7049 = vpow2.f32 %v794_v24  ;;  %v1054_v40 = vmul.f32 %v7048_v0, %v7042_v2  ;;  %v663_v27 = vld [vmem:[%s8099_s15 + $0x58] sm:$0xff]  ;;  %v2712_v20 = vsel %vm2384_vm1, %v11352_v19, 0  ;;  %v6674_v5 = vpop.f32.mrb[48].mxu0  ;;  %v8534_v22 = vld [vmem:[%s11012_s8] ss:$0 sm:$0xff] }
 0x154   : > { %6139 = vmatpush3.bf16.xpose.msra.mxu1 %v2443_v11  ;;  %6928 = vmatprep.subr.msk.bf16.mxu0 %vm2384_vm1, %v2686_v29  ;;  %7051 = vpow2.f32 %v890_v10  ;;  %v2446_v29 = vsel %vm2384_vm1, %v11343_v59, 0  ;;  %v695_v2 = vld [vmem:[%s8106_s18 + $0x58] sm:$0xff]  ;;  %v2129_v15 = vpop.f32.mrb[49].mxu0  ;;  %v8542_v24 = vmul.f32 %v8394_v30, %v11358_v49  ;;  %v11359_v59 = vld [vmem:[#allocation52_spill] sm:$0xff] }
 0x155   : > { %6920 = vmatprep.subr.msk.bf16.mxu1 %vm2384_vm1, %v2380_v43  ;;  %v727_v50 = vmax.f32 %v663_v27, %v695_v2  ;;  %v11356_v11 = vld [vmem:[#allocation53_spill] sm:$0xff] }
 0x157   : > { %4347 = vperm.xlu1 %6942, %v1022_v32   ;;  %v759_v14 = vsub.f32 %v663_v27, %v727_v50  ;;  %v855_v56 = vsub.f32 %v695_v2, %v727_v50  ;;  %v1012_v32 = vmul.f32 %v11357_v57, %v11356_v11 }
 0x159   : > { %v802_v36 = vmul.f32 1.442695, %v759_v14  ;;  %v898_v52 = vmul.f32 1.442695, %v855_v56 }
 0x15b   : > { %6189 = vmatpush3.bf16.xpose.msra.mxu0 %v2703_v33  ;;  %4949 = vperm.xlu1 %6942, %v1054_v40   ;;  %v6675_v33 = vpop.f32.mrb[50].mxu0 }
 0x15c   : > { %6141 = vmatpush3.bf16.xpose.msra.mxu1 %v2446_v29  ;;  %6929 = vmatprep.subr.msk.bf16.mxu0 %vm2384_vm1, %v2687_v44  ;;  %v1004_v44 = vmul.f32 %v8156_v46, %v8119_v42  ;;  %v2709_v42 = vsel %vm2384_vm1, %v11346_v1, 0  ;;  %v11347_v46 = vpack.c.bf16 %v8348_v18, %v8330_v39  ;;  %v8505_v39 = vld [vmem:[%s8099_s15 + $0x78] sm:$0xff]  ;;  %v11360_v29 = vld [vmem:[#allocation54_spill] sm:$0xff] }
 0x15d   : > { %6921 = vmatprep.subr.msk.bf16.mxu1 %vm2384_vm1, %v2381_v63  ;;  %v7050_v43 = vpop.eup %7049  ;;  %v8508_v18 = vld [vmem:[%s8106_s18 + $0x78] sm:$0xff]  ;;  %v8548_v27 = vmul.f32 %v11360_v29, %v11359_v59 }
 0x15e   : > { %v7052_v12 = vpop.eup %7051  ;;  %4257 = vperm.xlu0 %6941, %v1004_v44   ;;  %v2452_v3 = vsel %vm2384_vm1, %v11347_v46, 0  ;;  %v8527_v55 = vmax.f32 %v8505_v39, %v8508_v18 }
 0x15f   : > { %v947_v63 = vadd.f32 %v7052_v12, %v7050_v43 }
 0x161   : > { %7053 = vrcp.f32 %v947_v63 }
 0x162   : > { %7055 = vpow2.f32 %v802_v36  ;;  %4277 = vperm.xlu0 %6941, %v1008_v60  }
 0x163   : > { %6191 = vmatpush3.bf16.xpose.msra.mxu0 %v2706_v35  ;;  %7057 = vpow2.f32 %v898_v52 }
 0x164   : > { %6143 = vmatpush3.bf16.xpose.msra.mxu1 %v2449_v47  ;;  %6930 = vmatprep.subr.msk.bf16.mxu0 %vm2384_vm1, %v2688_v25  ;;  %v11355_v25 = vpack.c.bf16 %v11353_v45, %v11354_v28 }
 0x165   : > { %6922 = vmatprep.subr.msk.bf16.mxu1 %vm2384_vm1, %v2382_v4  ;;  %v6638_v4 = vpop.f32.mrb[48].mxu1 }
 0x166   : > { %4884 = vperm.xlu0 %6941, %v1041_v48   ;;  %v2455_v16 = vsel %vm2384_vm1, %v11355_v25, 0  ;;  %v1860_v58 = vpop.f32.mrb[49].mxu1 }
 0x167   : > { %v6639_v40 = vpop.f32.mrb[50].mxu1 }
 0x168   : > { %v1863_v35 = vpop.f32.mrb[51].mxu1 }
 0x169   : > { %v6642_v63 = vpop.f32.mrb[52].mxu1 }
 0x16b   : > { %6193 = vmatpush3.bf16.xpose.msra.mxu0 %v2709_v42  ;;  %v7054_v51 = vpop.eup %7053  ;;  %v1876_v42 = vpop.f32.mrb[53].mxu1 }
 0x16c   : > { %6145 = vmatpush3.bf16.xpose.msra.mxu1 %v2452_v3  ;;  %6931 = vmatprep.subr.msk.bf16.mxu0 %vm2384_vm1, %v2689_v17  ;;  %v1011_v26 = vmul.f32 %v7054_v51, %v7050_v43  ;;  %v8514_v17 = vpop.eup %7055  ;;  %v1043_v7 = vmul.f32 %v7054_v51, %v7052_v12  ;;  %v2132_v12 = vpop.f32.mrb[51].mxu0 }
 0x16d   : > { %6923 = vmatprep.subr.msk.bf16.mxu1 %vm2384_vm1, %v2383_v38  ;;  %v8523_v38 = vld [vmem:[%s11011_s7] ss:$0 sm:$0xff]  ;;  %v8529_v8 = vpop.eup %7057  ;;  %v6678_v56 = vpop.f32.mrb[52].mxu0 }
 0x16e   : > { %4292 = vperm.xlu0 %6941, %v1011_v26   ;;  %v1995_v37 = vmul.f32 %v6638_v4, %v8523_v38  ;;  %v2258_v0 = vmul.f32 %v6674_v5, %v8523_v38  ;;  %v1993_v10 = vmul.f32 %v8523_v38, %v1860_v58  ;;  %v2256_v54 = vmul.f32 %v8523_v38, %v2129_v15  ;;  %v2145_v46 = vpop.f32.mrb[53].mxu0  ;;  %v6643_v51 = vpop.f32.mrb[54].mxu1 }
 0x16f   : > { %v8552_v2 = vadd.f32 %v8529_v8, %v8514_v17  ;;  %v1996_v61 = vmul.f32 %v6639_v40, %v8523_v38  ;;  %v2259_v50 = vmul.f32 %v6675_v33, %v8523_v38  ;;  %v1994_v47 = vmul.f32 %v8523_v38, %v1863_v35  ;;  %v6679_v26 = vpop.f32.mrb[54].mxu0  ;;  %v1879_v28 = vpop.f32.mrb[55].mxu1 }
 0x170   : > { %v2033_v43 = vadd.f32 %v8534_v22, %v1995_v37  ;;  %v2290_v30 = vadd.f32 %v8534_v22, %v2258_v0  ;;  %v2031_v31 = vadd.f32 %v8534_v22, %v1993_v10  ;;  %v2288_v44 = vadd.f32 %v8534_v22, %v2256_v54  ;;  %v2148_v25 = vpop.f32.mrb[55].mxu0  ;;  %v6646_v58 = vpop.f32.mrb[56].mxu1 }
 0x171   : > { %v2257_v14 = vmul.f32 %v8523_v38, %v2132_v12  ;;  %v2034_v36 = vadd.f32 %v8534_v22, %v1996_v61  ;;  %v1999_v1 = vmul.f32 %v6642_v63, %v8523_v38  ;;  %v2032_v34 = vadd.f32 %v8534_v22, %v1994_v47  ;;  %v6682_v0 = vpop.f32.mrb[56].mxu0  ;;  %v1892_v10 = vpop.f32.mrb[57].mxu1 }
 0x172   : > { %4894 = vperm.xlu0 %6941, %v1043_v7   ;;  %v2065_v60 = vmax.f32 %v2033_v43, 0.0  ;;  %v2322_v52 = vmax.f32 %v2290_v30, 0.0  ;;  %v2063_v3 = vmax.f32 %v2031_v31, 0.0  ;;  %v2320_v21 = vmax.f32 %v2288_v44, 0.0  ;;  %v2161_v40 = vpop.f32.mrb[57].mxu0  ;;  %v6647_v43 = vpop.f32.mrb[58].mxu1 }
 0x173   : > { %6195 = vmatpush3.bf16.xpose.msra.mxu0 %v2712_v20  ;;  %v2291_v48 = vadd.f32 %v8534_v22, %v2259_v50  ;;  %v2066_v53 = vmax.f32 %v2034_v36, 0.0  ;;  %v2037_v19 = vadd.f32 %v8534_v22, %v1999_v1  ;;  %v1997_v20 = vmul.f32 %v8523_v38, %v1876_v42  ;;  %v6683_v61 = vpop.f32.mrb[58].mxu0  ;;  %v1895_v12 = vpop.f32.mrb[59].mxu1 }
 0x174   : > { %6147 = vmatpush3.bf16.xpose.msra.mxu1 %v2455_v16  ;;  %v2289_v45 = vadd.f32 %v8534_v22, %v2257_v14  ;;  %v11362_v16 = vld [vmem:[#allocation17_spill] sm:$0xff]  ;;  %v2064_v7 = vmax.f32 %v2032_v34, 0.0  ;;  %v2000_v5 = vmul.f32 %v6643_v51, %v8523_v38  ;;  %v2262_v37 = vmul.f32 %v6678_v56, %v8523_v38  ;;  %v2164_v31 = vpop.f32.mrb[59].mxu0  ;;  %v6650_v56 = vpop.f32.mrb[60].mxu1 }
 0x175   : > { %v2323_v4 = vmax.f32 %v2291_v48, 0.0  ;;  %v8579_v15 = vpack.c.bf16 %v2066_v53, %v2065_v60  ;;  %v2069_v11 = vmax.f32 %v2037_v19, 0.0  ;;  %v2035_v57 = vadd.f32 %v8534_v22, %v1997_v20  ;;  %v6686_v60 = vpop.f32.mrb[60].mxu0 }
 0x176   : > { %4297 = vperm.xlu0 %6941, %v1012_v32   ;;  %v2321_v49 = vmax.f32 %v2289_v45, 0.0  ;;  %v8582_v54 = vpack.c.bf16 %v2064_v7, %v2063_v3  ;;  %v2038_v59 = vadd.f32 %v8534_v22, %v2000_v5  ;;  %v2294_v29 = vadd.f32 %v8534_v22, %v2262_v37 }
 0x177   : > { %v8584_v33 = vpack.c.bf16 %v2323_v4, %v2322_v52  ;;  %v2067_v30 = vmax.f32 %v2035_v57, 0.0  ;;  %v1998_v32 = vmul.f32 %v8523_v38, %v1879_v28  ;;  %v2260_v50 = vmul.f32 %v8523_v38, %v2145_v46  ;;  %v1908_v46 = vpop.f32.mrb[61].mxu1  ;;  %v11363_v28 = vld [vmem:[#allocation2_spill] sm:$0xff] }
 0x178   : > { %v8588_v35 = vpack.c.bf16 %v2321_v49, %v2320_v21  ;;  %v2070_v47 = vmax.f32 %v2038_v59, 0.0  ;;  %v2326_v44 = vmax.f32 %v2294_v29, 0.0  ;;  %v2003_v63 = vmul.f32 %v6646_v58, %v8523_v38  ;;  %v6651_v51 = vpop.f32.mrb[62].mxu1 }
 0x179   : > { %v2263_v14 = vmul.f32 %v6679_v26, %v8523_v38  ;;  %v2036_v36 = vadd.f32 %v8534_v22, %v1998_v32  ;;  %v2292_v52 = vadd.f32 %v8534_v22, %v2260_v50  ;;  %v2001_v1 = vmul.f32 %v8523_v38, %v1892_v10  ;;  %v8604_v26 = vpop.f32.mrb[61].mxu0  ;;  %v1911_v20 = vpop.f32.mrb[63].mxu1 }
 0x17a   : > { %6197 = vmatmul.mubr.msk.bf16.vlgmr.msra.gmra.mrb[80].mxu0 %vm2384_vm1, %v11361_v41  ;;  %4904 = vperm.xlu0 %6941, %v8548_v27   ;;  %v2261_v42 = vmul.f32 %v8523_v38, %v2148_v25  ;;  %v8599_v3 = vpack.c.bf16 %v2070_v47, %v2069_v11  ;;  %v2041_v34 = vadd.f32 %v8534_v22, %v2003_v63  ;;  %v8610_v45 = vpop.f32.mrb[62].mxu0  ;;  %v6654_v37 = vpop.f32.mrb[64].mxu1  ;;  %7059 = vrcp.f32 %v8552_v2 }
 0x17b   : > { %6149 = vmatmul.mubr.msk.bf16.vlgmr.msra.gmra.mrb[80].mxu1 %vm2384_vm1, %v11361_v41  ;;  %6198 = vmatprep.mubr.msk.bf16.mxu0 %vm2384_vm1, %v11362_v16  ;;  %v2295_v21 = vadd.f32 %v8534_v22, %v2263_v14  ;;  %v2004_v48 = vmul.f32 %v6647_v43, %v8523_v38  ;;  %v2068_v27 = vmax.f32 %v2036_v36, 0.0  ;;  %v2324_v41 = vmax.f32 %v2292_v52, 0.0  ;;  %v8618_v58 = vpop.f32.mrb[63].mxu0  ;;  %v8625_v10 = vpop.f32.mrb[65].mxu1 }
 0x17c   : > { %6150 = vmatprep.mubr.msk.bf16.mxu1 %vm2384_vm1, %v11362_v16  ;;  %v2039_v53 = vadd.f32 %v8534_v22, %v2001_v1  ;;  %v2293_v19 = vadd.f32 %v8534_v22, %v2261_v42  ;;  %v2073_v25 = vmax.f32 %v2041_v34, 0.0  ;;  %v2266_v5 = vmul.f32 %v6682_v0, %v8523_v38  ;;  %v8631_v32 = vpop.f32.mrb[66].mxu1  ;;  %v8633_v50 = vpop.f32.mrb[64].mxu0  ;;  %v11365_v1 = vld [vmem:[#allocation57_spill] sm:$0xff] }
 0x17d   : > { %v2327_v7 = vmax.f32 %v2295_v21, 0.0  ;;  %v2042_v4 = vadd.f32 %v8534_v22, %v2004_v48  ;;  %v8622_v11 = vpack.c.bf16 %v2068_v27, %v2067_v30  ;;  %v2264_v0 = vmul.f32 %v8523_v38, %v2161_v40  ;;  %v8640_v63 = vpop.f32.mrb[67].mxu1 }
 0x17e   : > { %v2071_v57 = vmax.f32 %v2039_v53, 0.0  ;;  %v2325_v49 = vmax.f32 %v2293_v19, 0.0  ;;  %v2298_v43 = vadd.f32 %v8534_v22, %v2266_v5  ;;  %v2267_v36 = vmul.f32 %v6683_v61, %v8523_v38  ;;  %v8654_v34 = vpop.f32.mrb[68].mxu1 }
 0x17f   : > { %v8627_v59 = vpack.c.bf16 %v2327_v7, %v2326_v44  ;;  %v2074_v29 = vmax.f32 %v2042_v4, 0.0  ;;  %v8642_v44 = vpop.f32.mrb[65].mxu0  ;;  %v2296_v40 = vadd.f32 %v8534_v22, %v2264_v0  ;;  %v8652_v42 = vmul.f32 %v8377_v9, %v11365_v1  ;;  %v8664_v9 = vpop.f32.mrb[69].mxu1 }
 0x180   : > { %v8635_v47 = vpack.c.bf16 %v2325_v49, %v2324_v41  ;;  %v8648_v52 = vpop.f32.mrb[66].mxu0  ;;  %v2005_v21 = vmul.f32 %v8523_v38, %v1908_v46  ;;  %v2265_v48 = vmul.f32 %v8523_v38, %v2164_v31  ;;  %v2330_v41 = vmax.f32 %v2298_v43, 0.0  ;;  %v8674_v5 = vpop.f32.mrb[70].mxu1 }
 0x181   : > { %v8644_v14 = vpack.c.bf16 %v2074_v29, %v2073_v25  ;;  %v8659_v27 = vpop.f32.mrb[67].mxu0  ;;  %v2299_v61 = vadd.f32 %v8534_v22, %v2267_v36  ;;  %v2008_v53 = vmul.f32 %v6651_v51, %v8523_v38  ;;  %v2270_v19 = vmul.f32 %v6686_v60, %v8523_v38  ;;  %v11366_v60 = vld [vmem:[#allocation21_spill] sm:$0xff]  ;;  %v8684_v43 = vpop.f32.mrb[71].mxu1 }
 0x182   : > { %6199 = vmatmul.mubr.msk.bf16.gmra.mrb[84].mxu0 %vm2384_vm1, %v11362_v16  ;;  %v8666_v25 = vpop.f32.mrb[68].mxu0  ;;  %v2328_v46 = vmax.f32 %v2296_v40, 0.0  ;;  %v2043_v31 = vadd.f32 %v8534_v22, %v2005_v21  ;;  %v2297_v4 = vadd.f32 %v8534_v22, %v2265_v48  ;;  %v2006_v29 = vmul.f32 %v8523_v38, %v1911_v20 }
 0x183   : > { %6151 = vmatmul.mubr.msk.bf16.gmra.mrb[84].mxu1 %vm2384_vm1, %v11362_v16  ;;  %6200 = vmatprep.mubr.msk.bf16.mxu0 %vm2384_vm1, %v11363_v28  ;;  %v2002_v16 = vmul.f32 %v8523_v38, %v1895_v12  ;;  %v2007_v12 = vmul.f32 %v6650_v56, %v8523_v38  ;;  %11364 = vst [vmem:[#allocation46_spill] sm:$0xff] %v8644_v14  ;;  %v8676_v49 = vpop.f32.mrb[69].mxu0 }
 0x184   : > { %6152 = vmatprep.mubr.msk.bf16.mxu1 %vm2384_vm1, %v11363_v28  ;;  %v8686_v0 = vpop.f32.mrb[70].mxu0  ;;  %v2011_v40 = vmul.f32 %v6654_v37, %v8523_v38  ;;  %v2075_v20 = vmax.f32 %v2043_v31, 0.0  ;;  %v8699_v21 = vpop.f32.mrb[72].mxu1 }
 0x185   : > { %v2040_v30 = vadd.f32 %v8534_v22, %v2002_v16  ;;  %v2045_v56 = vadd.f32 %v8534_v22, %v2007_v12  ;;  %v2331_v16 = vmax.f32 %v2299_v61, 0.0  ;;  %v2302_v12 = vadd.f32 %v8534_v22, %v2270_v19  ;;  %v8694_v36 = vpop.f32.mrb[71].mxu0 }
 0x186   : > { %v8701_v48 = vpop.f32.mrb[72].mxu0 }
 0x187   : > { %v2072_v2 = vmax.f32 %v2040_v30, 0.0  ;;  %v2077_v51 = vmax.f32 %v2045_v56, 0.0  ;;  %v2329_v30 = vmax.f32 %v2297_v4, 0.0  ;;  %v8696_v1 = vpack.c.bf16 %v2331_v16, %v2330_v41  ;;  %v8710_v41 = vpop.f32.mrb[73].mxu1  ;;  %v8712_v19 = vpop.f32.mrb[73].mxu0 }
 0x188   : > { %v2044_v56 = vadd.f32 %v8534_v22, %v2006_v29  ;;  %v2009_v16 = vmul.f32 %v8523_v38, %v8625_v10  ;;  %v8722_v29 = vpop.f32.mrb[74].mxu0 }
 0x189   : > { %v8670_v7 = vpack.c.bf16 %v2072_v2, %v2071_v57  ;;  %v2046_v57 = vadd.f32 %v8534_v22, %v2008_v53  ;;  %11367 = vst [vmem:[#allocation51_spill] sm:$0xff] %v8696_v1  ;;  %v8703_v61 = vpack.c.bf16 %v2329_v30, %v2328_v46  ;;  %v2269_v46 = vmul.f32 %v8523_v38, %v8618_v58  ;;  %v8738_v6 = vpop.f32.mrb[75].mxu0 }
 0x18a   : > { %6201 = vmatmul.mubr.msk.bf16.gmra.mrb[88].mxu0 %vm2384_vm1, %v11363_v28  ;;  %v2076_v4 = vmax.f32 %v2044_v56, 0.0  ;;  %v2334_v30 = vmax.f32 %v2302_v12, 0.0  ;;  %v8736_v23 = vadd.f32 %v8534_v22, %v2009_v16  ;;  %v2272_v16 = vmul.f32 %v8523_v38, %v8642_v44 }
 0x18b   : > { %6153 = vmatmul.mubr.msk.bf16.gmra.mrb[88].mxu1 %vm2384_vm1, %v11363_v28  ;;  %6202 = vmatprep.mubr.msk.bf16.mxu0 %vm2384_vm1, %v11366_v60  ;;  %v2268_v28 = vmul.f32 %v8523_v38, %v8604_v26  ;;  %v2078_v2 = vmax.f32 %v2046_v57, 0.0  ;;  %v2271_v26 = vmul.f32 %v8610_v45, %v8523_v38  ;;  %v8720_v57 = vpop.f32.mrb[74].mxu1  ;;  %v7060_v45 = vpop.eup %7059  ;;  %v2273_v1 = vmul.f32 %v8523_v38, %v8659_v27 }
 0x18c   : > { %6154 = vmatprep.mubr.msk.bf16.mxu1 %vm2384_vm1, %v11366_v60  ;;  %v1015_v10 = vmul.f32 %v7060_v45, %v8514_v17  ;;  %v8733_v56 = vpack.c.bf16 %v2076_v4, %v2075_v20  ;;  %v2274_v17 = vmul.f32 %v8633_v50, %v8523_v38  ;;  %v11370_v4 = vld [vmem:[#allocation44_spill] sm:$0xff] }
 0x18d   : > { %v2300_v53 = vadd.f32 %v8534_v22, %v2268_v28  ;;  %v8714_v31 = vpack.c.bf16 %v2078_v2, %v2077_v51  ;;  %v8725_v28 = vadd.f32 %v8534_v22, %v2011_v40  ;;  %v2303_v37 = vadd.f32 %v8534_v22, %v2271_v26  ;;  %v8730_v2 = vpop.f32.mrb[75].mxu1 }
 0x18e   : > { %v2012_v51 = vmul.f32 %v8631_v32, %v8523_v38  ;;  %11369 = vst [vmem:[#allocation55_spill] sm:$0xff] %v8733_v56  ;;  %v8740_v12 = vpop.f32.mrb[76].mxu1  ;;  %v2301_v32 = vadd.f32 %v8534_v22, %v2269_v46  ;;  %v2275_v46 = vmul.f32 %v8648_v52, %v8523_v38  ;;  %4312 = vperm.xlu0 %6941, %v1015_v10  }
 0x18f   : > { %11368 = vst [vmem:[#allocation58_spill] sm:$0xff] %v8714_v31  ;;  %v2332_v58 = vmax.f32 %v2300_v53, 0.0  ;;  %v2335_v40 = vmax.f32 %v2303_v37, 0.0  ;;  %v8750_v20 = vpop.f32.mrb[77].mxu1  ;;  %v8752_v53 = vpop.f32.mrb[76].mxu0  ;;  %v2010_v37 = vmul.f32 %v8523_v38, %v8640_v63  ;;  %v2081_v13 = vmax.f32 %v8725_v28, 0.0 }
 0x190   : > { %v8746_v26 = vadd.f32 %v8534_v22, %v2012_v51  ;;  %v8764_v50 = vpop.f32.mrb[78].mxu1  ;;  %v8766_v51 = vpop.f32.mrb[77].mxu0  ;;  %v2333_v63 = vmax.f32 %v2301_v32, 0.0  ;;  %v2306_v44 = vadd.f32 %v8534_v22, %v2274_v17  ;;  %v2304_v56 = vadd.f32 %v8534_v22, %v2272_v16 }
 0x191   : > { %v8772_v62 = vpack.c.bf16 %v2335_v40, %v2334_v30  ;;  %v8774_v31 = vpop.f32.mrb[79].mxu1  ;;  %v2048_v52 = vadd.f32 %v8534_v22, %v2010_v37  ;;  %v8781_v14 = vpop.f32.mrb[78].mxu0  ;;  %v2013_v30 = vmul.f32 %v8523_v38, %v8664_v9  ;;  %v2079_v40 = vmax.f32 %v8736_v23, 0.0 }
 0x192   : > { %6203 = vmatmul.mubr.msk.bf16.gmra.mrb[92].mxu0 %vm2384_vm1, %v11366_v60  ;;  %v8783_v10 = vpack.c.bf16 %v2333_v63, %v2332_v58  ;;  %v8790_v28 = vpop.f32.mrb[79].mxu0  ;;  %v2082_v32 = vmax.f32 %v8746_v26, 0.0  ;;  %v2305_v27 = vadd.f32 %v8534_v22, %v2273_v1  ;;  %v2278_v9 = vmul.f32 %v8666_v25, %v8523_v38  ;;  %v11372_v25 = vld [vmem:[#allocation42_spill] sm:$0xff] }
 0x193   : > { %6155 = vmatmul.mubr.msk.bf16.gmra.mrb[92].mxu1 %vm2384_vm1, %v11366_v60  ;;  %6204 = vmatprep.mubr.msk.bf16.mxu0 %vm2384_vm1, %v11370_v4  ;;  %v1047_v60 = vmul.f32 %v7060_v45, %v8529_v8  ;;  %v2307_v8 = vadd.f32 %v8534_v22, %v2275_v46  ;;  %v2015_v45 = vmul.f32 %v8654_v34, %v8523_v38  ;;  %v2080_v17 = vmax.f32 %v2048_v52, 0.0 }
 0x194   : > { %6156 = vmatprep.mubr.msk.bf16.mxu1 %vm2384_vm1, %v11370_v4  ;;  %v8799_v37 = vadd.f32 %v8534_v22, %v2013_v30  ;;  %v2016_v34 = vmul.f32 %v8674_v5, %v8523_v38  ;;  %v2338_v16 = vmax.f32 %v2306_v44, 0.0  ;;  %v2014_v23 = vmul.f32 %v8523_v38, %v8684_v43 }
 0x195   : > { %4914 = vperm.xlu0 %6941, %v1047_v60   ;;  %v8796_v58 = vadd.f32 %v8534_v22, %v2015_v45  ;;  %v2276_v1 = vmul.f32 %v8523_v38, %v8676_v49  ;;  %v11371_v26 = vsub.f32 %v8505_v39, %v8527_v55  ;;  %v2336_v60 = vmax.f32 %v2304_v56, 0.0 }
 0x196   : > { %v2339_v63 = vmax.f32 %v2307_v8, 0.0  ;;  %v2337_v5 = vmax.f32 %v2305_v27, 0.0  ;;  %v8815_v52 = vadd.f32 %v8534_v22, %v2016_v34  ;;  %v8823_v39 = vadd.f32 %v8534_v22, %v2278_v9 }
 0x197   : > { %v810_v46 = vmul.f32 1.442695, %v11371_v26  ;;  %v2085_v49 = vmax.f32 %v8796_v58, 0.0  ;;  %v2052_v43 = vadd.f32 %v8534_v22, %v2014_v23  ;;  %v859_v56 = vsub.f32 %v8508_v18, %v8527_v55  ;;  %v11373_v23 = vld [vmem:[#allocation49_spill] sm:$0xff] }
 0x198   : > { %v2308_v44 = vadd.f32 %v8534_v22, %v2276_v1  ;;  %v2279_v8 = vmul.f32 %v8686_v0, %v8523_v38  ;;  %v3835_v45 = vpack.c.bf16 %v2080_v17, %v2079_v40  ;;  %v2277_v34 = vmul.f32 %v8523_v38, %v8694_v36 }
 0x199   : > { %4317 = vperm.xlu0 %6941, %v8542_v24   ;;  %v2084_v30 = vmax.f32 %v2052_v43, 0.0  ;;  %7061 = vpow2.f32 %v810_v46  ;;  %v906_v27 = vmul.f32 1.442695, %v859_v56  ;;  %v3883_v55 = vpack.c.bf16 %v2337_v5, %v2336_v60 }
 0x19a   : > { %6205 = vmatmul.mubr.msk.bf16.gmra.mrb[96].mxu0 %vm2384_vm1, %v11370_v4  ;;  %v2311_v18 = vadd.f32 %v8534_v22, %v2279_v8  ;;  %6340 = vmatprep.subr.bf16.mxu0 %v3835_v45  ;;  %v2019_v24 = vmul.f32 %v8699_v21, %v8523_v38  ;;  %v2309_v9 = vadd.f32 %v8534_v22, %v2277_v34  ;;  %v2340_v36 = vmax.f32 %v2308_v44, 0.0  ;;  %v703_v34 = vld [vmem:[%s8106_s18 + $0x98] sm:$0xff] }
 0x19b   : > { %6157 = vmatmul.mubr.msk.bf16.gmra.mrb[96].mxu1 %vm2384_vm1, %v11370_v4  ;;  %6206 = vmatprep.mubr.msk.bf16.mxu0 %vm2384_vm1, %v11372_v25  ;;  %v2083_v4 = vmax.f32 %v8799_v37, 0.0  ;;  %v3836_v37 = vpack.c.bf16 %v2082_v32, %v2081_v13  ;;  %7063 = vpow2.f32 %v906_v27  ;;  %v2017_v0 = vmul.f32 %v8523_v38, %v8710_v41  ;;  %v671_v27 = vld [vmem:[%s8099_s15 + $0x98] sm:$0xff] }
 0x19c   : > { %6158 = vmatprep.mubr.msk.bf16.mxu1 %vm2384_vm1, %v11372_v25  ;;  %6341 = vmatpush3.bf16.msra.mxu0 %v8582_v54  ;;  %v2020_v40 = vmul.f32 %v8720_v57, %v8523_v38  ;;  %v8848_v17 = vadd.f32 %v8534_v22, %v2019_v24  ;;  %v2282_v13 = vmul.f32 %v8701_v48, %v8523_v38  ;;  %v2341_v32 = vmax.f32 %v2309_v9, 0.0 }
 0x19d   : > { %4924 = vperm.xlu0 %6941, %v8652_v42   ;;  %6228 = vmatprep.subr.bf16.mxu1 %v3883_v55  ;;  %v3884_v21 = vpack.c.bf16 %v2339_v63, %v2338_v16  ;;  %v8854_v54 = vadd.f32 %v8534_v22, %v2017_v0  ;;  %v2018_v42 = vmul.f32 %v8523_v38, %v8730_v2  ;;  %v2086_v57 = vmax.f32 %v8815_v52, 0.0 }
 0x19e   : > { %6229 = vmatpush3.bf16.msra.mxu1 %v8588_v35  ;;  %6342 = vmatprep.subr.bf16.mxu0 %v3836_v37  ;;  %v8857_v41 = vadd.f32 %v8534_v22, %v2020_v40  ;;  %v2342_v48 = vmax.f32 %v8823_v39, 0.0  ;;  %v8866_v16 = vadd.f32 %v8534_v22, %v2282_v13  ;;  %v2280_v35 = vmul.f32 %v8523_v38, %v8712_v19  ;;  %v11374_v37 = vld [vmem:[#allocation47_spill] sm:$0xff] }
 0x19f   : > { %6230 = vmatprep.subr.bf16.mxu1 %v3884_v21  ;;  %v2343_v2 = vmax.f32 %v2311_v18, 0.0  ;;  %v2089_v1 = vmax.f32 %v8848_v17, 0.0  ;;  %v2056_v26 = vadd.f32 %v8534_v22, %v2018_v42  ;;  %v2283_v46 = vmul.f32 %v8722_v29, %v8523_v38  ;;  %v11376_v17 = vld [vmem:[#allocation46_spill] sm:$0xff] }
 0x1a0   : > { %v2087_v60 = vmax.f32 %v8854_v54, 0.0  ;;  %6343 = vmatpush3.bf16.msra.mxu0 %v8579_v15  ;;  %v2312_v19 = vadd.f32 %v8534_v22, %v2280_v35  ;;  %v3837_v63 = vpack.c.bf16 %v2084_v30, %v2083_v4  ;;  %v2281_v5 = vmul.f32 %v8523_v38, %v8738_v6 }
 0x1a1   : > { %v2090_v52 = vmax.f32 %v8857_v41, 0.0  ;;  %v2315_v29 = vadd.f32 %v8534_v22, %v2283_v46  ;;  %v3885_v39 = vpack.c.bf16 %v2341_v32, %v2340_v36  ;;  %v2088_v43 = vmax.f32 %v2056_v26, 0.0 }
 0x1a2   : > { %6207 = vmatmul.mubr.msk.bf16.gmra.mrb[100].mxu0 %vm2384_vm1, %v11372_v25  ;;  %6231 = vmatpush3.bf16.msra.mxu1 %v8584_v33  ;;  %v2313_v15 = vadd.f32 %v8534_v22, %v2281_v5  ;;  %v2023_v56 = vmul.f32 %v8740_v12, %v8523_v38  ;;  %v3838_v6 = vpack.c.bf16 %v2086_v57, %v2085_v49  ;;  %v2344_v44 = vmax.f32 %v2312_v19, 0.0  ;;  %v11378_v19 = vld [vmem:[#allocation55_spill] sm:$0xff] }
 0x1a3   : > { %6159 = vmatmul.mubr.msk.bf16.gmra.mrb[100].mxu1 %vm2384_vm1, %v11372_v25  ;;  %6208 = vmatprep.mubr.msk.bf16.mxu0 %vm2384_vm1, %v11373_v23  ;;  %v2346_v25 = vmax.f32 %v8866_v16, 0.0  ;;  %v8894_v4 = vpop.eup %7061  ;;  %v2021_v33 = vmul.f32 %v8523_v38, %v8750_v20  ;;  %v2024_v8 = vmul.f32 %v8764_v50, %v8523_v38  ;;  %v2286_v45 = vmul.f32 %v8752_v53, %v8523_v38 }
 0x1a4   : > { %6160 = vmatprep.mubr.msk.bf16.mxu1 %vm2384_vm1, %v11373_v23  ;;  %6344 = vmatprep.subr.bf16.mxu0 %v3837_v63  ;;  %v2347_v30 = vmax.f32 %v2315_v29, 0.0  ;;  %v2061_v12 = vadd.f32 %v8534_v22, %v2023_v56  ;;  %v3886_v58 = vpack.c.bf16 %v2343_v2, %v2342_v48  ;;  %v2022_v49 = vmul.f32 %v8523_v38, %v8774_v31  ;;  %v11380_v29 = vld [vmem:[#allocation58_spill] sm:$0xff] }
 0x1a5   : > { %6232 = vmatprep.subr.bf16.mxu1 %v3885_v39  ;;  %6345 = vmatpush3.bf16.msra.mxu0 %v8622_v11  ;;  %v8908_v18 = vpop.eup %7063  ;;  %v2345_v20 = vmax.f32 %v2313_v15, 0.0  ;;  %v2059_v50 = vadd.f32 %v8534_v22, %v2021_v33  ;;  %v2062_v53 = vadd.f32 %v8534_v22, %v2024_v8  ;;  %v2318_v11 = vadd.f32 %v8534_v22, %v2286_v45  ;;  %v11381_v39 = vld [vmem:[#allocation63_spill] sm:$0xff]  ;;  %v11383_v56 = vld [vmem:[#allocation62_spill] sm:$0xff] }
 0x1a6   : > { %6233 = vmatpush3.bf16.msra.mxu1 %v8635_v47  ;;  %6346 = vmatprep.subr.bf16.mxu0 %v3838_v6  ;;  %v955_v31 = vadd.f32 %v8908_v18, %v8894_v4  ;;  %v2093_v55 = vmax.f32 %v2061_v12, 0.0  ;;  %v2060_v24 = vadd.f32 %v8534_v22, %v2022_v49  ;;  %v2284_v47 = vmul.f32 %v8523_v38, %v8766_v51  ;;  %v11384_v6 = vld [vmem:[#allocation64_spill] sm:$0xff]  ;;  %v11386_v8 = vld [vmem:[#allocation22_spill] sm:$0xff]  ;;  %v11388_v12 = vld [vmem:[#allocation43_spill] sm:$0xff] }
 0x1a7   : > { %6234 = vmatprep.subr.bf16.mxu1 %v3886_v58  ;;  %v2091_v9 = vmax.f32 %v2059_v50, 0.0  ;;  %v2094_v0 = vmax.f32 %v2062_v53, 0.0  ;;  %v2350_v40 = vmax.f32 %v2318_v11, 0.0  ;;  %v735_v36 = vmax.f32 %v671_v27, %v703_v34  ;;  %v11389_v58 = vld [vmem:[#allocation50_spill] sm:$0xff]  ;;  %v11390_v49 = vld [vmem:[#allocation48_spill] sm:$0xff] }
 0x1a8   : > { %7065 = vrcp.f32 %v955_v31  ;;  %v2092_v13 = vmax.f32 %v2060_v24, 0.0  ;;  %v2316_v21 = vadd.f32 %v8534_v22, %v2284_v47  ;;  %v2287_v51 = vmul.f32 %v8781_v14, %v8523_v38 }
 0x1a9   : > { %6347 = vmatpush3.bf16.msra.mxu0 %v8599_v3  ;;  %v767_v32 = vsub.f32 %v671_v27, %v735_v36  ;;  %v863_v54 = vsub.f32 %v703_v34, %v735_v36  ;;  %v3839_v41 = vpack.c.bf16 %v2088_v43, %v2087_v60  ;;  %v2285_v42 = vmul.f32 %v8523_v38, %v8790_v28  ;;  %v9020_v27 = vpop.permute.xlu1 %4262 }
 0x1aa   : > { %6209 = vmatmul.mubr.msk.bf16.gmra.mrb[104].mxu0 %vm2384_vm1, %v11373_v23  ;;  %6235 = vmatpush3.bf16.msra.mxu1 %v8627_v59  ;;  %v2348_v57 = vmax.f32 %v2316_v21, 0.0  ;;  %v2319_v48 = vadd.f32 %v8534_v22, %v2287_v51  ;;  %v3887_v16 = vpack.c.bf16 %v2345_v20, %v2344_v44  ;;  %v3840_v3 = vpack.c.bf16 %v2090_v52, %v2089_v1  ;;  %v11379_v52 = vld [vmem:[#allocation18_spill] sm:$0xff]  ;;  %v11385_v44 = vld [vmem:[#allocation3_spill] sm:$0xff] }
 0x1ab   : > { %6161 = vmatmul.mubr.msk.bf16.gmra.mrb[104].mxu1 %vm2384_vm1, %v11373_v23  ;;  %6210 = vmatprep.mubr.msk.bf16.mxu0 %vm2384_vm1, %v11374_v37  ;;  %v818_v35 = vmul.f32 1.442695, %v767_v32  ;;  %v914_v23 = vmul.f32 1.442695, %v863_v54  ;;  %v2317_v14 = vadd.f32 %v8534_v22, %v2285_v42  ;;  %v3888_v2 = vpack.c.bf16 %v2347_v30, %v2346_v25  ;;  %v11375_v22 = vld [vmem:[#allocation7_spill] sm:$0xff]  ;;  %v11387_v30 = vld [vmem:[#allocation45_spill] sm:$0xff] }
 0x1ac   : > { %6162 = vmatprep.mubr.msk.bf16.mxu1 %vm2384_vm1, %v11374_v37  ;;  %6348 = vmatprep.subr.bf16.mxu0 %v3839_v41  ;;  %v2351_v59 = vmax.f32 %v2319_v48, 0.0  ;;  %v3841_v26 = vpack.c.bf16 %v2092_v13, %v2091_v9  ;;  %v3842_v46 = vpack.c.bf16 %v2094_v0, %v2093_v55  ;;  %11391 = vst [vmem:[#allocation59_spill] sm:$0xff] %v9020_v27 }
 0x1ad   : > { %6349 = vmatpush3.bf16.msra.mxu0 %v8670_v7  ;;  %6236 = vmatprep.subr.bf16.mxu1 %v3887_v16  ;;  %7067 = vpow2.f32 %v818_v35  ;;  %v2349_v38 = vmax.f32 %v2317_v14, 0.0  ;;  %v9022_v34 = vpop.permute.xlu1 %4859 }
 0x1ae   : > { %6237 = vmatpush3.bf16.msra.mxu1 %v8703_v61  ;;  %6350 = vmatprep.subr.bf16.mxu0 %v3840_v3  ;;  %7069 = vpow2.f32 %v914_v23  ;;  %v3890_v28 = vpack.c.bf16 %v2351_v59, %v2350_v40  ;;  %v11377_v61 = vld [vmem:[#allocation51_spill] sm:$0xff]  ;;  %11392 = vst [vmem:[#allocation56_spill] sm:$0xff] %v9022_v34 }
 0x1af   : > { %6238 = vmatprep.subr.bf16.mxu1 %v3888_v2  ;;  %v3889_v7 = vpack.c.bf16 %v2349_v38, %v2348_v57 }
 0x1b1   : > { %6351 = vmatpush3.bf16.msra.mxu0 %v11376_v17 }
 0x1b2   : > { %6211 = vmatmul.mubr.msk.bf16.gmra.mrb[108].mxu0 %vm2384_vm1, %v11374_v37  ;;  %6239 = vmatpush3.bf16.msra.mxu1 %v11377_v61  ;;  %v7066_v1 = vpop.eup %7065 }
 0x1b3   : > { %6163 = vmatmul.mubr.msk.bf16.gmra.mrb[108].mxu1 %vm2384_vm1, %v11374_v37  ;;  %6212 = vmatprep.mubr.msk.bf16.mxu0 %vm2384_vm1, %v11375_v22  ;;  %v1019_v60 = vmul.f32 %v7066_v1, %v8894_v4  ;;  %v1051_v63 = vmul.f32 %v7066_v1, %v8908_v18  ;;  %v1053_v4 = vmul.f32 %v11384_v6, %v11383_v56  ;;  %v9024_v18 = vpop.permute.xlu1 %4864 }
 0x1b4   : > { %6164 = vmatprep.mubr.msk.bf16.mxu1 %vm2384_vm1, %v11375_v22  ;;  %6352 = vmatprep.subr.bf16.mxu0 %v3841_v26  ;;  %11393 = vst [vmem:[#allocation53_spill] sm:$0xff] %v9024_v18 }
 0x1b5   : > { %6240 = vmatprep.subr.bf16.mxu1 %v3889_v7  ;;  %6353 = vmatpush3.bf16.msra.mxu0 %v11378_v19 }
 0x1b6   : > { %4332 = vperm.xlu0 %6941, %v1019_v60   ;;  %6241 = vmatpush3.bf16.msra.mxu1 %v8783_v10  ;;  %v11382_v10 = vld [vmem:[#allocation65_spill] sm:$0xff] }
 0x1b7   : > { %6354 = vmatprep.subr.bf16.mxu0 %v3842_v46  ;;  %v7068_v5 = vpop.eup %7067  ;;  %v1020_v43 = vmul.f32 %v11382_v10, %v11381_v39  ;;  %6242 = vmatprep.subr.bf16.mxu1 %v3890_v28  ;;  %v9026_v20 = vpop.permute.xlu1 %4267 }
 0x1b8   : > { %v7070_v25 = vpop.eup %7069  ;;  %11394 = vst [vmem:[#allocation60_spill] sm:$0xff] %v9026_v20 }
 0x1b9   : > { %6355 = vmatpush3.bf16.msra.mxu0 %v11380_v29  ;;  %v959_v15 = vadd.f32 %v7070_v25, %v7068_v5 }
 0x1ba   : > { %6213 = vmatmul.mubr.msk.bf16.gmra.mrb[112].mxu0 %vm2384_vm1, %v11375_v22  ;;  %4934 = vperm.xlu0 %6941, %v1051_v63  }
 0x1bb   : > { %6165 = vmatmul.mubr.msk.bf16.gmra.mrb[112].mxu1 %vm2384_vm1, %v11375_v22  ;;  %6214 = vmatprep.mubr.msk.bf16.mxu0 %vm2384_vm1, %v11379_v52  ;;  %7071 = vrcp.f32 %v959_v15  ;;  %v9028_v50 = vpop.permute.xlu1 %4272 }
 0x1bc   : > { %6166 = vmatprep.mubr.msk.bf16.mxu1 %vm2384_vm1, %v11379_v52  ;;  %6243 = vmatpush3.bf16.msra.mxu1 %v8772_v62  ;;  %11395 = vst [vmem:[#allocation61_spill] sm:$0xff] %v9028_v50 }
 0x1be   : > { %4337 = vperm.xlu0 %6941, %v1020_v43  }
 0x1bf   : > { %v9054_v21 = vpop.permute.xlu1 %4869 }
 0x1c0   : > { %11396 = vst [vmem:[#allocation52_spill] sm:$0xff] %v9054_v21 }
 0x1c2   : > { %6215 = vmatmul.mubr.msk.bf16.gmra.mrb[116].mxu0 %vm2384_vm1, %v11379_v52  ;;  %4944 = vperm.xlu0 %6941, %v1053_v4  }
 0x1c3   : > { %6167 = vmatmul.mubr.msk.bf16.gmra.mrb[116].mxu1 %vm2384_vm1, %v11379_v52  ;;  %6216 = vmatprep.mubr.msk.bf16.mxu0 %vm2384_vm1, %v11385_v44  ;;  %v9080_v2 = vpop.permute.xlu1 %4874 }
 0x1c4   : > { %6168 = vmatprep.mubr.msk.bf16.mxu1 %vm2384_vm1, %v11385_v44  ;;  %11397 = vst [vmem:[#allocation54_spill] sm:$0xff] %v9080_v2 }
 0x1c5   : > { %v7072_v33 = vpop.eup %7071 }
 0x1c6   : > { %v1023_v62 = vmul.f32 %v7072_v33, %v7068_v5  ;;  %v1055_v45 = vmul.f32 %v7072_v33, %v7070_v25 }
 0x1c7   : > { %v9106_v63 = vpop.permute.xlu1 %4282 }
 0x1c8   : > { %4352 = vperm.xlu0 %6941, %v1023_v62   ;;  %11398 = vst [vmem:[#allocation5_spill] sm:$0xff] %v9106_v63 }
 0x1ca   : > { %6217 = vmatmul.mubr.msk.bf16.gmra.mrb[120].mxu0 %vm2384_vm1, %v11385_v44 }
 0x1cb   : > { %6169 = vmatmul.mubr.msk.bf16.gmra.mrb[120].mxu1 %vm2384_vm1, %v11385_v44  ;;  %6218 = vmatprep.mubr.msk.bf16.mxu0 %vm2384_vm1, %v11386_v8  ;;  %v9134_v62 = vpop.permute.xlu1 %4879 }
 0x1cc   : > { %6170 = vmatprep.mubr.msk.bf16.mxu1 %vm2384_vm1, %v11386_v8  ;;  %4954 = vperm.xlu0 %6941, %v1055_v45   ;;  %11408 = vst [vmem:[#allocation46_spill] sm:$0xff] %v9134_v62 }
 0x1d2   : > { %6219 = vmatmul.mubr.msk.bf16.gmra.mrb[124].mxu0 %vm2384_vm1, %v11386_v8 }
 0x1d3   : > { %6171 = vmatmul.mubr.msk.bf16.gmra.mrb[124].mxu1 %vm2384_vm1, %v11386_v8  ;;  %6220 = vmatprep.mubr.msk.bf16.mxu0 %vm2384_vm1, %v11387_v30 }
 0x1d4   : > { %6172 = vmatprep.mubr.msk.bf16.mxu1 %vm2384_vm1, %v11387_v30 }
 0x1da   : > { %6221 = vmatmul.mubr.msk.bf16.gmra.mrb[128].mxu0 %vm2384_vm1, %v11387_v30 }
 0x1db   : > { %6173 = vmatmul.mubr.msk.bf16.gmra.mrb[128].mxu1 %vm2384_vm1, %v11387_v30  ;;  %6222 = vmatprep.mubr.msk.bf16.mxu0 %vm2384_vm1, %v11388_v12 }
 0x1dc   : > { %6174 = vmatprep.mubr.msk.bf16.mxu1 %vm2384_vm1, %v11388_v12 }
 0x1dd   : > { %v9108_v5 = vpop.permute.xlu0 %4257 }
 0x1de   : > { %11399 = vst [vmem:[#allocation17_spill] sm:$0xff] %v9108_v5 }
 0x1e1   : > { %v9136_v8 = vpop.permute.xlu0 %4277 }
 0x1e2   : > { %6223 = vmatmul.mubr.msk.bf16.gmra.mrb[132].mxu0 %vm2384_vm1, %v11388_v12  ;;  %11409 = vst [vmem:[#allocation51_spill] sm:$0xff] %v9136_v8 }
 0x1e3   : > { %6175 = vmatmul.mubr.msk.bf16.gmra.mrb[132].mxu1 %vm2384_vm1, %v11388_v12  ;;  %6224 = vmatprep.mubr.msk.bf16.mxu0 %vm2384_vm1, %v11389_v58 }
 0x1e4   : > { %6176 = vmatprep.mubr.msk.bf16.mxu1 %vm2384_vm1, %v11389_v58 }
 0x1ea   : > { %6225 = vmatmul.mubr.msk.bf16.gmra.mrb[136].mxu0 %vm2384_vm1, %v11389_v58 }
 0x1eb   : > { %6177 = vmatmul.mubr.msk.bf16.gmra.mrb[136].mxu1 %vm2384_vm1, %v11389_v58  ;;  %6226 = vmatprep.mubr.msk.bf16.mxu0 %vm2384_vm1, %v11390_v49 }
 0x1ec   : > { %6178 = vmatprep.mubr.msk.bf16.mxu1 %vm2384_vm1, %v11390_v49 }
 0x1f2   : > { %6227 = vmatmul.mubr.msk.bf16.gmra.mrb[140].mxu0 %vm2384_vm1, %v11390_v49 }
 0x1f3   : > { %6179 = vmatmul.mubr.msk.bf16.gmra.mrb[140].mxu1 %vm2384_vm1, %v11390_v49 }
 0x24d   : > { %v9030_v53 = vpop.f32.mrb[80].mxu0 }
 0x24e   : > { %v9032_v11 = vpop.f32.mrb[80].mxu1  ;;  %v9034_v31 = vpop.f32.mrb[81].mxu0 }
 0x24f   : > { %v9036_v55 = vpop.f32.mrb[81].mxu1  ;;  %v9038_v24 = vpop.f32.mrb[82].mxu0  ;;  %v3027_v47 = vmax.f32 %v9030_v53, %v9034_v31 }
 0x250   : > { %v9042_v37 = vpop.f32.mrb[82].mxu1  ;;  %v9044_v9 = vpop.f32.mrb[83].mxu0  ;;  %v2931_v0 = vmax.f32 %v9032_v11, %v9036_v55 }
 0x251   : > { %v9048_v40 = vpop.f32.mrb[83].mxu1  ;;  %3028 = vmax.xlane.f32.xlu1 %v3027_v47  ;;  %v3030_v36 = vmax.f32 %v9038_v24, %v9044_v9 }
 0x252   : > { %2932 = vmax.xlane.f32.xlu0 %v2931_v0  ;;  %v2934_v13 = vmax.f32 %v9042_v37, %v9048_v40 }
 0x255   : > { %3031 = vmax.xlane.f32.xlu1 %v3030_v36  ;;  %v9056_v51 = vpop.f32.mrb[84].mxu0 }
 0x256   : > { %2935 = vmax.xlane.f32.xlu0 %v2934_v13  ;;  %v9058_v32 = vpop.f32.mrb[84].mxu1  ;;  %v9060_v54 = vpop.f32.mrb[85].mxu0 }
 0x257   : > { %v9062_v41 = vpop.f32.mrb[85].mxu1  ;;  %v9064_v42 = vpop.f32.mrb[86].mxu0  ;;  %v3033_v57 = vmax.f32 %v9056_v51, %v9060_v54 }
 0x258   : > { %v9068_v48 = vpop.f32.mrb[86].mxu1  ;;  %v9070_v16 = vpop.f32.mrb[87].mxu0  ;;  %v2937_v3 = vmax.f32 %v9058_v32, %v9062_v41 }
 0x259   : > { %v9074_v35 = vpop.f32.mrb[87].mxu1  ;;  %v3036_v23 = vmax.f32 %v9064_v42, %v9070_v16 }
 0x25a   : > { %2938 = vmax.xlane.f32.xlu0 %v2937_v3  ;;  %v2940_v14 = vmax.f32 %v9068_v48, %v9074_v35 }
 0x25c   : > { %2941 = vmax.xlane.f32.xlu1 %v2940_v14  ;;  %v9162_v14 = vpop.permute.xlu1 %4287 }
 0x25d   : > { %v9082_v59 = vpop.f32.mrb[88].mxu0  ;;  %11418 = vst [vmem:[#allocation22_spill] sm:$0xff] %v9162_v14 }
 0x25e   : > { %3034 = vmax.xlane.f32.xlu0 %v3033_v57  ;;  %v9084_v26 = vpop.f32.mrb[88].mxu1  ;;  %v9086_v46 = vpop.f32.mrb[89].mxu0 }
 0x25f   : > { %v9088_v38 = vpop.f32.mrb[89].mxu1  ;;  %v9090_v28 = vpop.f32.mrb[90].mxu0  ;;  %v3039_v22 = vmax.f32 %v9082_v59, %v9086_v46 }
 0x260   : > { %3037 = vmax.xlane.f32.xlu1 %v3036_v23  ;;  %v9094_v7 = vpop.f32.mrb[90].mxu1  ;;  %v9096_v17 = vpop.f32.mrb[91].mxu0  ;;  %v2943_v61 = vmax.f32 %v9084_v26, %v9088_v38 }
 0x261   : > { %v9100_v1 = vpop.f32.mrb[91].mxu1  ;;  %v3042_v60 = vmax.f32 %v9090_v28, %v9096_v17  ;;  %v9190_v63 = vpop.permute.xlu1 %4889 }
 0x262   : > { %2944 = vmax.xlane.f32.xlu0 %v2943_v61  ;;  %v2946_v19 = vmax.f32 %v9094_v7, %v9100_v1  ;;  %11428 = vst [vmem:[#allocation71_spill] sm:$0xff] %v9190_v63 }
 0x264   : > { %2947 = vmax.xlane.f32.xlu1 %v2946_v19 }
 0x265   : > { %v9110_v52 = vpop.f32.mrb[92].mxu0  ;;  %v9218_v27 = vpop.permute.xlu1 %4302 }
 0x266   : > { %11400 = vst [vmem:[#allocation2_spill] sm:$0xff] %v9110_v52  ;;  %3040 = vmax.xlane.f32.xlu0 %v3039_v22  ;;  %v9112_v25 = vpop.f32.mrb[92].mxu1  ;;  %v9114_v29 = vpop.f32.mrb[93].mxu0  ;;  %11438 = vst [vmem:[#allocation81_spill] sm:$0xff] %v9218_v27 }
 0x267   : > { %11401 = vst [vmem:[#allocation57_spill] sm:$0xff] %v9112_v25  ;;  %11402 = vst [vmem:[#allocation21_spill] sm:$0xff] %v9114_v29  ;;  %v9116_v39 = vpop.f32.mrb[93].mxu1  ;;  %v9118_v10 = vpop.f32.mrb[94].mxu0  ;;  %v3045_v43 = vmax.f32 %v9110_v52, %v9114_v29 }
 0x268   : > { %11403 = vst [vmem:[#allocation44_spill] sm:$0xff] %v9116_v39  ;;  %11404 = vst [vmem:[#allocation42_spill] sm:$0xff] %v9118_v10  ;;  %3043 = vmax.xlane.f32.xlu1 %v3042_v60  ;;  %v9122_v15 = vpop.f32.mrb[94].mxu1  ;;  %v9124_v56 = vpop.f32.mrb[95].mxu0  ;;  %v2949_v6 = vmax.f32 %v9112_v25, %v9116_v39 }
 0x269   : > { %11405 = vst [vmem:[#allocation49_spill] sm:$0xff] %v9122_v15  ;;  %11406 = vst [vmem:[#allocation47_spill] sm:$0xff] %v9124_v56  ;;  %v9128_v4 = vpop.f32.mrb[95].mxu1  ;;  %v3048_v44 = vmax.f32 %v9118_v10, %v9124_v56  ;;  %v9164_v22 = vpop.permute.xlu0 %4884 }
 0x26a   : > { %11407 = vst [vmem:[#allocation7_spill] sm:$0xff] %v9128_v4  ;;  %2950 = vmax.xlane.f32.xlu0 %v2949_v6  ;;  %v2952_v33 = vmax.f32 %v9122_v15, %v9128_v4  ;;  %11419 = vst [vmem:[#allocation45_spill] sm:$0xff] %v9164_v22 }
 0x26c   : > { %2953 = vmax.xlane.f32.xlu1 %v2952_v33 }
 0x26d   : > { %v9138_v45 = vpop.f32.mrb[96].mxu0 }
 0x26e   : > { %11410 = vst [vmem:[#allocation55_spill] sm:$0xff] %v9138_v45  ;;  %3046 = vmax.xlane.f32.xlu0 %v3045_v43  ;;  %v9140_v30 = vpop.f32.mrb[96].mxu1  ;;  %v9142_v12 = vpop.f32.mrb[97].mxu0 }
 0x26f   : > { %11411 = vst [vmem:[#allocation18_spill] sm:$0xff] %v9140_v30  ;;  %11412 = vst [vmem:[#allocation58_spill] sm:$0xff] %v9142_v12  ;;  %v9144_v58 = vpop.f32.mrb[97].mxu1  ;;  %v9146_v49 = vpop.f32.mrb[98].mxu0  ;;  %v3051_v47 = vmax.f32 %v9138_v45, %v9142_v12 }
 0x270   : > { %11413 = vst [vmem:[#allocation63_spill] sm:$0xff] %v9144_v58  ;;  %11414 = vst [vmem:[#allocation65_spill] sm:$0xff] %v9146_v49  ;;  %3049 = vmax.xlane.f32.xlu1 %v3048_v44  ;;  %v9150_v0 = vpop.f32.mrb[98].mxu1  ;;  %v9152_v36 = vpop.f32.mrb[99].mxu0  ;;  %v2955_v13 = vmax.f32 %v9140_v30, %v9144_v58 }
 0x271   : > { %11415 = vst [vmem:[#allocation62_spill] sm:$0xff] %v9150_v0  ;;  %11416 = vst [vmem:[#allocation64_spill] sm:$0xff] %v9152_v36  ;;  %v9156_v57 = vpop.f32.mrb[99].mxu1  ;;  %v3054_v3 = vmax.f32 %v9146_v49, %v9152_v36  ;;  %v9433_v36 = vld [vmem:[%s8106_s18 + $0xe8] sm:$0xff] }
 0x272   : > { %11417 = vst [vmem:[#allocation3_spill] sm:$0xff] %v9156_v57  ;;  %2956 = vmax.xlane.f32.xlu0 %v2955_v13  ;;  %v2958_v23 = vmax.f32 %v9150_v0, %v9156_v57 }
 0x274   : > { %2959 = vmax.xlane.f32.xlu1 %v2958_v23 }
 0x275   : > { %v9166_v61 = vpop.f32.mrb[100].mxu0 }
 0x276   : > { %11420 = vst [vmem:[#allocation43_spill] sm:$0xff] %v9166_v61  ;;  %3052 = vmax.xlane.f32.xlu0 %v3051_v47  ;;  %v9168_v60 = vpop.f32.mrb[100].mxu1  ;;  %v9170_v19 = vpop.f32.mrb[101].mxu0 }
 0x277   : > { %11421 = vst [vmem:[#allocation50_spill] sm:$0xff] %v9168_v60  ;;  %11422 = vst [vmem:[#allocation48_spill] sm:$0xff] %v9170_v19  ;;  %v9172_v43 = vpop.f32.mrb[101].mxu1  ;;  %v9174_v6 = vpop.f32.mrb[102].mxu0  ;;  %v3057_v44 = vmax.f32 %v9166_v61, %v9170_v19 }
 0x278   : > { %11423 = vst [vmem:[#allocation66_spill] sm:$0xff] %v9172_v43  ;;  %11424 = vst [vmem:[#allocation67_spill] sm:$0xff] %v9174_v6  ;;  %3055 = vmax.xlane.f32.xlu1 %v3054_v3  ;;  %v9178_v33 = vpop.f32.mrb[102].mxu1  ;;  %v9180_v13 = vpop.f32.mrb[103].mxu0  ;;  %v2961_v23 = vmax.f32 %v9168_v60, %v9172_v43  ;;  %v681_v60 = vld [vmem:[%s8099_s15 + $0xe8] sm:$0xff] }
 0x279   : > { %11425 = vst [vmem:[#allocation68_spill] sm:$0xff] %v9178_v33  ;;  %11426 = vst [vmem:[#allocation69_spill] sm:$0xff] %v9180_v13  ;;  %v9184_v47 = vpop.f32.mrb[103].mxu1  ;;  %v3060_v14 = vmax.f32 %v9174_v6, %v9180_v13  ;;  %v9192_v3 = vpop.permute.xlu0 %4292  ;;  %v672_v13 = vld [vmem:[%s8099_s15 + $0xa0] sm:$0xff]  ;;  %v745_v57 = vmax.f32 %v681_v60, %v9433_v36 }
 0x27a   : > { %11427 = vst [vmem:[#allocation70_spill] sm:$0xff] %v9184_v47  ;;  %2962 = vmax.xlane.f32.xlu0 %v2961_v23  ;;  %v2964_v22 = vmax.f32 %v9178_v33, %v9184_v47  ;;  %11429 = vst [vmem:[#allocation72_spill] sm:$0xff] %v9192_v3 }
 0x27b   : > { %v777_v4 = vsub.f32 %v681_v60, %v745_v57 }
 0x27c   : > { %2965 = vmax.xlane.f32.xlu1 %v2964_v22 }
 0x27d   : > { %v9194_v62 = vpop.f32.mrb[104].mxu0 }
 0x27e   : > { %11430 = vst [vmem:[#allocation73_spill] sm:$0xff] %v9194_v62  ;;  %3058 = vmax.xlane.f32.xlu0 %v3057_v44  ;;  %v9196_v8 = vpop.f32.mrb[104].mxu1  ;;  %v9198_v2 = vpop.f32.mrb[105].mxu0 }
 0x27f   : > { %11431 = vst [vmem:[#allocation74_spill] sm:$0xff] %v9196_v8  ;;  %11432 = vst [vmem:[#allocation75_spill] sm:$0xff] %v9198_v2  ;;  %v9200_v50 = vpop.f32.mrb[105].mxu1  ;;  %v9202_v21 = vpop.f32.mrb[106].mxu0  ;;  %v3063_v23 = vmax.f32 %v9194_v62, %v9198_v2 }
 0x280   : > { %11433 = vst [vmem:[#allocation76_spill] sm:$0xff] %v9200_v50  ;;  %11434 = vst [vmem:[#allocation77_spill] sm:$0xff] %v9202_v21  ;;  %3061 = vmax.xlane.f32.xlu1 %v3060_v14  ;;  %v9206_v20 = vpop.f32.mrb[106].mxu1  ;;  %v9208_v22 = vpop.f32.mrb[107].mxu0  ;;  %v2967_v3 = vmax.f32 %v9196_v8, %v9200_v50 }
 0x281   : > { %11435 = vst [vmem:[#allocation78_spill] sm:$0xff] %v9206_v20  ;;  %11436 = vst [vmem:[#allocation79_spill] sm:$0xff] %v9208_v22  ;;  %v9212_v44 = vpop.f32.mrb[107].mxu1  ;;  %v3066_v63 = vmax.f32 %v9202_v21, %v9208_v22  ;;  %v9220_v14 = vpop.permute.xlu0 %4894 }
 0x282   : > { %11437 = vst [vmem:[#allocation80_spill] sm:$0xff] %v9212_v44  ;;  %2968 = vmax.xlane.f32.xlu0 %v2967_v3  ;;  %v2970_v18 = vmax.f32 %v9206_v20, %v9212_v44  ;;  %11439 = vst [vmem:[#allocation82_spill] sm:$0xff] %v9220_v14  ;;  %v9246_v44 = vpop.permute.xlu1 %4899 }
 0x283   : > { %11448 = vst [vmem:[#allocation91_spill] sm:$0xff] %v9246_v44 }
 0x284   : > { %2971 = vmax.xlane.f32.xlu1 %v2970_v18 }
 0x285   : > { %v9222_v34 = vpop.f32.mrb[108].mxu0 }
 0x286   : > { %11440 = vst [vmem:[#allocation83_spill] sm:$0xff] %v9222_v34  ;;  %3064 = vmax.xlane.f32.xlu0 %v3063_v23  ;;  %v9224_v5 = vpop.f32.mrb[108].mxu1  ;;  %v9226_v2 = vpop.f32.mrb[109].mxu0 }
 0x287   : > { %11441 = vst [vmem:[#allocation84_spill] sm:$0xff] %v9224_v5  ;;  %11442 = vst [vmem:[#allocation85_spill] sm:$0xff] %v9226_v2  ;;  %v9228_v62 = vpop.f32.mrb[109].mxu1  ;;  %v9230_v50 = vpop.f32.mrb[110].mxu0  ;;  %v3069_v3 = vmax.f32 %v9222_v34, %v9226_v2 }
 0x288   : > { %11443 = vst [vmem:[#allocation86_spill] sm:$0xff] %v9228_v62  ;;  %11444 = vst [vmem:[#allocation87_spill] sm:$0xff] %v9230_v50  ;;  %3067 = vmax.xlane.f32.xlu1 %v3066_v63  ;;  %v9234_v22 = vpop.f32.mrb[110].mxu1  ;;  %v9236_v18 = vpop.f32.mrb[111].mxu0  ;;  %v2973_v27 = vmax.f32 %v9224_v5, %v9228_v62 }
 0x289   : > { %11445 = vst [vmem:[#allocation88_spill] sm:$0xff] %v9234_v22  ;;  %11446 = vst [vmem:[#allocation89_spill] sm:$0xff] %v9236_v18  ;;  %v9240_v23 = vpop.f32.mrb[111].mxu1  ;;  %v3072_v14 = vmax.f32 %v9230_v50, %v9236_v18  ;;  %v9248_v63 = vpop.permute.xlu0 %4297 }
 0x28a   : > { %11447 = vst [vmem:[#allocation90_spill] sm:$0xff] %v9240_v23  ;;  %2974 = vmax.xlane.f32.xlu0 %v2973_v27  ;;  %v2976_v21 = vmax.f32 %v9234_v22, %v9240_v23  ;;  %11449 = vst [vmem:[#allocation92_spill] sm:$0xff] %v9248_v63  ;;  %v9274_v23 = vpop.permute.xlu1 %4307 }
 0x28b   : > { %11458 = vst [vmem:[#allocation101_spill] sm:$0xff] %v9274_v23 }
 0x28c   : > { %2977 = vmax.xlane.f32.xlu1 %v2976_v21 }
 0x28d   : > { %v9250_v2 = vpop.f32.mrb[112].mxu0 }
 0x28e   : > { %11450 = vst [vmem:[#allocation93_spill] sm:$0xff] %v9250_v2  ;;  %3070 = vmax.xlane.f32.xlu0 %v3069_v3  ;;  %v9252_v34 = vpop.f32.mrb[112].mxu1  ;;  %v9254_v62 = vpop.f32.mrb[113].mxu0 }
 0x28f   : > { %11451 = vst [vmem:[#allocation94_spill] sm:$0xff] %v9252_v34  ;;  %11452 = vst [vmem:[#allocation95_spill] sm:$0xff] %v9254_v62  ;;  %v9256_v5 = vpop.f32.mrb[113].mxu1  ;;  %v9258_v20 = vpop.f32.mrb[114].mxu0  ;;  %v3075_v27 = vmax.f32 %v9250_v2, %v9254_v62 }
 0x290   : > { %11453 = vst [vmem:[#allocation96_spill] sm:$0xff] %v9256_v5  ;;  %11454 = vst [vmem:[#allocation97_spill] sm:$0xff] %v9258_v20  ;;  %3073 = vmax.xlane.f32.xlu1 %v3072_v14  ;;  %v9262_v18 = vpop.f32.mrb[114].mxu1  ;;  %v9264_v21 = vpop.f32.mrb[115].mxu0  ;;  %v2979_v44 = vmax.f32 %v9252_v34, %v9256_v5 }
 0x291   : > { %11455 = vst [vmem:[#allocation98_spill] sm:$0xff] %v9262_v18  ;;  %11456 = vst [vmem:[#allocation99_spill] sm:$0xff] %v9264_v21  ;;  %v9268_v3 = vpop.f32.mrb[115].mxu1  ;;  %v3078_v63 = vmax.f32 %v9258_v20, %v9264_v21  ;;  %v9276_v14 = vpop.permute.xlu0 %4904 }
 0x292   : > { %11457 = vst [vmem:[#allocation100_spill] sm:$0xff] %v9268_v3  ;;  %2980 = vmax.xlane.f32.xlu0 %v2979_v44  ;;  %v2982_v50 = vmax.f32 %v9262_v18, %v9268_v3  ;;  %11459 = vst [vmem:[#allocation102_spill] sm:$0xff] %v9276_v14 }
 0x294   : > { %2983 = vmax.xlane.f32.xlu1 %v2982_v50 }
 0x295   : > { %v9278_v62 = vpop.f32.mrb[116].mxu0 }
 0x296   : > { %11460 = vst [vmem:[#allocation103_spill] sm:$0xff] %v9278_v62  ;;  %3076 = vmax.xlane.f32.xlu0 %v3075_v27  ;;  %v9280_v2 = vpop.f32.mrb[116].mxu1  ;;  %v9282_v5 = vpop.f32.mrb[117].mxu0 }
 0x297   : > { %11461 = vst [vmem:[#allocation104_spill] sm:$0xff] %v9280_v2  ;;  %11462 = vst [vmem:[#allocation105_spill] sm:$0xff] %v9282_v5  ;;  %v9284_v34 = vpop.f32.mrb[117].mxu1  ;;  %v9286_v22 = vpop.f32.mrb[118].mxu0  ;;  %v3081_v44 = vmax.f32 %v9278_v62, %v9282_v5 }
 0x298   : > { %11463 = vst [vmem:[#allocation106_spill] sm:$0xff] %v9284_v34  ;;  %11464 = vst [vmem:[#allocation107_spill] sm:$0xff] %v9286_v22  ;;  %3079 = vmax.xlane.f32.xlu1 %v3078_v63  ;;  %v9290_v50 = vpop.f32.mrb[118].mxu1  ;;  %v9292_v23 = vpop.f32.mrb[119].mxu0  ;;  %v2985_v27 = vmax.f32 %v9280_v2, %v9284_v34  ;;  %v673_v2 = vld [vmem:[%s8099_s15 + $0xa8] sm:$0xff] }
 0x299   : > { %11465 = vst [vmem:[#allocation108_spill] sm:$0xff] %v9290_v50  ;;  %11466 = vst [vmem:[#allocation109_spill] sm:$0xff] %v9292_v23  ;;  %v9296_v14 = vpop.f32.mrb[119].mxu1  ;;  %v3084_v21 = vmax.f32 %v9286_v22, %v9292_v23  ;;  %v9302_v5 = vpop.permute.xlu1 %4909  ;;  %v705_v23 = vld [vmem:[%s8106_s18 + $0xa8] sm:$0xff] }
 0x29a   : > { %11467 = vst [vmem:[#allocation110_spill] sm:$0xff] %v9296_v14  ;;  %2986 = vmax.xlane.f32.xlu0 %v2985_v27  ;;  %v2988_v20 = vmax.f32 %v9290_v50, %v9296_v14  ;;  %11468 = vst [vmem:[#allocation111_spill] sm:$0xff] %v9302_v5  ;;  %v9304_v63 = vpop.permute.xlu0 %4312  ;;  %v737_v18 = vmax.f32 %v673_v2, %v705_v23 }
 0x29b   : > { %11469 = vst [vmem:[#allocation112_spill] sm:$0xff] %v9304_v63 }
 0x29c   : > { %2989 = vmax.xlane.f32.xlu1 %v2988_v20 }
 0x29d   : > { %v9306_v62 = vpop.f32.mrb[120].mxu0 }
 0x29e   : > { %11470 = vst [vmem:[#allocation113_spill] sm:$0xff] %v9306_v62  ;;  %3082 = vmax.xlane.f32.xlu0 %v3081_v44  ;;  %v9308_v3 = vpop.f32.mrb[120].mxu1  ;;  %v9310_v34 = vpop.f32.mrb[121].mxu0 }
 0x29f   : > { %11471 = vst [vmem:[#allocation114_spill] sm:$0xff] %v9308_v3  ;;  %11472 = vst [vmem:[#allocation115_spill] sm:$0xff] %v9310_v34  ;;  %v9314_v27 = vpop.f32.mrb[121].mxu1  ;;  %v9316_v22 = vpop.f32.mrb[122].mxu0  ;;  %v3087_v20 = vmax.f32 %v9306_v62, %v9310_v34  ;;  %v704_v34 = vld [vmem:[%s8106_s18 + $0xa0] sm:$0xff] }
 0x2a0   : > { %11473 = vst [vmem:[#allocation116_spill] sm:$0xff] %v9314_v27  ;;  %11474 = vst [vmem:[#allocation117_spill] sm:$0xff] %v9316_v22  ;;  %3085 = vmax.xlane.f32.xlu1 %v3084_v21  ;;  %v9320_v63 = vpop.f32.mrb[122].mxu1  ;;  %v9322_v5 = vpop.f32.mrb[123].mxu0  ;;  %v2991_v44 = vmax.f32 %v9308_v3, %v9314_v27  ;;  %v769_v27 = vsub.f32 %v673_v2, %v737_v18  ;;  %v736_v3 = vmax.f32 %v672_v13, %v704_v34 }
 0x2a1   : > { %11475 = vst [vmem:[#allocation118_spill] sm:$0xff] %v9320_v63  ;;  %11476 = vst [vmem:[#allocation119_spill] sm:$0xff] %v9322_v5  ;;  %v9326_v14 = vpop.f32.mrb[123].mxu1  ;;  %v3090_v50 = vmax.f32 %v9316_v22, %v9322_v5  ;;  %v9334_v21 = vpop.permute.xlu1 %4322 }
 0x2a2   : > { %11477 = vst [vmem:[#allocation120_spill] sm:$0xff] %v9326_v14  ;;  %2992 = vmax.xlane.f32.xlu0 %v2991_v44  ;;  %v2994_v8 = vmax.f32 %v9320_v63, %v9326_v14  ;;  %11478 = vst [vmem:[#allocation121_spill] sm:$0xff] %v9334_v21  ;;  %v9336_v62 = vpop.permute.xlu0 %4914  ;;  %v865_v44 = vsub.f32 %v705_v23, %v737_v18  ;;  %v822_v23 = vmul.f32 1.442695, %v769_v27 }
 0x2a3   : > { %11479 = vst [vmem:[#allocation122_spill] sm:$0xff] %v9336_v62  ;;  %v768_v63 = vsub.f32 %v672_v13, %v736_v3 }
 0x2a4   : > { %2995 = vmax.xlane.f32.xlu1 %v2994_v8  ;;  %7073 = vpow2.f32 %v822_v23 }
 0x2a5   : > { %v9338_v6 = vpop.f32.mrb[124].mxu0 }
 0x2a6   : > { %11480 = vst [vmem:[#allocation123_spill] sm:$0xff] %v9338_v6  ;;  %3088 = vmax.xlane.f32.xlu0 %v3087_v20  ;;  %v9340_v47 = vpop.f32.mrb[124].mxu1  ;;  %v9342_v5 = vpop.f32.mrb[125].mxu0 }
 0x2a7   : > { %11481 = vst [vmem:[#allocation124_spill] sm:$0xff] %v9340_v47  ;;  %11482 = vst [vmem:[#allocation125_spill] sm:$0xff] %v9342_v5  ;;  %v9344_v22 = vpop.f32.mrb[125].mxu1  ;;  %v9346_v14 = vpop.f32.mrb[126].mxu0  ;;  %v3093_v21 = vmax.f32 %v9338_v6, %v9342_v5  ;;  %v918_v5 = vmul.f32 1.442695, %v865_v44 }
 0x2a8   : > { %11483 = vst [vmem:[#allocation126_spill] sm:$0xff] %v9344_v22  ;;  %11484 = vst [vmem:[#allocation127_spill] sm:$0xff] %v9346_v14  ;;  %3091 = vmax.xlane.f32.xlu1 %v3090_v50  ;;  %v9350_v8 = vpop.f32.mrb[126].mxu1  ;;  %v9352_v62 = vpop.f32.mrb[127].mxu0  ;;  %v2997_v2 = vmax.f32 %v9340_v47, %v9344_v22  ;;  %v864_v50 = vsub.f32 %v704_v34, %v736_v3  ;;  %v820_v22 = vmul.f32 1.442695, %v768_v63 }
 0x2a9   : > { %11485 = vst [vmem:[#allocation128_spill] sm:$0xff] %v9350_v8  ;;  %11486 = vst [vmem:[#allocation129_spill] sm:$0xff] %v9352_v62  ;;  %v9356_v20 = vpop.f32.mrb[127].mxu1  ;;  %v3096_v18 = vmax.f32 %v9346_v14, %v9352_v62  ;;  %v9362_v6 = vpop.permute.xlu1 %4919  ;;  %7075 = vpow2.f32 %v918_v5 }
 0x2aa   : > { %11487 = vst [vmem:[#allocation130_spill] sm:$0xff] %v9356_v20  ;;  %2998 = vmax.xlane.f32.xlu0 %v2997_v2  ;;  %v3000_v33 = vmax.f32 %v9350_v8, %v9356_v20  ;;  %11488 = vst [vmem:[#allocation131_spill] sm:$0xff] %v9362_v6  ;;  %v9364_v19 = vpop.permute.xlu0 %4317  ;;  %v916_v2 = vmul.f32 1.442695, %v864_v50  ;;  %7077 = vpow2.f32 %v820_v22  ;;  %v675_v50 = vld [vmem:[%s8099_s15 + $0xb8] sm:$0xff] }
 0x2ab   : > { %11489 = vst [vmem:[#allocation132_spill] sm:$0xff] %v9364_v19  ;;  %v707_v6 = vld [vmem:[%s8106_s18 + $0xb8] sm:$0xff] }
 0x2ac   : > { %3001 = vmax.xlane.f32.xlu1 %v3000_v33  ;;  %7079 = vpow2.f32 %v916_v2 }
 0x2ad   : > { %v9366_v61 = vpop.f32.mrb[128].mxu0  ;;  %v9392_v19 = vpop.permute.xlu1 %4327 }
 0x2ae   : > { %11490 = vst [vmem:[#allocation133_spill] sm:$0xff] %v9366_v61  ;;  %3094 = vmax.xlane.f32.xlu0 %v3093_v21  ;;  %v9368_v27 = vpop.f32.mrb[128].mxu1  ;;  %v9370_v13 = vpop.f32.mrb[129].mxu0  ;;  %11498 = vst [vmem:[#allocation141_spill] sm:$0xff] %v9392_v19  ;;  %v679_v19 = vld [vmem:[%s8099_s15 + $0xd8] sm:$0xff] }
 0x2af   : > { %11491 = vst [vmem:[#allocation134_spill] sm:$0xff] %v9368_v27  ;;  %11492 = vst [vmem:[#allocation135_spill] sm:$0xff] %v9370_v13  ;;  %v9372_v44 = vpop.f32.mrb[129].mxu1  ;;  %v9374_v34 = vpop.f32.mrb[130].mxu0  ;;  %v3099_v33 = vmax.f32 %v9366_v61, %v9370_v13  ;;  %v739_v13 = vmax.f32 %v675_v50, %v707_v6 }
 0x2b0   : > { %11493 = vst [vmem:[#allocation136_spill] sm:$0xff] %v9372_v44  ;;  %11494 = vst [vmem:[#allocation137_spill] sm:$0xff] %v9374_v34  ;;  %3097 = vmax.xlane.f32.xlu1 %v3096_v18  ;;  %v9378_v3 = vpop.f32.mrb[130].mxu1  ;;  %v9380_v63 = vpop.f32.mrb[131].mxu0  ;;  %v3003_v21 = vmax.f32 %v9368_v27, %v9372_v44  ;;  %v677_v27 = vld [vmem:[%s8099_s15 + $0xc8] sm:$0xff] }
 0x2b1   : > { %11495 = vst [vmem:[#allocation138_spill] sm:$0xff] %v9378_v3  ;;  %11496 = vst [vmem:[#allocation139_spill] sm:$0xff] %v9380_v63  ;;  %v9384_v23 = vpop.f32.mrb[131].mxu1  ;;  %v3102_v5 = vmax.f32 %v9374_v34, %v9380_v63  ;;  %v9394_v61 = vpop.permute.xlu0 %4924  ;;  %v709_v63 = vld [vmem:[%s8106_s18 + $0xc8] sm:$0xff]  ;;  %v771_v20 = vsub.f32 %v675_v50, %v739_v13 }
 0x2b2   : > { %11497 = vst [vmem:[#allocation140_spill] sm:$0xff] %v9384_v23  ;;  %3004 = vmax.xlane.f32.xlu0 %v3003_v21  ;;  %v3006_v18 = vmax.f32 %v9378_v3, %v9384_v23  ;;  %11499 = vst [vmem:[#allocation142_spill] sm:$0xff] %v9394_v61  ;;  %v9404_v34 = vpop.eup %7073  ;;  %v9414_v61 = vld [vmem:[%s8106_s18 + $0xd8] sm:$0xff]  ;;  %v741_v8 = vmax.f32 %v677_v27, %v709_v63  ;;  %v9441_v49 = vpop.permute.xlu1 %4929 }
 0x2b3   : > { %v9416_v3 = vpop.eup %7075  ;;  %v743_v43 = vmax.f32 %v679_v19, %v9414_v61  ;;  %11508 = vst [vmem:[#allocation151_spill] sm:$0xff] %v9441_v49 }
 0x2b4   : > { %3007 = vmax.xlane.f32.xlu1 %v3006_v18  ;;  %v961_v50 = vadd.f32 %v9416_v3, %v9404_v34 }
 0x2b5   : > { %v9396_v44 = vpop.f32.mrb[132].mxu0 }
 0x2b6   : > { %11500 = vst [vmem:[#allocation143_spill] sm:$0xff] %v9396_v44  ;;  %3100 = vmax.xlane.f32.xlu0 %v3099_v33  ;;  %v9400_v22 = vpop.f32.mrb[132].mxu1  ;;  %v9402_v21 = vpop.f32.mrb[133].mxu0  ;;  %7081 = vrcp.f32 %v961_v50  ;;  %v871_v50 = vsub.f32 %v9414_v61, %v743_v43 }
 0x2b7   : > { %11501 = vst [vmem:[#allocation144_spill] sm:$0xff] %v9400_v22  ;;  %11502 = vst [vmem:[#allocation145_spill] sm:$0xff] %v9402_v21  ;;  %v9406_v23 = vpop.f32.mrb[133].mxu1  ;;  %v9408_v2 = vpop.f32.mrb[134].mxu0  ;;  %v3105_v18 = vmax.f32 %v9396_v44, %v9402_v21 }
 0x2b8   : > { %11503 = vst [vmem:[#allocation146_spill] sm:$0xff] %v9406_v23  ;;  %11504 = vst [vmem:[#allocation147_spill] sm:$0xff] %v9408_v2  ;;  %3103 = vmax.xlane.f32.xlu1 %v3102_v5  ;;  %v9418_v33 = vpop.f32.mrb[134].mxu1  ;;  %v9420_v62 = vpop.f32.mrb[135].mxu0  ;;  %v3009_v14 = vmax.f32 %v9400_v22, %v9406_v23  ;;  %v867_v5 = vsub.f32 %v707_v6, %v739_v13  ;;  %v9444_v6 = vld [vmem:[%s8099_s15 + $0xf8] sm:$0xff] }
 0x2b9   : > { %11505 = vst [vmem:[#allocation148_spill] sm:$0xff] %v9418_v33  ;;  %11506 = vst [vmem:[#allocation149_spill] sm:$0xff] %v9420_v62  ;;  %v9424_v47 = vpop.f32.mrb[135].mxu1  ;;  %v3108_v21 = vmax.f32 %v9408_v2, %v9420_v62  ;;  %v9435_v23 = vpop.eup %7077  ;;  %v826_v62 = vmul.f32 1.442695, %v771_v20  ;;  %v9447_v13 = vld [vmem:[%s8106_s18 + $0xf8] sm:$0xff] }
 0x2ba   : > { %11507 = vst [vmem:[#allocation150_spill] sm:$0xff] %v9424_v47  ;;  %v3012_v44 = vmax.f32 %v9418_v33, %v9424_v47  ;;  %3010 = vmax.xlane.f32.xlu0 %v3009_v14  ;;  %v9439_v22 = vpop.eup %7079  ;;  %v773_v14 = vsub.f32 %v677_v27, %v741_v8  ;;  %v9449_v2 = vpop.permute.xlu0 %4332  ;;  %v869_v33 = vsub.f32 %v709_v63, %v741_v8  ;;  %v922_v49 = vmul.f32 1.442695, %v867_v5  ;;  %v9459_v20 = vld [vmem:[%s8099_s15 + $0xb0] sm:$0xff] }
 0x2bb   : > { %11509 = vst [vmem:[#allocation152_spill] sm:$0xff] %v9449_v2  ;;  %v9462_v27 = vld [vmem:[%s8106_s18 + $0xb0] sm:$0xff]  ;;  %v960_v63 = vadd.f32 %v9439_v22, %v9435_v23  ;;  %7083 = vpow2.f32 %v826_v62 }
 0x2bc   : > { %3013 = vmax.xlane.f32.xlu1 %v3012_v44  ;;  %v775_v44 = vsub.f32 %v679_v19, %v743_v43  ;;  %v747_v19 = vmax.f32 %v9444_v6, %v9447_v13  ;;  %v830_v30 = vmul.f32 1.442695, %v773_v14  ;;  %v926_v10 = vmul.f32 1.442695, %v869_v33  ;;  %v678_v14 = vld [vmem:[%s8099_s15 + $0xd0] sm:$0xff] }
 0x2bd   : > { %v9451_v47 = vpop.f32.mrb[136].mxu0  ;;  %7085 = vpow2.f32 %v922_v49  ;;  %v873_v43 = vsub.f32 %v9433_v36, %v745_v57  ;;  %v680_v49 = vld [vmem:[%s8099_s15 + $0xe0] sm:$0xff]  ;;  %v838_v57 = vmul.f32 1.442695, %v777_v4 }
 0x2be   : > { %11510 = vst [vmem:[#allocation153_spill] sm:$0xff] %v9451_v47  ;;  %3106 = vmax.xlane.f32.xlu0 %v3105_v18  ;;  %v9454_v0 = vpop.f32.mrb[136].mxu1  ;;  %v9456_v12 = vpop.f32.mrb[137].mxu0  ;;  %v834_v61 = vmul.f32 1.442695, %v775_v44  ;;  %7087 = vrcp.f32 %v960_v63  ;;  %v779_v60 = vsub.f32 %v9444_v6, %v747_v19  ;;  %v712_v44 = vld [vmem:[%s8106_s18 + $0xe0] sm:$0xff] }
 0x2bf   : > { %11511 = vst [vmem:[#allocation154_spill] sm:$0xff] %v9454_v0  ;;  %11512 = vst [vmem:[#allocation155_spill] sm:$0xff] %v9456_v12  ;;  %v9464_v45 = vpop.f32.mrb[137].mxu1  ;;  %v9466_v2 = vpop.f32.mrb[138].mxu0  ;;  %v3111_v8 = vmax.f32 %v9451_v47, %v9456_v12  ;;  %v9482_v12 = vld [vmem:[%s8099_s15 + $0xc0] sm:$0xff]  ;;  %7089 = vpow2.f32 %v830_v30 }
 0x2c0   : > { %11513 = vst [vmem:[#allocation156_spill] sm:$0xff] %v9464_v45  ;;  %11514 = vst [vmem:[#allocation157_spill] sm:$0xff] %v9466_v2  ;;  %3109 = vmax.xlane.f32.xlu1 %v3108_v21  ;;  %v9474_v18 = vpop.f32.mrb[138].mxu1  ;;  %v9476_v5 = vpop.f32.mrb[139].mxu0  ;;  %v3015_v58 = vmax.f32 %v9454_v0, %v9464_v45  ;;  %v9485_v47 = vld [vmem:[%s8106_s18 + $0xc0] sm:$0xff]  ;;  %v738_v45 = vmax.f32 %v9459_v20, %v9462_v27  ;;  %v9498_v0 = vld [vmem:[%s8106_s18 + $0xd0] sm:$0xff]  ;;  %7091 = vpow2.f32 %v926_v10 }
 0x2c1   : > { %11515 = vst [vmem:[#allocation158_spill] sm:$0xff] %v9474_v18  ;;  %11516 = vst [vmem:[#allocation159_spill] sm:$0xff] %v9476_v5  ;;  %v9487_v56 = vpop.f32.mrb[139].mxu1  ;;  %v3114_v21 = vmax.f32 %v9466_v2, %v9476_v5  ;;  %v9500_v15 = vpop.permute.xlu0 %4934  ;;  %v740_v33 = vmax.f32 %v9482_v12, %v9485_v47  ;;  %v930_v5 = vmul.f32 1.442695, %v871_v50  ;;  %v742_v6 = vmax.f32 %v678_v14, %v9498_v0 }
 0x2c2   : > { %11517 = vst [vmem:[#allocation160_spill] sm:$0xff] %v9487_v56  ;;  %v3018_v62 = vmax.f32 %v9474_v18, %v9487_v56  ;;  %3016 = vmax.xlane.f32.xlu0 %v3015_v58  ;;  %11518 = vst [vmem:[#allocation161_spill] sm:$0xff] %v9500_v15  ;;  %v875_v58 = vsub.f32 %v9447_v13, %v747_v19  ;;  %v9508_v2 = vpop.permute.xlu1 %4342  ;;  %v770_v63 = vsub.f32 %v9459_v20, %v738_v45 }
 0x2c3   : > { %11519 = vst [vmem:[#allocation162_spill] sm:$0xff] %v9508_v2  ;;  %7093 = vpow2.f32 %v834_v61  ;;  %v934_v30 = vmul.f32 1.442695, %v873_v43  ;;  %v866_v13 = vsub.f32 %v9462_v27, %v738_v45  ;;  %v842_v4 = vmul.f32 1.442695, %v779_v60  ;;  %v9533_v43 = vpop.eup %7081 }
 0x2c4   : > { %3019 = vmax.xlane.f32.xlu1 %v3018_v62  ;;  %v772_v20 = vsub.f32 %v9482_v12, %v740_v33  ;;  %v744_v2 = vmax.f32 %v680_v49, %v712_v44  ;;  %7095 = vpow2.f32 %v930_v5  ;;  %v938_v45 = vmul.f32 1.442695, %v875_v58 }
 0x2c5   : > { %v9510_v36 = vpop.f32.mrb[140].mxu0  ;;  %v868_v27 = vsub.f32 %v9485_v47, %v740_v33  ;;  %v9535_v18 = vpop.permute.xlu0 %4337  ;;  %7097 = vpow2.f32 %v838_v57  ;;  %v920_v47 = vmul.f32 1.442695, %v866_v13  ;;  %v870_v33 = vsub.f32 %v9498_v0, %v742_v6  ;;  %v714_v13 = vld [vmem:[%s8106_s18 + $0xf0] sm:$0xff] }
 0x2c6   : > { %11520 = vst [vmem:[#allocation163_spill] sm:$0xff] %v9510_v36  ;;  %3112 = vmax.xlane.f32.xlu0 %v3111_v8  ;;  %v9514_v15 = vpop.f32.mrb[140].mxu1  ;;  %v9516_v62 = vpop.f32.mrb[141].mxu0  ;;  %11527 = vst [vmem:[#allocation170_spill] sm:$0xff] %v9535_v18  ;;  %7099 = vpow2.f32 %v934_v30  ;;  %v828_v58 = vmul.f32 1.442695, %v772_v20  ;;  %v776_v18 = vsub.f32 %v680_v49, %v744_v2 }
 0x2c7   : > { %11521 = vst [vmem:[#allocation164_spill] sm:$0xff] %v9514_v15  ;;  %11522 = vst [vmem:[#allocation165_spill] sm:$0xff] %v9516_v62  ;;  %v9519_v19 = vpop.f32.mrb[141].mxu1  ;;  %v9521_v50 = vpop.f32.mrb[142].mxu0  ;;  %v3117_v10 = vmax.f32 %v9510_v36, %v9516_v62  ;;  %v774_v62 = vsub.f32 %v678_v14, %v742_v6  ;;  %7101 = vpow2.f32 %v842_v4  ;;  %v924_v57 = vmul.f32 1.442695, %v868_v27 }
 0x2c8   : > { %11523 = vst [vmem:[#allocation166_spill] sm:$0xff] %v9519_v19  ;;  %11524 = vst [vmem:[#allocation167_spill] sm:$0xff] %v9521_v50  ;;  %3115 = vmax.xlane.f32.xlu1 %v3114_v21  ;;  %v9526_v8 = vpop.f32.mrb[142].mxu1  ;;  %v9528_v56 = vpop.f32.mrb[143].mxu0  ;;  %v3021_v61 = vmax.f32 %v9514_v15, %v9519_v19  ;;  %v824_v21 = vmul.f32 1.442695, %v770_v63  ;;  %7103 = vpow2.f32 %v938_v45  ;;  %v872_v14 = vsub.f32 %v712_v44, %v744_v2 }
 0x2c9   : > { %11525 = vst [vmem:[#allocation168_spill] sm:$0xff] %v9526_v8  ;;  %11526 = vst [vmem:[#allocation169_spill] sm:$0xff] %v9528_v56  ;;  %v9537_v60 = vpop.f32.mrb[143].mxu1  ;;  %v9541_v36 = vpop.eup %7083  ;;  %v832_v12 = vmul.f32 1.442695, %v774_v62  ;;  %v682_v6 = vld [vmem:[%s8099_s15 + $0xf0] sm:$0xff] }
 0x2ca   : > { %11528 = vst [vmem:[#allocation171_spill] sm:$0xff] %v9537_v60  ;;  %3022 = vmax.xlane.f32.xlu0 %v3021_v61  ;;  %v9546_v19 = vpop.eup %7085  ;;  %7105 = vpow2.f32 %v824_v21  ;;  %v9552_v30 = vpop.permute.xlu1 %4939  ;;  %v928_v0 = vmul.f32 1.442695, %v870_v33  ;;  %v836_v20 = vmul.f32 1.442695, %v776_v18  ;;  %v746_v62 = vmax.f32 %v682_v6, %v714_v13 }
 0x2cb   : > { %v9548_v63 = vpop.eup %7087  ;;  %11529 = vst [vmem:[#allocation172_spill] sm:$0xff] %v9552_v30  ;;  %7107 = vpow2.f32 %v920_v47  ;;  %v9558_v49 = vpop.permute.xlu0 %4944  ;;  %v932_v44 = vmul.f32 1.442695, %v872_v14  ;;  %v1025_v47 = vmul.f32 %v9533_v43, %v9404_v34 }
 0x2cc   : > { %v9550_v5 = vpop.eup %7089  ;;  %11530 = vst [vmem:[#allocation173_spill] sm:$0xff] %v9558_v49  ;;  %7109 = vpow2.f32 %v828_v58  ;;  %v778_v33 = vsub.f32 %v682_v6, %v746_v62  ;;  %v874_v14 = vsub.f32 %v714_v13, %v746_v62 }
 0x2cd   : > { %v9556_v4 = vpop.eup %7091  ;;  %7111 = vpow2.f32 %v924_v57 }
 0x2ce   : > { %3118 = vmax.xlane.f32.xlu0 %v3117_v10  ;;  %v9560_v2 = vpop.eup %7093  ;;  %7113 = vpow2.f32 %v832_v12  ;;  %v9568_v27 = vpop.permute.xlu1 %4347  ;;  %v963_v12 = vadd.f32 %v9546_v19, %v9541_v36  ;;  %v965_v57 = vadd.f32 %v9556_v4, %v9550_v5  ;;  %v840_v6 = vmul.f32 1.442695, %v778_v33 }
 0x2cf   : > { %v9562_v61 = vpop.eup %7095  ;;  %7115 = vpow2.f32 %v928_v0  ;;  %11531 = vst [vmem:[#allocation174_spill] sm:$0xff] %v9568_v27  ;;  %v9572_v18 = vpop.permute.xlu0 %4352  ;;  %v936_v13 = vmul.f32 1.442695, %v874_v14 }
 0x2d0   : > { %v9564_v10 = vpop.eup %7097  ;;  %7117 = vpow2.f32 %v836_v20  ;;  %11532 = vst [vmem:[#allocation175_spill] sm:$0xff] %v9572_v18  ;;  %v967_v20 = vadd.f32 %v9562_v61, %v9560_v2 }
 0x2d1   : > { %v9566_v45 = vpop.eup %7099  ;;  %7119 = vpow2.f32 %v932_v44 }
 0x2d2   : > { %v9570_v21 = vpop.eup %7101  ;;  %v969_v34 = vadd.f32 %v9566_v45, %v9564_v10  ;;  %7121 = vrcp.f32 %v963_v12  ;;  %v9594_v49 = vpop.permute.xlu1 %4949 }
 0x2d3   : > { %v9578_v58 = vpop.eup %7103  ;;  %11534 = vst [vmem:[#allocation177_spill] sm:$0xff] %v9594_v49  ;;  %7123 = vrcp.f32 %v965_v57  ;;  %v9598_v30 = vpop.permute.xlu0 %4954 }
 0x2d4   : > { %11533 = vst [vmem:[#allocation176_spill] sm:$0xff] %v9578_v58  ;;  %v9582_v0 = vpop.eup %7105  ;;  %11535 = vst [vmem:[#allocation178_spill] sm:$0xff] %v9598_v30  ;;  %7125 = vrcp.f32 %v967_v20  ;;  %v971_v15 = vadd.f32 %v9578_v58, %v9570_v21 }
 0x2d5   : > { %v9586_v44 = vpop.eup %7107  ;;  %7127 = vrcp.f32 %v969_v34  ;;  %v1024_v34 = vmul.f32 %v9548_v63, %v9435_v23 }
 0x2d6   : > { %v9590_v18 = vpop.eup %7109  ;;  %7129 = vpow2.f32 %v840_v6 }
 0x2d7   : > { %v9592_v27 = vpop.eup %7111  ;;  %7131 = vpow2.f32 %v936_v13 }
 0x2d8   : > { %v9596_v62 = vpop.eup %7113  ;;  %v964_v33 = vadd.f32 %v9592_v27, %v9590_v18  ;;  %7133 = vrcp.f32 %v971_v15 }
 0x2d9   : > { %4362 = vperm.xlu1 %6942, %v1025_v47   ;;  %v9602_v56 = vpop.eup %7115  ;;  %v962_v47 = vadd.f32 %v9586_v44, %v9582_v0 }
 0x2da   : > { %v9606_v12 = vpop.eup %7117  ;;  %v966_v30 = vadd.f32 %v9602_v56, %v9596_v62 }
 0x2db   : > { %v9610_v57 = vpop.eup %7119  ;;  %7135 = vrcp.f32 %v962_v47 }
 0x2dc   : > { %7137 = vrcp.f32 %v964_v33  ;;  %v968_v58 = vadd.f32 %v9610_v57, %v9606_v12  ;;  %v7122_v52 = vpop.eup %7121 }
 0x2dd   : > { %7139 = vrcp.f32 %v966_v30  ;;  %v7124_v23 = vpop.eup %7123 }
 0x2de   : > { %v3029_v14 = vpop.xlane.xlu1 %3028  ;;  %7141 = vrcp.f32 %v968_v58 }
 0x2df   : > { %v2933_v20 = vpop.xlane.xlu0 %2932 }
 0x2e0   : > { %v3123_v49 = vmax.f32 %v2933_v20, %v3029_v14  ;;  %v1057_v14 = vmul.f32 %v9533_v43, %v9416_v3 }
 0x2e2   : > { %v3155_v6 = vsub.f32 %v9032_v11, %v3123_v49  ;;  %v3156_v50 = vsub.f32 %v9036_v55, %v3123_v49  ;;  %v3347_v13 = vsub.f32 %v9030_v53, %v3123_v49  ;;  %v3348_v15 = vsub.f32 %v9034_v31, %v3123_v49  ;;  %v3032_v29 = vpop.xlane.xlu1 %3031  ;;  %v7126_v11 = vpop.eup %7125 }
 0x2e3   : > { %v2936_v39 = vpop.xlane.xlu0 %2935  ;;  %v7128_v55 = vpop.eup %7127 }
 0x2e4   : > { %v3219_v47 = vmul.f32 1.442695, %v3155_v6  ;;  %v3221_v33 = vmul.f32 1.442695, %v3156_v50  ;;  %v3411_v20 = vmul.f32 1.442695, %v3347_v13  ;;  %v3124_v25 = vmax.f32 %v2936_v39, %v3032_v29  ;;  %4357 = vperm.xlu0 %6941, %v1024_v34   ;;  %v9627_v8 = vpop.eup %7129 }
 0x2e5   : > { %v3413_v60 = vmul.f32 1.442695, %v3348_v15  ;;  %v1027_v29 = vmul.f32 %v7122_v52, %v9541_v36  ;;  %v9631_v39 = vpop.eup %7131  ;;  %v1059_v34 = vmul.f32 %v7122_v52, %v9546_v19  ;;  %v9641_v36 = vmul.f32 %v7126_v11, %v9560_v2 }
 0x2e6   : > { %7143 = vpow2.f32 %v3219_v47  ;;  %v3157_v53 = vsub.f32 %v9042_v37, %v3124_v25  ;;  %v3158_v31 = vsub.f32 %v9048_v40, %v3124_v25  ;;  %v3349_v49 = vsub.f32 %v9038_v24, %v3124_v25  ;;  %11536 = vst [vmem:[#allocation179_spill] sm:$0xff] %v9631_v39  ;;  %v9633_v37 = vpop.eup %7133 }
 0x2e7   : > { %7145 = vpow2.f32 %v3221_v33  ;;  %v3350_v3 = vsub.f32 %v9044_v9, %v3124_v25  ;;  %v2939_v50 = vpop.xlane.xlu0 %2938  ;;  %11537 = vst [vmem:[#allocation180_spill] sm:$0xff] %v9633_v37  ;;  %v7136_v6 = vpop.eup %7135  ;;  %v1029_v9 = vmul.f32 %v7124_v23, %v9550_v5  ;;  %v9638_v25 = vmul.f32 %v7124_v23, %v9556_v4 }
 0x2e8   : > { %7147 = vpow2.f32 %v3411_v20  ;;  %v3223_v43 = vmul.f32 1.442695, %v3157_v53  ;;  %v3225_v30 = vmul.f32 1.442695, %v3158_v31  ;;  %v3415_v58 = vmul.f32 1.442695, %v3349_v49  ;;  %4964 = vperm.xlu0 %6941, %v1057_v14   ;;  %v7138_v13 = vpop.eup %7137 }
 0x2e9   : > { %7149 = vpow2.f32 %v3413_v60  ;;  %v3417_v40 = vmul.f32 1.442695, %v3350_v3  ;;  %v2942_v24 = vpop.xlane.xlu1 %2941  ;;  %v9644_v14 = vmul.f32 %v7126_v11, %v9562_v61  ;;  %v9647_v60 = vmul.f32 %v7128_v55, %v9564_v10  ;;  %v7140_v2 = vpop.eup %7139 }
 0x2ea   : > { %7151 = vpow2.f32 %v3223_v43  ;;  %v970_v52 = vadd.f32 %v9631_v39, %v9627_v8  ;;  %v9652_v5 = vmul.f32 %v7128_v55, %v9566_v45  ;;  %v9656_v4 = vmul.f32 %v9633_v37, %v9570_v21  ;;  %v7142_v11 = vpop.eup %7141 }
 0x2eb   : > { %7153 = vpow2.f32 %v3225_v30  ;;  %v3035_v15 = vpop.xlane.xlu0 %3034  ;;  %v9660_v10 = vmul.f32 %v9548_v63, %v9439_v22  ;;  %v9663_v23 = vmul.f32 %v7136_v6, %v9582_v0  ;;  %v9666_v47 = vmul.f32 %v7136_v6, %v9586_v44 }
 0x2ec   : > { %7155 = vpow2.f32 %v3415_v58  ;;  %v3125_v19 = vmax.f32 %v2939_v50, %v3035_v15  ;;  %4372 = vperm.xlu0 %6941, %v1027_v29   ;;  %v9673_v22 = vmul.f32 %v7138_v13, %v9590_v18  ;;  %v9676_v63 = vmul.f32 %v7138_v13, %v9592_v27 }
 0x2ed   : > { %7157 = vpow2.f32 %v3417_v40  ;;  %v3038_v61 = vpop.xlane.xlu1 %3037  ;;  %v9688_v43 = vmul.f32 %v7140_v2, %v9602_v56 }
 0x2ee   : > { %v3159_v45 = vsub.f32 %v9058_v32, %v3125_v19  ;;  %v3160_v33 = vsub.f32 %v9062_v41, %v3125_v19  ;;  %v3351_v21 = vsub.f32 %v9056_v51, %v3125_v19  ;;  %v3352_v20 = vsub.f32 %v9060_v54, %v3125_v19 }
 0x2ef   : > { %v3126_v55 = vmax.f32 %v2942_v24, %v3038_v61  ;;  %v2945_v53 = vpop.xlane.xlu0 %2944  ;;  %7159 = vrcp.f32 %v970_v52  ;;  %v9679_v41 = vmul.f32 %v7140_v2, %v9596_v62  ;;  %v9699_v52 = vmul.f32 %v7142_v11, %v9610_v57 }
 0x2f0   : > { %v7144_v0 = vpop.eup %7143  ;;  %v3227_v44 = vmul.f32 1.442695, %v3159_v45  ;;  %v3229_v31 = vmul.f32 1.442695, %v3160_v33  ;;  %v3419_v32 = vmul.f32 1.442695, %v3351_v21  ;;  %4974 = vperm.xlu0 %6941, %v1059_v34  }
 0x2f1   : > { %v7146_v51 = vpop.eup %7145  ;;  %v3421_v54 = vmul.f32 1.442695, %v3352_v20  ;;  %v3161_v49 = vsub.f32 %v9068_v48, %v3126_v55  ;;  %v3162_v3 = vsub.f32 %v9074_v35, %v3126_v55  ;;  %v3353_v18 = vsub.f32 %v9064_v42, %v3126_v55  ;;  %v2948_v50 = vpop.xlane.xlu1 %2947 }
 0x2f2   : > { %v9684_v27 = vpop.eup %7147  ;;  %7161 = vpow2.f32 %v3227_v44  ;;  %v3354_v29 = vsub.f32 %v9070_v16, %v3126_v55  ;;  %v9690_v30 = vadd.f32 %v7146_v51, %v7144_v0  ;;  %v9693_v35 = vmul.f32 %v7142_v11, %v9606_v12 }
 0x2f3   : > { %v7150_v62 = vpop.eup %7149  ;;  %7163 = vpow2.f32 %v3229_v31  ;;  %v3231_v58 = vmul.f32 1.442695, %v3161_v49  ;;  %v3233_v40 = vmul.f32 1.442695, %v3162_v3  ;;  %v3041_v48 = vpop.xlane.xlu0 %3040  ;;  %v3423_v24 = vmul.f32 1.442695, %v3353_v18 }
 0x2f4   : > { %v7152_v42 = vpop.eup %7151  ;;  %7165 = vpow2.f32 %v3419_v32  ;;  %v3127_v34 = vmax.f32 %v2945_v53, %v3041_v48  ;;  %4382 = vperm.xlu0 %6941, %v1029_v9   ;;  %v9696_v16 = vadd.f32 %v7150_v62, %v9684_v27  ;;  %v3425_v6 = vmul.f32 1.442695, %v3354_v29 }
 0x2f5   : > { %v7154_v56 = vpop.eup %7153  ;;  %7167 = vpow2.f32 %v3421_v54  ;;  %v3044_v13 = vpop.xlane.xlu1 %3043  ;;  %v3795_v15 = vpack.c.bf16 %v7152_v42, %v7144_v0 }
 0x2f6   : > { %v7156_v19 = vpop.eup %7155  ;;  %7169 = vpow2.f32 %v3231_v58  ;;  %v3163_v12 = vsub.f32 %v9084_v26, %v3127_v34  ;;  %v3164_v2 = vsub.f32 %v9088_v38, %v3127_v34  ;;  %v3355_v61 = vsub.f32 %v9082_v59, %v3127_v34 }
 0x2f7   : > { %v7158_v9 = vpop.eup %7157  ;;  %7171 = vpow2.f32 %v3233_v40  ;;  %v3356_v45 = vsub.f32 %v9086_v46, %v3127_v34  ;;  %v3128_v33 = vmax.f32 %v2948_v50, %v3044_v13  ;;  %v3796_v21 = vpack.c.bf16 %v7154_v56, %v7146_v51  ;;  %v2951_v20 = vpop.xlane.xlu0 %2950  ;;  %v11539_v50 = vld [vmem:[#allocation168_spill] sm:$0xff]  ;;  %v11544_v34 = vld [vmem:[#allocation2_spill] sm:$0xff] }
 0x2f8   : > { %7173 = vpow2.f32 %v3423_v24  ;;  %v3235_v55 = vmul.f32 1.442695, %v3163_v12  ;;  %v3237_v53 = vmul.f32 1.442695, %v3164_v2  ;;  %v3427_v57 = vmul.f32 1.442695, %v3355_v61  ;;  %4984 = vperm.xlu0 %6941, %v9638_v25  }
 0x2f9   : > { %v9706_v11 = vpop.eup %7159  ;;  %7175 = vpow2.f32 %v3425_v6  ;;  %v3429_v26 = vmul.f32 1.442695, %v3356_v45  ;;  %v3165_v38 = vsub.f32 %v9094_v7, %v3128_v33  ;;  %v3166_v59 = vsub.f32 %v9100_v1, %v3128_v33  ;;  %4084 = vmatprep.mubr.bf16.mxu0 %v3796_v21  ;;  %v2954_v0 = vpop.xlane.xlu1 %2953  ;;  %v11543_v24 = vld [vmem:[#allocation44_spill] sm:$0xff] }
 0x2fa   : > { %11538 = vst [vmem:[#allocation181_spill] sm:$0xff] %v9706_v11  ;;  %7177 = vpow2.f32 %v3235_v55  ;;  %v3357_v46 = vsub.f32 %v9090_v28, %v3128_v33  ;;  %v3358_v44 = vsub.f32 %v9096_v17, %v3128_v33  ;;  %v3844_v31 = vpack.c.bf16 %v7158_v9, %v7150_v62  ;;  %4085 = vmatmul.mubr.bf16.vlgmr.msra.gmra.mrb[144].mxu0 %v3795_v15  ;;  %v11545_v15 = vld [vmem:[#allocation21_spill] sm:$0xff] }
 0x2fb   : > { %7179 = vpow2.f32 %v3237_v53  ;;  %v3239_v32 = vmul.f32 1.442695, %v3165_v38  ;;  %v3241_v25 = vmul.f32 1.442695, %v3166_v59  ;;  %v3843_v51 = vpack.c.bf16 %v7156_v19, %v9684_v27  ;;  %v3047_v54 = vpop.xlane.xlu0 %3046  ;;  %v11540_v27 = vld [vmem:[#allocation171_spill] sm:$0xff]  ;;  %v11549_v59 = vld [vmem:[#allocation169_spill] sm:$0xff] }
 0x2fc   : > { %v9713_v49 = vpop.eup %7161  ;;  %7181 = vpow2.f32 %v3427_v57  ;;  %v3431_v7 = vmul.f32 1.442695, %v3357_v46  ;;  %3923 = vmatprep.mubr.bf16.mxu1 %v3844_v31  ;;  %v3129_v1 = vmax.f32 %v2951_v20, %v3047_v54  ;;  %4392 = vperm.xlu0 %6941, %v9641_v36   ;;  %v9718_v28 = vmul.f32 %v9706_v11, %v9627_v8  ;;  %v11542_v36 = vld [vmem:[#allocation57_spill] sm:$0xff]  ;;  %v11547_v53 = vld [vmem:[#allocation7_spill] sm:$0xff] }
 0x2fd   : > { %v7164_v17 = vpop.eup %7163  ;;  %7183 = vpow2.f32 %v3429_v26  ;;  %v3433_v3 = vmul.f32 1.442695, %v3358_v44  ;;  %3924 = vmatmul.mubr.bf16.vlgmr.msra.gmra.mrb[144].mxu1 %v3843_v51  ;;  %v3050_v18 = vpop.xlane.xlu1 %3049  ;;  %v11541_v29 = vmax.f32 %v11539_v50, %v11540_v27  ;;  %v9723_v62 = vadd.f32 %v7154_v56, %v7152_v42  ;;  %v11546_v20 = vld [vmem:[#allocation49_spill] sm:$0xff]  ;;  %v11548_v38 = vld [vmem:[#allocation167_spill] sm:$0xff]  ;;  %v11551_v44 = vld [vmem:[#allocation42_spill] sm:$0xff] }
 0x2fe   : > { %v9725_v58 = vadd.f32 %v7158_v9, %v7156_v19  ;;  %v7166_v40 = vpop.eup %7165  ;;  %7185 = vpow2.f32 %v3239_v32  ;;  %v3167_v48 = vsub.f32 %v11542_v36, %v3129_v1  ;;  %v3168_v8 = vsub.f32 %v11543_v24, %v3129_v1  ;;  %v11552_v32 = vld [vmem:[#allocation47_spill] sm:$0xff] }
 0x2ff   : > { %3025 = vmax.xlane.f32.xlu1 %v11541_v29  ;;  %v3359_v6 = vsub.f32 %v11544_v34, %v3129_v1  ;;  %v7168_v13 = vpop.eup %7167  ;;  %7187 = vpow2.f32 %v3241_v25  ;;  %v3360_v12 = vsub.f32 %v11545_v15, %v3129_v1  ;;  %v3130_v2 = vmax.f32 %v2954_v0, %v3050_v18  ;;  %v2957_v61 = vpop.xlane.xlu0 %2956  ;;  %v11584_v11 = vld [vmem:[#allocation83_spill] sm:$0xff] }
 0x300   : > { %v9732_v45 = vadd.f32 %v7164_v17, %v9713_v49  ;;  %v7170_v42 = vpop.eup %7169  ;;  %7189 = vpow2.f32 %v3431_v7  ;;  %v3243_v56 = vmul.f32 1.442695, %v3167_v48  ;;  %v3245_v19 = vmul.f32 1.442695, %v3168_v8  ;;  %4994 = vperm.xlu0 %6941, %v9644_v14  }
 0x301   : > { %v3435_v9 = vmul.f32 1.442695, %v3359_v6  ;;  %v7172_v33 = vpop.eup %7171  ;;  %7191 = vpow2.f32 %v3433_v3  ;;  %v3437_v21 = vmul.f32 1.442695, %v3360_v12  ;;  %v3169_v55 = vsub.f32 %v11546_v20, %v3130_v2  ;;  %v2960_v26 = vpop.xlane.xlu1 %2959 }
 0x302   : > { %v3170_v57 = vsub.f32 %v11547_v53, %v3130_v2  ;;  %v11550_v0 = vmax.f32 %v11548_v38, %v11549_v59  ;;  %v9740_v46 = vpop.eup %7173  ;;  %7193 = vpow2.f32 %v3243_v56  ;;  %v3361_v31 = vsub.f32 %v11551_v44, %v3130_v2 }
 0x303   : > { %v3362_v25 = vsub.f32 %v11552_v32, %v3130_v2  ;;  %v3798_v14 = vpack.c.bf16 %v7172_v33, %v7164_v17  ;;  %v9744_v51 = vpop.eup %7175  ;;  %7195 = vpow2.f32 %v3245_v19  ;;  %v3247_v54 = vmul.f32 1.442695, %v3169_v55  ;;  %v3053_v3 = vpop.xlane.xlu0 %3052  ;;  %v11556_v55 = vld [vmem:[#allocation58_spill] sm:$0xff] }
 0x304   : > { %3121 = vmax.xlane.f32.xlu1 %v11550_v0  ;;  %v3249_v7 = vmul.f32 1.442695, %v3170_v57  ;;  %v3845_v1 = vpack.c.bf16 %v9740_v46, %v7166_v40  ;;  %v9747_v18 = vpop.eup %7177  ;;  %7197 = vpow2.f32 %v3435_v9  ;;  %v3439_v29 = vmul.f32 1.442695, %v3361_v31  ;;  %4402 = vperm.xlu0 %6941, %v9647_v60   ;;  %v11553_v60 = vld [vmem:[#allocation18_spill] sm:$0xff] }
 0x305   : > { %v3441_v36 = vmul.f32 1.442695, %v3362_v25  ;;  %v3846_v48 = vpack.c.bf16 %v9744_v51, %v7168_v13  ;;  %4092 = vmatprep.mubr.bf16.mxu0 %v3798_v14  ;;  %v7180_v24 = vpop.eup %7179  ;;  %7199 = vpow2.f32 %v3437_v21  ;;  %v3797_v17 = vpack.c.bf16 %v7170_v42, %v9713_v49  ;;  %v3056_v34 = vpop.xlane.xlu1 %3055  ;;  %v11554_v49 = vld [vmem:[#allocation63_spill] sm:$0xff]  ;;  %v11557_v57 = vld [vmem:[#allocation62_spill] sm:$0xff] }
 0x306   : > { %v3131_v8 = vmax.f32 %v2957_v61, %v3053_v3  ;;  %v9752_v6 = vadd.f32 %v7168_v13, %v7166_v40  ;;  %v7182_v15 = vpop.eup %7181  ;;  %7201 = vpow2.f32 %v3247_v54  ;;  %v3132_v12 = vmax.f32 %v2960_v26, %v3056_v34  ;;  %v11555_v21 = vld [vmem:[#allocation55_spill] sm:$0xff]  ;;  %v11559_v3 = vld [vmem:[#allocation65_spill] sm:$0xff] }
 0x307   : > { %3931 = vmatprep.mubr.bf16.mxu1 %v3846_v48  ;;  %v9755_v2 = vadd.f32 %v7180_v24, %v9747_v18  ;;  %v9757_v56 = vadd.f32 %v7172_v33, %v7170_v42  ;;  %v7184_v19 = vpop.eup %7183  ;;  %7203 = vpow2.f32 %v3249_v7  ;;  %4093 = vmatmul.mubr.bf16.gmra.mrb[148].mxu0 %v3797_v17  ;;  %v2963_v13 = vpop.xlane.xlu0 %2962  ;;  %v11558_v42 = vld [vmem:[#allocation3_spill] sm:$0xff]  ;;  %v11560_v17 = vld [vmem:[#allocation64_spill] sm:$0xff] }
 0x308   : > { %3932 = vmatmul.mubr.bf16.gmra.mrb[148].mxu1 %v3845_v1  ;;  %v3171_v9 = vsub.f32 %v11553_v60, %v3131_v8  ;;  %v3172_v61 = vsub.f32 %v11554_v49, %v3131_v8  ;;  %v3363_v40 = vsub.f32 %v11555_v21, %v3131_v8  ;;  %v9762_v20 = vpop.eup %7185  ;;  %7205 = vpow2.f32 %v3439_v29  ;;  %5004 = vperm.xlu0 %6941, %v9652_v5  }
 0x309   : > { %v3364_v53 = vsub.f32 %v11556_v55, %v3131_v8  ;;  %v3173_v26 = vsub.f32 %v11557_v57, %v3132_v12  ;;  %v3174_v33 = vsub.f32 %v11558_v42, %v3132_v12  ;;  %v9768_v0 = vpop.eup %7187  ;;  %7207 = vpow2.f32 %v3441_v36  ;;  %v2966_v25 = vpop.xlane.xlu1 %2965  ;;  %v11561_v42 = vld [vmem:[#allocation50_spill] sm:$0xff] }
 0x30a   : > { %v3251_v44 = vmul.f32 1.442695, %v3171_v9  ;;  %v3253_v31 = vmul.f32 1.442695, %v3172_v61  ;;  %v3443_v32 = vmul.f32 1.442695, %v3363_v40  ;;  %v9770_v14 = vpop.eup %7189  ;;  %v3365_v29 = vsub.f32 %v11559_v3, %v3132_v12 }
 0x30b   : > { %v3445_v54 = vmul.f32 1.442695, %v3364_v53  ;;  %v3255_v7 = vmul.f32 1.442695, %v3173_v26  ;;  %v3257_v1 = vmul.f32 1.442695, %v3174_v33  ;;  %v9773_v48 = vpop.eup %7191  ;;  %v3366_v8 = vsub.f32 %v11560_v17, %v3132_v12  ;;  %v3059_v34 = vpop.xlane.xlu0 %3058 }
 0x30c   : > { %7209 = vpow2.f32 %v3251_v44  ;;  %v3800_v5 = vpack.c.bf16 %v9768_v0, %v7180_v24  ;;  %v3847_v36 = vpack.c.bf16 %v9770_v14, %v7182_v15  ;;  %v9778_v60 = vpop.eup %7193  ;;  %v3447_v9 = vmul.f32 1.442695, %v3365_v29  ;;  %4412 = vperm.xlu0 %6941, %v9656_v4   ;;  %v11562_v33 = vld [vmem:[#allocation66_spill] sm:$0xff]  ;;  %v11565_v3 = vld [vmem:[#allocation68_spill] sm:$0xff] }
 0x30d   : > { %7211 = vpow2.f32 %v3253_v31  ;;  %v3848_v49 = vpack.c.bf16 %v9773_v48, %v7184_v19  ;;  %v3799_v61 = vpack.c.bf16 %v9762_v20, %v9747_v18  ;;  %v7196_v21 = vpop.eup %7195  ;;  %v3449_v40 = vmul.f32 1.442695, %v3366_v8  ;;  %v3062_v24 = vpop.xlane.xlu1 %3061 }
 0x30e   : > { %7213 = vpow2.f32 %v3443_v32  ;;  %4100 = vmatprep.mubr.bf16.mxu0 %v3800_v5  ;;  %v3133_v12 = vmax.f32 %v2963_v13, %v3059_v34  ;;  %v9784_v55 = vadd.f32 %v7184_v19, %v7182_v15  ;;  %v7198_v53 = vpop.eup %7197  ;;  %v3134_v57 = vmax.f32 %v2966_v25, %v3062_v24  ;;  %v11563_v19 = vld [vmem:[#allocation43_spill] sm:$0xff]  ;;  %v11564_v25 = vld [vmem:[#allocation48_spill] sm:$0xff] }
 0x30f   : > { %7215 = vpow2.f32 %v3445_v54  ;;  %3939 = vmatprep.mubr.bf16.mxu1 %v3848_v49  ;;  %v9787_v26 = vadd.f32 %v7196_v21, %v9778_v60  ;;  %v9791_v18 = vadd.f32 %v9744_v51, %v9740_v46  ;;  %v7200_v4 = vpop.eup %7199  ;;  %4101 = vmatmul.mubr.bf16.gmra.mrb[152].mxu0 %v3799_v61  ;;  %v2969_v31 = vpop.xlane.xlu0 %2968  ;;  %v11566_v46 = vld [vmem:[#allocation70_spill] sm:$0xff] }
 0x310   : > { %7217 = vpow2.f32 %v3255_v7  ;;  %3940 = vmatmul.mubr.bf16.gmra.mrb[152].mxu1 %v3847_v36  ;;  %v3175_v13 = vsub.f32 %v11561_v42, %v3133_v12  ;;  %v3176_v15 = vsub.f32 %v11562_v33, %v3133_v12  ;;  %v3367_v44 = vsub.f32 %v11563_v19, %v3133_v12  ;;  %v9796_v32 = vpop.eup %7201  ;;  %v11570_v33 = vld [vmem:[#allocation69_spill] sm:$0xff] }
 0x311   : > { %7219 = vpow2.f32 %v3257_v1  ;;  %v3368_v54 = vsub.f32 %v11564_v25, %v3133_v12  ;;  %v3177_v29 = vsub.f32 %v11565_v3, %v3134_v57  ;;  %v3178_v51 = vsub.f32 %v11566_v46, %v3134_v57  ;;  %v9801_v17 = vpop.eup %7203  ;;  %v2972_v36 = vpop.xlane.xlu1 %2971  ;;  %v11569_v12 = vld [vmem:[#allocation67_spill] sm:$0xff] }
 0x312   : > { %7221 = vpow2.f32 %v3447_v9  ;;  %v3259_v7 = vmul.f32 1.442695, %v3175_v13  ;;  %v3261_v8 = vmul.f32 1.442695, %v3176_v15  ;;  %v3451_v5 = vmul.f32 1.442695, %v3367_v44  ;;  %v9803_v34 = vpop.eup %7205 }
 0x313   : > { %11567 = vst [vmem:[#allocation57_spill] sm:$0xff] %v9803_v34  ;;  %7223 = vpow2.f32 %v3449_v40  ;;  %v3453_v49 = vmul.f32 1.442695, %v3368_v54  ;;  %v3263_v61 = vmul.f32 1.442695, %v3177_v29  ;;  %v9806_v1 = vpop.eup %7207  ;;  %v3369_v42 = vsub.f32 %v11569_v12, %v3134_v57  ;;  %v3065_v13 = vpop.xlane.xlu0 %3064 }
 0x314   : > { %v3265_v24 = vmul.f32 1.442695, %v3178_v51  ;;  %11568 = vst [vmem:[#allocation44_spill] sm:$0xff] %v9806_v1  ;;  %7225 = vpow2.f32 %v3259_v7  ;;  %v3370_v19 = vsub.f32 %v11570_v33, %v3134_v57  ;;  %v3802_v9 = vpack.c.bf16 %v9801_v17, %v7196_v21 }
 0x315   : > { %4959 = vperm.xlu1 %6942, %v9660_v10   ;;  %7227 = vpow2.f32 %v3261_v8  ;;  %v3850_v15 = vpack.c.bf16 %v9806_v1, %v7200_v4  ;;  %v3849_v40 = vpack.c.bf16 %v9803_v34, %v7198_v53  ;;  %v3801_v44 = vpack.c.bf16 %v9796_v32, %v9778_v60  ;;  %v3068_v29 = vpop.xlane.xlu1 %3067  ;;  %v11573_v8 = vld [vmem:[#allocation76_spill] sm:$0xff] }
 0x316   : > { %v9815_v25 = vpop.eup %7209  ;;  %7229 = vpow2.f32 %v3451_v5  ;;  %v3455_v10 = vmul.f32 1.442695, %v3369_v42  ;;  %v3457_v54 = vmul.f32 1.442695, %v3370_v19  ;;  %4108 = vmatprep.mubr.bf16.mxu0 %v3802_v9  ;;  %v3135_v3 = vmax.f32 %v2969_v31, %v3065_v13  ;;  %v11572_v31 = vld [vmem:[#allocation74_spill] sm:$0xff] }
 0x317   : > { %v9817_v57 = vpop.eup %7211  ;;  %7231 = vpow2.f32 %v3453_v49  ;;  %3947 = vmatprep.mubr.bf16.mxu1 %v3850_v15  ;;  %v3136_v21 = vmax.f32 %v2972_v36, %v3068_v29  ;;  %v9820_v46 = vadd.f32 %v7200_v4, %v7198_v53  ;;  %v9824_v60 = vadd.f32 %v9768_v0, %v9762_v20  ;;  %4109 = vmatmul.mubr.bf16.gmra.mrb[156].mxu0 %v3801_v44  ;;  %v11574_v49 = vld [vmem:[#allocation73_spill] sm:$0xff]  ;;  %v2975_v36 = vpop.xlane.xlu0 %2974  ;;  %v11576_v4 = vld [vmem:[#allocation78_spill] sm:$0xff]  ;;  %v11577_v0 = vld [vmem:[#allocation80_spill] sm:$0xff] }
 0x318   : > { %v9826_v51 = vpop.eup %7213  ;;  %7233 = vpow2.f32 %v3263_v61  ;;  %3948 = vmatmul.mubr.bf16.gmra.mrb[156].mxu1 %v3849_v40  ;;  %v3179_v7 = vsub.f32 %v11572_v31, %v3135_v3  ;;  %v3180_v5 = vsub.f32 %v11573_v8, %v3135_v3  ;;  %v3371_v12 = vsub.f32 %v11574_v49, %v3135_v3  ;;  %v11580_v49 = vld [vmem:[#allocation79_spill] sm:$0xff] }
 0x319   : > { %4367 = vperm.xlu1 %6942, %v9663_v23   ;;  %11571 = vst [vmem:[#allocation2_spill] sm:$0xff] %v9824_v60  ;;  %v9831_v42 = vpop.eup %7215  ;;  %7235 = vpow2.f32 %v3265_v24  ;;  %v11575_v23 = vld [vmem:[#allocation75_spill] sm:$0xff]  ;;  %v3181_v20 = vsub.f32 %v11576_v4, %v3136_v21  ;;  %v3182_v33 = vsub.f32 %v11577_v0, %v3136_v21  ;;  %v2978_v15 = vpop.xlane.xlu1 %2977  ;;  %v11618_v60 = vld [vmem:[#allocation126_spill] sm:$0xff] }
 0x31a   : > { %v3372_v53 = vsub.f32 %v11575_v23, %v3135_v3  ;;  %v9836_v19 = vpop.eup %7217  ;;  %7237 = vpow2.f32 %v3455_v10  ;;  %v3267_v61 = vmul.f32 1.442695, %v3179_v7  ;;  %v3269_v9 = vmul.f32 1.442695, %v3180_v5  ;;  %v11579_v3 = vld [vmem:[#allocation77_spill] sm:$0xff] }
 0x31b   : > { %v3459_v13 = vmul.f32 1.442695, %v3371_v12  ;;  %v9838_v40 = vpop.eup %7219  ;;  %7239 = vpow2.f32 %v3457_v54  ;;  %v3271_v29 = vmul.f32 1.442695, %v3181_v20  ;;  %v3273_v31 = vmul.f32 1.442695, %v3182_v33  ;;  %v3071_v7 = vpop.xlane.xlu0 %3070 }
 0x31c   : > { %v3461_v44 = vmul.f32 1.442695, %v3372_v53  ;;  %v9841_v24 = vpop.eup %7221  ;;  %7241 = vpow2.f32 %v3267_v61  ;;  %v3373_v8 = vsub.f32 %v11579_v3, %v3136_v21  ;;  %v3374_v23 = vsub.f32 %v11580_v49, %v3136_v21  ;;  %v11582_v61 = vld [vmem:[#allocation84_spill] sm:$0xff]  ;;  %v11583_v3 = vld [vmem:[#allocation86_spill] sm:$0xff] }
 0x31d   : > { %4969 = vperm.xlu1 %6942, %v9666_v47   ;;  %11578 = vst [vmem:[#allocation21_spill] sm:$0xff] %v9841_v24  ;;  %v3804_v10 = vpack.c.bf16 %v9838_v40, %v9817_v57  ;;  %v9847_v5 = vpop.eup %7223  ;;  %7243 = vpow2.f32 %v3269_v9  ;;  %v3851_v54 = vpack.c.bf16 %v9841_v24, %v9826_v51  ;;  %v3803_v47 = vpack.c.bf16 %v9836_v19, %v9815_v25  ;;  %v3074_v0 = vpop.xlane.xlu1 %3073 }
 0x31e   : > { %11581 = vst [vmem:[#allocation49_spill] sm:$0xff] %v9847_v5  ;;  %v3137_v12 = vmax.f32 %v2975_v36, %v3071_v7  ;;  %v9853_v53 = vpop.eup %7225  ;;  %7245 = vpow2.f32 %v3459_v13  ;;  %v3463_v4 = vmul.f32 1.442695, %v3373_v8  ;;  %v3465_v20 = vmul.f32 1.442695, %v3374_v23  ;;  %v11585_v13 = vld [vmem:[#allocation85_spill] sm:$0xff] }
 0x31f   : > { %v3852_v21 = vpack.c.bf16 %v9847_v5, %v9831_v42  ;;  %4116 = vmatprep.mubr.bf16.mxu0 %v3804_v10  ;;  %v7228_v33 = vpop.eup %7227  ;;  %7247 = vpow2.f32 %v3461_v44  ;;  %v3138_v23 = vmax.f32 %v2978_v15, %v3074_v0  ;;  %v2981_v7 = vpop.xlane.xlu0 %2980  ;;  %v9864_v10 = vadd.f32 %v9817_v57, %v9815_v25  ;;  %v11588_v25 = vld [vmem:[#allocation87_spill] sm:$0xff] }
 0x320   : > { %v3183_v9 = vsub.f32 %v11582_v61, %v3137_v12  ;;  %v3184_v49 = vsub.f32 %v11583_v3, %v3137_v12  ;;  %v3375_v39 = vsub.f32 %v11584_v11, %v3137_v12  ;;  %v7230_v36 = vpop.eup %7229  ;;  %7249 = vpow2.f32 %v3271_v29  ;;  %4117 = vmatmul.mubr.bf16.gmra.mrb[160].mxu0 %v3803_v47  ;;  %v11586_v29 = vld [vmem:[#allocation88_spill] sm:$0xff]  ;;  %v11600_v5 = vld [vmem:[#allocation103_spill] sm:$0xff] }
 0x321   : > { %4377 = vperm.xlu1 %6942, %v9673_v22   ;;  %3955 = vmatprep.mubr.bf16.mxu1 %v3852_v21  ;;  %v3376_v8 = vsub.f32 %v11585_v13, %v3137_v12  ;;  %v7232_v44 = vpop.eup %7231  ;;  %7251 = vpow2.f32 %v3273_v31  ;;  %v3185_v47 = vsub.f32 %v11586_v29, %v3138_v23  ;;  %v11587_v21 = vld [vmem:[#allocation90_spill] sm:$0xff]  ;;  %v2984_v15 = vpop.xlane.xlu1 %2983  ;;  %v3377_v57 = vsub.f32 %v11588_v25, %v3138_v23  ;;  %v11589_v13 = vld [vmem:[#allocation89_spill] sm:$0xff] }
 0x322   : > { %3956 = vmatmul.mubr.bf16.gmra.mrb[160].mxu1 %v3851_v54  ;;  %v3275_v61 = vmul.f32 1.442695, %v3183_v9  ;;  %v3277_v3 = vmul.f32 1.442695, %v3184_v49  ;;  %v3467_v11 = vmul.f32 1.442695, %v3375_v39  ;;  %v9866_v37 = vpop.eup %7233  ;;  %7253 = vpow2.f32 %v3463_v4 }
 0x323   : > { %v3469_v22 = vmul.f32 1.442695, %v3376_v8  ;;  %v3186_v12 = vsub.f32 %v11587_v21, %v3138_v23  ;;  %v9870_v0 = vpop.eup %7235  ;;  %7255 = vpow2.f32 %v3465_v20  ;;  %v3378_v31 = vsub.f32 %v11589_v13, %v3138_v23  ;;  %v3077_v8 = vpop.xlane.xlu0 %3076 }
 0x324   : > { %v3805_v39 = vpack.c.bf16 %v9866_v37, %v9853_v53  ;;  %v9877_v54 = vpop.eup %7237  ;;  %7257 = vpow2.f32 %v3275_v61  ;;  %v3279_v4 = vmul.f32 1.442695, %v3185_v47  ;;  %v3806_v49 = vpack.c.bf16 %v9870_v0, %v7228_v33 }
 0x325   : > { %4979 = vperm.xlu1 %6942, %v9676_v63   ;;  %v3281_v9 = vmul.f32 1.442695, %v3186_v12  ;;  %v9880_v29 = vpop.eup %7239  ;;  %7259 = vpow2.f32 %v3277_v3  ;;  %v3471_v20 = vmul.f32 1.442695, %v3377_v57  ;;  %v3473_v21 = vmul.f32 1.442695, %v3378_v31  ;;  %v3080_v61 = vpop.xlane.xlu1 %3079 }
 0x326   : > { %v3853_v23 = vpack.c.bf16 %v9877_v54, %v7230_v36  ;;  %v9883_v25 = vpop.eup %7241  ;;  %7261 = vpow2.f32 %v3467_v11  ;;  %v3854_v63 = vpack.c.bf16 %v9880_v29, %v7232_v44  ;;  %4124 = vmatprep.mubr.bf16.mxu0 %v3806_v49  ;;  %v3139_v13 = vmax.f32 %v2981_v7, %v3077_v8  ;;  %v11590_v7 = vld [vmem:[#allocation94_spill] sm:$0xff]  ;;  %v11591_v8 = vld [vmem:[#allocation96_spill] sm:$0xff] }
 0x327   : > { %v9888_v47 = vadd.f32 %v9831_v42, %v9826_v51  ;;  %v9890_v12 = vpop.eup %7243  ;;  %7263 = vpow2.f32 %v3469_v22  ;;  %v3140_v3 = vmax.f32 %v2984_v15, %v3080_v61  ;;  %v9894_v57 = vadd.f32 %v7228_v33, %v9853_v53  ;;  %v11592_v42 = vld [vmem:[#allocation93_spill] sm:$0xff]  ;;  %v2987_v38 = vpop.xlane.xlu0 %2986  ;;  %v11594_v53 = vld [vmem:[#allocation98_spill] sm:$0xff] }
 0x328   : > { %v9896_v31 = vadd.f32 %v7232_v44, %v7230_v36  ;;  %v7246_v11 = vpop.eup %7245  ;;  %7265 = vpow2.f32 %v3279_v4  ;;  %3963 = vmatprep.mubr.bf16.mxu1 %v3854_v63  ;;  %4125 = vmatmul.mubr.bf16.gmra.mrb[164].mxu0 %v3805_v39  ;;  %v3187_v49 = vsub.f32 %v11590_v7, %v3139_v13  ;;  %v3188_v51 = vsub.f32 %v11591_v8, %v3139_v13  ;;  %v11595_v36 = vld [vmem:[#allocation100_spill] sm:$0xff] }
 0x329   : > { %4387 = vperm.xlu1 %6942, %v9679_v41   ;;  %v3379_v59 = vsub.f32 %v11592_v42, %v3139_v13  ;;  %v7248_v22 = vpop.eup %7247  ;;  %7267 = vpow2.f32 %v3281_v9  ;;  %v11593_v41 = vld [vmem:[#allocation95_spill] sm:$0xff]  ;;  %v3189_v33 = vsub.f32 %v11594_v53, %v3140_v3  ;;  %v3190_v44 = vsub.f32 %v11595_v36, %v3140_v3  ;;  %v2990_v7 = vpop.xlane.xlu1 %2989 }
 0x32a   : > { %3964 = vmatmul.mubr.bf16.gmra.mrb[164].mxu1 %v3853_v23  ;;  %v3380_v15 = vsub.f32 %v11593_v41, %v3139_v13  ;;  %v9904_v61 = vpop.eup %7249  ;;  %7269 = vpow2.f32 %v3471_v20  ;;  %v3283_v39 = vmul.f32 1.442695, %v3187_v49  ;;  %v3285_v4 = vmul.f32 1.442695, %v3188_v51  ;;  %v11596_v13 = vld [vmem:[#allocation97_spill] sm:$0xff]  ;;  %v11597_v53 = vld [vmem:[#allocation99_spill] sm:$0xff] }
 0x32b   : > { %v3475_v63 = vmul.f32 1.442695, %v3379_v59  ;;  %v9906_v8 = vpop.eup %7251  ;;  %7271 = vpow2.f32 %v3473_v21  ;;  %v3287_v27 = vmul.f32 1.442695, %v3189_v33  ;;  %v3289_v9 = vmul.f32 1.442695, %v3190_v44  ;;  %v3083_v59 = vpop.xlane.xlu0 %3082  ;;  %3540 = vadd.xlane.f32.xlu0 %v9690_v30 }
 0x32c   : > { %v3477_v42 = vmul.f32 1.442695, %v3380_v15  ;;  %v9909_v23 = vpop.eup %7253  ;;  %7273 = vpow2.f32 %v3283_v39  ;;  %v3381_v41 = vsub.f32 %v11596_v13, %v3140_v3  ;;  %v3382_v36 = vsub.f32 %v11597_v53, %v3140_v3  ;;  %v11598_v30 = vld [vmem:[#allocation104_spill] sm:$0xff] }
 0x32d   : > { %4989 = vperm.xlu1 %6942, %v9688_v43   ;;  %v3808_v20 = vpack.c.bf16 %v9906_v8, %v9890_v12  ;;  %v9916_v49 = vpop.eup %7255  ;;  %7275 = vpow2.f32 %v3285_v4  ;;  %v3855_v21 = vpack.c.bf16 %v9909_v23, %v7246_v11  ;;  %v3807_v43 = vpack.c.bf16 %v9904_v61, %v9883_v25  ;;  %v3086_v39 = vpop.xlane.xlu1 %3085  ;;  %v11599_v4 = vld [vmem:[#allocation106_spill] sm:$0xff] }
 0x32e   : > { %v3141_v51 = vmax.f32 %v2987_v38, %v3083_v59  ;;  %v9921_v15 = vpop.eup %7257  ;;  %7277 = vpow2.f32 %v3475_v63  ;;  %v3479_v33 = vmul.f32 1.442695, %v3381_v41  ;;  %v3481_v3 = vmul.f32 1.442695, %v3382_v36  ;;  %v11601_v63 = vld [vmem:[#allocation105_spill] sm:$0xff] }
 0x32f   : > { %v3856_v44 = vpack.c.bf16 %v9916_v49, %v7248_v22  ;;  %4132 = vmatprep.mubr.bf16.mxu0 %v3808_v20  ;;  %v7260_v13 = vpop.eup %7259  ;;  %7279 = vpow2.f32 %v3477_v42  ;;  %v3142_v36 = vmax.f32 %v2990_v7, %v3086_v39  ;;  %v2993_v59 = vpop.xlane.xlu0 %2992  ;;  %v9929_v20 = vadd.f32 %v7248_v22, %v7246_v11  ;;  %3636 = vadd.xlane.f32.xlu0 %v9696_v16  ;;  %v11604_v11 = vld [vmem:[#allocation107_spill] sm:$0xff] }
 0x330   : > { %v3191_v53 = vsub.f32 %v11598_v30, %v3141_v51  ;;  %v3192_v50 = vsub.f32 %v11599_v4, %v3141_v51  ;;  %v3383_v24 = vsub.f32 %v11600_v5, %v3141_v51  ;;  %v7262_v38 = vpop.eup %7261  ;;  %7281 = vpow2.f32 %v3287_v27  ;;  %4133 = vmatmul.mubr.bf16.gmra.mrb[168].mxu0 %v3807_v43  ;;  %v11602_v27 = vld [vmem:[#allocation108_spill] sm:$0xff] }
 0x331   : > { %4397 = vperm.xlu1 %6942, %v9693_v35   ;;  %3971 = vmatprep.mubr.bf16.mxu1 %v3856_v44  ;;  %v3384_v41 = vsub.f32 %v11601_v63, %v3141_v51  ;;  %v7264_v1 = vpop.eup %7263  ;;  %7283 = vpow2.f32 %v3289_v9  ;;  %v3193_v43 = vsub.f32 %v11602_v27, %v3142_v36  ;;  %v11603_v44 = vld [vmem:[#allocation110_spill] sm:$0xff]  ;;  %v2996_v7 = vpop.xlane.xlu1 %2995  ;;  %v3385_v22 = vsub.f32 %v11604_v11, %v3142_v36  ;;  %v11605_v9 = vld [vmem:[#allocation109_spill] sm:$0xff] }
 0x332   : > { %3972 = vmatmul.mubr.bf16.gmra.mrb[168].mxu1 %v3855_v21  ;;  %v3291_v42 = vmul.f32 1.442695, %v3191_v53  ;;  %v3293_v30 = vmul.f32 1.442695, %v3192_v50  ;;  %v3483_v4 = vmul.f32 1.442695, %v3383_v24  ;;  %v9932_v5 = vpop.eup %7265  ;;  %7285 = vpow2.f32 %v3479_v33 }
 0x333   : > { %v3485_v35 = vmul.f32 1.442695, %v3384_v41  ;;  %v3194_v51 = vsub.f32 %v11603_v44, %v3142_v36  ;;  %v9936_v39 = vpop.eup %7267  ;;  %7287 = vpow2.f32 %v3481_v3  ;;  %v3386_v21 = vsub.f32 %v11605_v9, %v3142_v36  ;;  %v3089_v63 = vpop.xlane.xlu0 %3088  ;;  %3546 = vadd.xlane.f32.xlu0 %v9732_v45 }
 0x334   : > { %v3809_v16 = vpack.c.bf16 %v9932_v5, %v9921_v15  ;;  %v9943_v50 = vpop.eup %7269  ;;  %7289 = vpow2.f32 %v3291_v42  ;;  %v3295_v24 = vmul.f32 1.442695, %v3193_v43  ;;  %v3810_v53 = vpack.c.bf16 %v9936_v39, %v7260_v13 }
 0x335   : > { %4999 = vperm.xlu1 %6942, %v9699_v52   ;;  %v3297_v33 = vmul.f32 1.442695, %v3194_v51  ;;  %v9946_v41 = vpop.eup %7271  ;;  %7291 = vpow2.f32 %v3293_v30  ;;  %v3487_v3 = vmul.f32 1.442695, %v3385_v22  ;;  %v3489_v27 = vmul.f32 1.442695, %v3386_v21  ;;  %v3092_v43 = vpop.xlane.xlu1 %3091 }
 0x336   : > { %v3857_v36 = vpack.c.bf16 %v9943_v50, %v7262_v38  ;;  %v9950_v52 = vpop.eup %7273  ;;  %7293 = vpow2.f32 %v3483_v4  ;;  %v3858_v44 = vpack.c.bf16 %v9946_v41, %v7264_v1  ;;  %4140 = vmatprep.mubr.bf16.mxu0 %v3810_v53  ;;  %v3143_v42 = vmax.f32 %v2993_v59, %v3089_v63  ;;  %v11607_v59 = vld [vmem:[#allocation114_spill] sm:$0xff]  ;;  %v11608_v21 = vld [vmem:[#allocation116_spill] sm:$0xff] }
 0x337   : > { %v9955_v51 = vadd.f32 %v9906_v8, %v9904_v61  ;;  %v9957_v11 = vpop.eup %7275  ;;  %7295 = vpow2.f32 %v3485_v35  ;;  %v3144_v30 = vmax.f32 %v2996_v7, %v3092_v43  ;;  %v9961_v45 = vadd.f32 %v7260_v13, %v9921_v15  ;;  %v11609_v8 = vld [vmem:[#allocation113_spill] sm:$0xff]  ;;  %v2999_v63 = vpop.xlane.xlu0 %2998  ;;  %v11611_v15 = vld [vmem:[#allocation118_spill] sm:$0xff]  ;;  %3642 = vadd.xlane.f32.xlu0 %v9752_v6 }
 0x338   : > { %v9963_v22 = vadd.f32 %v7264_v1, %v7262_v38  ;;  %v7278_v4 = vpop.eup %7277  ;;  %7297 = vpow2.f32 %v3295_v24  ;;  %3979 = vmatprep.mubr.bf16.mxu1 %v3858_v44  ;;  %4141 = vmatmul.mubr.bf16.gmra.mrb[172].mxu0 %v3809_v16  ;;  %v3195_v9 = vsub.f32 %v11607_v59, %v3143_v42  ;;  %v3196_v61 = vsub.f32 %v11608_v21, %v3143_v42  ;;  %v11612_v1 = vld [vmem:[#allocation120_spill] sm:$0xff] }
 0x339   : > { %4407 = vperm.xlu1 %6942, %v9718_v28   ;;  %v3387_v53 = vsub.f32 %v11609_v8, %v3143_v42  ;;  %v7280_v35 = vpop.eup %7279  ;;  %7299 = vpow2.f32 %v3297_v33  ;;  %v11610_v28 = vld [vmem:[#allocation115_spill] sm:$0xff]  ;;  %v3197_v13 = vsub.f32 %v11611_v15, %v3144_v30  ;;  %v3198_v38 = vsub.f32 %v11612_v1, %v3144_v30  ;;  %v3002_v59 = vpop.xlane.xlu1 %3001 }
 0x33a   : > { %11606 = vst [vmem:[#allocation7_spill] sm:$0xff] %v9963_v22  ;;  %3980 = vmatmul.mubr.bf16.gmra.mrb[172].mxu1 %v3857_v36  ;;  %v3388_v7 = vsub.f32 %v11610_v28, %v3143_v42  ;;  %v9972_v24 = vpop.eup %7281  ;;  %7301 = vpow2.f32 %v3487_v3  ;;  %v3299_v16 = vmul.f32 1.442695, %v3195_v9  ;;  %v3301_v44 = vmul.f32 1.442695, %v3196_v61  ;;  %v11614_v28 = vld [vmem:[#allocation117_spill] sm:$0xff] }
 0x33b   : > { %v3491_v43 = vmul.f32 1.442695, %v3387_v53  ;;  %v9974_v21 = vpop.eup %7283  ;;  %7303 = vpow2.f32 %v3489_v27  ;;  %v3303_v36 = vmul.f32 1.442695, %v3197_v13  ;;  %v3305_v8 = vmul.f32 1.442695, %v3198_v38  ;;  %v3095_v9 = vpop.xlane.xlu0 %3094  ;;  %3552 = vadd.xlane.f32.xlu0 %v9755_v2 }
 0x33c   : > { %v3493_v33 = vmul.f32 1.442695, %v3388_v7  ;;  %v9976_v42 = vpop.eup %7285  ;;  %7305 = vpow2.f32 %v3299_v16  ;;  %v3389_v15 = vsub.f32 %v11614_v28, %v3144_v30  ;;  %v11615_v1 = vld [vmem:[#allocation119_spill] sm:$0xff]  ;;  %v3812_v3 = vpack.c.bf16 %v9974_v21, %v9957_v11  ;;  %v11620_v2 = vld [vmem:[#allocation125_spill] sm:$0xff] }
 0x33d   : > { %11613 = vst [vmem:[#allocation42_spill] sm:$0xff] %v9976_v42  ;;  %v3390_v6 = vsub.f32 %v11615_v1, %v3144_v30  ;;  %v9982_v61 = vpop.eup %7287  ;;  %7307 = vpow2.f32 %v3301_v44  ;;  %v3859_v53 = vpack.c.bf16 %v9976_v42, %v7278_v4  ;;  %v3811_v27 = vpack.c.bf16 %v9972_v24, %v9950_v52  ;;  %v3098_v28 = vpop.xlane.xlu1 %3097  ;;  %v11617_v44 = vld [vmem:[#allocation124_spill] sm:$0xff]  ;;  %v11619_v42 = vld [vmem:[#allocation123_spill] sm:$0xff] }
 0x33e   : > { %11616 = vst [vmem:[#allocation47_spill] sm:$0xff] %v9982_v61  ;;  %v3145_v7 = vmax.f32 %v2999_v63, %v3095_v9  ;;  %v9988_v13 = vpop.eup %7289  ;;  %7309 = vpow2.f32 %v3491_v43  ;;  %v3495_v38 = vmul.f32 1.442695, %v3389_v15  ;;  %v3860_v16 = vpack.c.bf16 %v9982_v61, %v7280_v35  ;;  %4148 = vmatprep.mubr.bf16.mxu0 %v3812_v3 }
 0x33f   : > { %v3497_v30 = vmul.f32 1.442695, %v3390_v6  ;;  %v9991_v1 = vpop.eup %7291  ;;  %7311 = vpow2.f32 %v3493_v33  ;;  %v3146_v15 = vmax.f32 %v3002_v59, %v3098_v28  ;;  %v3005_v6 = vpop.xlane.xlu0 %3004  ;;  %v9999_v3 = vadd.f32 %v7280_v35, %v7278_v4  ;;  %3648 = vadd.xlane.f32.xlu0 %v9784_v55  ;;  %v11624_v35 = vld [vmem:[#allocation127_spill] sm:$0xff] }
 0x340   : > { %v3199_v34 = vsub.f32 %v11617_v44, %v3145_v7  ;;  %v3200_v22 = vsub.f32 %v11618_v60, %v3145_v7  ;;  %v3391_v63 = vsub.f32 %v11619_v42, %v3145_v7  ;;  %v9996_v9 = vpop.eup %7293  ;;  %7313 = vpow2.f32 %v3303_v36  ;;  %3987 = vmatprep.mubr.bf16.mxu1 %v3860_v16  ;;  %4149 = vmatmul.mubr.bf16.gmra.mrb[176].mxu0 %v3811_v27  ;;  %v11622_v27 = vld [vmem:[#allocation128_spill] sm:$0xff] }
 0x341   : > { %v3392_v43 = vsub.f32 %v11620_v2, %v3145_v7  ;;  %11621 = vst [vmem:[#allocation18_spill] sm:$0xff] %v9999_v3  ;;  %v10001_v61 = vpop.eup %7295  ;;  %7315 = vpow2.f32 %v3305_v8  ;;  %v3201_v16 = vsub.f32 %v11622_v27, %v3146_v15  ;;  %v11623_v7 = vld [vmem:[#allocation130_spill] sm:$0xff]  ;;  %v3008_v28 = vpop.xlane.xlu1 %3007  ;;  %v3393_v8 = vsub.f32 %v11624_v35, %v3146_v15 }
 0x342   : > { %3988 = vmatmul.mubr.bf16.gmra.mrb[176].mxu1 %v3859_v53  ;;  %v3307_v33 = vmul.f32 1.442695, %v3199_v34  ;;  %v3309_v44 = vmul.f32 1.442695, %v3200_v22  ;;  %v3499_v60 = vmul.f32 1.442695, %v3391_v63  ;;  %v10004_v42 = vpop.eup %7297  ;;  %7317 = vpow2.f32 %v3495_v38 }
 0x343   : > { %v3501_v36 = vmul.f32 1.442695, %v3392_v43  ;;  %v3202_v59 = vsub.f32 %v11623_v7, %v3146_v15  ;;  %v10008_v4 = vpop.eup %7299  ;;  %7319 = vpow2.f32 %v3497_v30  ;;  %v11625_v53 = vld [vmem:[#allocation129_spill] sm:$0xff]  ;;  %v3813_v22 = vpack.c.bf16 %v10004_v42, %v9988_v13  ;;  %v3101_v43 = vpop.xlane.xlu0 %3100  ;;  %3558 = vadd.xlane.f32.xlu0 %v9787_v26 }
 0x344   : > { %v3394_v34 = vsub.f32 %v11625_v53, %v3146_v15  ;;  %v10014_v55 = vpop.eup %7301  ;;  %7321 = vpow2.f32 %v3307_v33  ;;  %v3311_v38 = vmul.f32 1.442695, %v3201_v16  ;;  %v3814_v2 = vpack.c.bf16 %v10008_v4, %v9991_v1 }
 0x345   : > { %v3313_v63 = vmul.f32 1.442695, %v3202_v59  ;;  %v10018_v27 = vpop.eup %7303  ;;  %7323 = vpow2.f32 %v3309_v44  ;;  %v3503_v30 = vmul.f32 1.442695, %v3393_v8  ;;  %v3861_v15 = vpack.c.bf16 %v10014_v55, %v9996_v9  ;;  %v3104_v59 = vpop.xlane.xlu1 %3103 }
 0x346   : > { %v3505_v7 = vmul.f32 1.442695, %v3394_v34  ;;  %v10023_v35 = vpop.eup %7305  ;;  %7325 = vpow2.f32 %v3499_v60  ;;  %v3862_v33 = vpack.c.bf16 %v10018_v27, %v10001_v61  ;;  %4156 = vmatprep.mubr.bf16.mxu0 %v3814_v2  ;;  %v3147_v16 = vmax.f32 %v3005_v6, %v3101_v43  ;;  %v11630_v6 = vld [vmem:[#allocation134_spill] sm:$0xff]  ;;  %v11632_v43 = vld [vmem:[#allocation133_spill] sm:$0xff] }
 0x347   : > { %v10029_v53 = vadd.f32 %v9773_v48, %v9770_v14  ;;  %v10031_v44 = vpop.eup %7307  ;;  %7327 = vpow2.f32 %v3501_v36  ;;  %v3148_v8 = vmax.f32 %v3008_v28, %v3104_v59  ;;  %v10035_v26 = vadd.f32 %v9974_v21, %v9972_v24  ;;  %v11631_v48 = vld [vmem:[#allocation136_spill] sm:$0xff]  ;;  %v3011_v28 = vpop.xlane.xlu0 %3010  ;;  %v11633_v24 = vld [vmem:[#allocation135_spill] sm:$0xff]  ;;  %3654 = vadd.xlane.f32.xlu0 %v9820_v46 }
 0x348   : > { %11627 = vst [vmem:[#allocation55_spill] sm:$0xff] %v10031_v44  ;;  %v10039_v60 = vadd.f32 %v9801_v17, %v9796_v32  ;;  %v10041_v34 = vpop.eup %7309  ;;  %7329 = vpow2.f32 %v3311_v38  ;;  %3995 = vmatprep.mubr.bf16.mxu1 %v3862_v33  ;;  %4157 = vmatmul.mubr.bf16.gmra.mrb[180].mxu0 %v3813_v22  ;;  %v3203_v14 = vsub.f32 %v11630_v6, %v3147_v16  ;;  %v11634_v32 = vld [vmem:[#allocation138_spill] sm:$0xff] }
 0x349   : > { %11626 = vst [vmem:[#allocation63_spill] sm:$0xff] %v10029_v53  ;;  %11628 = vst [vmem:[#allocation58_spill] sm:$0xff] %v10035_v26  ;;  %v3204_v2 = vsub.f32 %v11631_v48, %v3147_v16  ;;  %v3395_v36 = vsub.f32 %v11632_v43, %v3147_v16  ;;  %v10046_v59 = vpop.eup %7311  ;;  %7331 = vpow2.f32 %v3313_v63  ;;  %v3396_v21 = vsub.f32 %v11633_v24, %v3147_v16  ;;  %v3014_v48 = vpop.xlane.xlu1 %3013  ;;  %v11637_v24 = vld [vmem:[#allocation137_spill] sm:$0xff] }
 0x34a   : > { %11629 = vst [vmem:[#allocation62_spill] sm:$0xff] %v10039_v60  ;;  %3996 = vmatmul.mubr.bf16.gmra.mrb[180].mxu1 %v3861_v15  ;;  %v3205_v17 = vsub.f32 %v11634_v32, %v3148_v8  ;;  %v11635_v60 = vld [vmem:[#allocation140_spill] sm:$0xff]  ;;  %v10052_v22 = vpop.eup %7313  ;;  %7333 = vpow2.f32 %v3503_v30  ;;  %v3315_v38 = vmul.f32 1.442695, %v3203_v14  ;;  %v11638_v32 = vld [vmem:[#allocation139_spill] sm:$0xff] }
 0x34b   : > { %v3206_v26 = vsub.f32 %v11635_v60, %v3148_v8  ;;  %v3317_v33 = vmul.f32 1.442695, %v3204_v2  ;;  %v3507_v6 = vmul.f32 1.442695, %v3395_v36  ;;  %v10054_v43 = vpop.eup %7315  ;;  %7335 = vpow2.f32 %v3505_v7  ;;  %v3107_v14 = vpop.xlane.xlu0 %3106  ;;  %3564 = vadd.xlane.f32.xlu0 %v9864_v10 }
 0x34c   : > { %v3509_v63 = vmul.f32 1.442695, %v3396_v21  ;;  %v3319_v15 = vmul.f32 1.442695, %v3205_v17  ;;  %v10056_v16 = vpop.eup %7317  ;;  %7337 = vpow2.f32 %v3315_v38  ;;  %v3397_v60 = vsub.f32 %v11637_v24, %v3148_v8 }
 0x34d   : > { %v3321_v53 = vmul.f32 1.442695, %v3206_v26  ;;  %11636 = vst [vmem:[#allocation3_spill] sm:$0xff] %v10056_v16  ;;  %v3398_v46 = vsub.f32 %v11638_v32, %v3148_v8  ;;  %v3816_v30 = vpack.c.bf16 %v10054_v43, %v10031_v44  ;;  %v10062_v2 = vpop.eup %7319  ;;  %7339 = vpow2.f32 %v3317_v33  ;;  %v3110_v24 = vpop.xlane.xlu1 %3109  ;;  %v11640_v32 = vld [vmem:[#allocation144_spill] sm:$0xff] }
 0x34e   : > { %11639 = vst [vmem:[#allocation65_spill] sm:$0xff] %v10062_v2  ;;  %v3863_v7 = vpack.c.bf16 %v10056_v16, %v10041_v34  ;;  %v3815_v26 = vpack.c.bf16 %v10052_v22, %v10023_v35  ;;  %v3149_v36 = vmax.f32 %v3011_v28, %v3107_v14  ;;  %v10069_v21 = vpop.eup %7321  ;;  %7341 = vpow2.f32 %v3507_v6  ;;  %v11641_v16 = vld [vmem:[#allocation146_spill] sm:$0xff]  ;;  %v11642_v28 = vld [vmem:[#allocation143_spill] sm:$0xff]  ;;  %v11643_v6 = vld [vmem:[#allocation145_spill] sm:$0xff] }
 0x34f   : > { %v3511_v8 = vmul.f32 1.442695, %v3397_v60  ;;  %v3513_v17 = vmul.f32 1.442695, %v3398_v46  ;;  %v3864_v38 = vpack.c.bf16 %v10062_v2, %v10046_v59  ;;  %4164 = vmatprep.mubr.bf16.mxu0 %v3816_v30  ;;  %v10073_v33 = vpop.eup %7323  ;;  %7343 = vpow2.f32 %v3509_v63  ;;  %v3017_v2 = vpop.xlane.xlu0 %3016  ;;  %3660 = vadd.xlane.f32.xlu0 %v9888_v47 }
 0x350   : > { %v3207_v3 = vsub.f32 %v11640_v32, %v3149_v36  ;;  %v3208_v44 = vsub.f32 %v11641_v16, %v3149_v36  ;;  %v3399_v14 = vsub.f32 %v11642_v28, %v3149_v36  ;;  %v10078_v10 = vpop.eup %7325  ;;  %7345 = vpow2.f32 %v3319_v15  ;;  %4165 = vmatmul.mubr.bf16.gmra.mrb[184].mxu0 %v3815_v26 }
 0x351   : > { %4003 = vmatprep.mubr.bf16.mxu1 %v3864_v38  ;;  %v3400_v60 = vsub.f32 %v11643_v6, %v3149_v36  ;;  %v3150_v46 = vmax.f32 %v3014_v48, %v3110_v24  ;;  %v10083_v30 = vadd.f32 %v9991_v1, %v9988_v13  ;;  %v10085_v63 = vpop.eup %7327  ;;  %7347 = vpow2.f32 %v3321_v53  ;;  %v11645_v36 = vld [vmem:[#allocation148_spill] sm:$0xff]  ;;  %v11646_v38 = vld [vmem:[#allocation150_spill] sm:$0xff]  ;;  %v3020_v6 = vpop.xlane.xlu1 %3019 }
 0x352   : > { %4004 = vmatmul.mubr.bf16.gmra.mrb[184].mxu1 %v3863_v7  ;;  %v3323_v16 = vmul.f32 1.442695, %v3207_v3  ;;  %v3325_v32 = vmul.f32 1.442695, %v3208_v44  ;;  %v3515_v28 = vmul.f32 1.442695, %v3399_v14  ;;  %v10088_v15 = vpop.eup %7329  ;;  %7349 = vpow2.f32 %v3511_v8 }
 0x353   : > { %11644 = vst [vmem:[#allocation64_spill] sm:$0xff] %v10083_v30  ;;  %v3517_v26 = vmul.f32 1.442695, %v3400_v60  ;;  %v3209_v48 = vsub.f32 %v11645_v36, %v3150_v46  ;;  %v3210_v24 = vsub.f32 %v11646_v38, %v3150_v46  ;;  %v6949_v13 = vld [vmem:[%s11014_s10] sm:$0xff]   ;;  %v10095_v1 = vpop.eup %7331  ;;  %7351 = vpow2.f32 %v3513_v17  ;;  %v11648_v3 = vld [vmem:[#allocation147_spill] sm:$0xff]  ;;  %v11649_v44 = vld [vmem:[#allocation149_spill] sm:$0xff]  ;;  %v3113_v36 = vpop.xlane.xlu0 %3112  ;;  %3570 = vadd.xlane.f32.xlu0 %v9894_v57 }
 0x354   : > { %11647 = vst [vmem:[#allocation50_spill] sm:$0xff] %v10095_v1  ;;  %v3401_v53 = vsub.f32 %v11648_v3, %v3150_v46  ;;  %v3402_v47 = vsub.f32 %v11649_v44, %v3150_v46  ;;  %v3817_v7 = vpack.c.bf16 %v10088_v15, %v10069_v21  ;;  %v10101_v8 = vpop.eup %7333  ;;  %7353 = vpow2.f32 %v3323_v16  ;;  %6704 = vmatprep.subr.bf16.mxu1 %v6949_v13 }
 0x355   : > { %v3327_v14 = vmul.f32 1.442695, %v3209_v48  ;;  %v3818_v60 = vpack.c.bf16 %v10095_v1, %v10073_v33  ;;  %6776 = vmatprep.subr.bf16.mxu0 %v6949_v13  ;;  %v10105_v38 = vpop.eup %7335  ;;  %7355 = vpow2.f32 %v3325_v32  ;;  %v3329_v17 = vmul.f32 1.442695, %v3210_v24  ;;  %6705 = vmatpush3.bf16.msra.mxu1 %v6949_v13  ;;  %v3116_v1 = vpop.xlane.xlu1 %3115 }
 0x356   : > { %11650 = vst [vmem:[#allocation66_spill] sm:$0xff] %v10105_v38  ;;  %v3519_v3 = vmul.f32 1.442695, %v3401_v53  ;;  %v3865_v46 = vpack.c.bf16 %v10101_v8, %v10078_v10  ;;  %v10110_v44 = vpop.eup %7337  ;;  %7357 = vpow2.f32 %v3515_v28  ;;  %v3521_v16 = vmul.f32 1.442695, %v3402_v47  ;;  %6777 = vmatpush3.bf16.msra.mxu0 %v6949_v13  ;;  %v11655_v13 = vld [vmem:[#allocation156_spill] sm:$0xff] }
 0x357   : > { %v3866_v48 = vpack.c.bf16 %v10105_v38, %v10085_v63  ;;  %4172 = vmatprep.mubr.bf16.mxu0 %v3818_v60  ;;  %v3151_v30 = vmax.f32 %v3017_v2, %v3113_v36  ;;  %v10114_v32 = vpop.eup %7339  ;;  %7359 = vpow2.f32 %v3517_v26  ;;  %v3152_v24 = vmax.f32 %v3020_v6, %v3116_v1  ;;  %v11654_v2 = vld [vmem:[#allocation154_spill] sm:$0xff]  ;;  %v11656_v36 = vld [vmem:[#allocation153_spill] sm:$0xff]  ;;  %v3023_v6 = vpop.xlane.xlu0 %3022  ;;  %3666 = vadd.xlane.f32.xlu0 %v9896_v31  ;;  %v11662_v31 = vld [vmem:[#allocation159_spill] sm:$0xff] }
 0x358   : > { %11651 = vst [vmem:[#allocation43_spill] sm:$0xff] %v10114_v32  ;;  %v10118_v53 = vadd.f32 %v10001_v61, %v9996_v9  ;;  %v10122_v57 = vadd.f32 %v9838_v40, %v9836_v19  ;;  %v10124_v28 = vpop.eup %7341  ;;  %7361 = vpow2.f32 %v3327_v14  ;;  %4173 = vmatmul.mubr.bf16.gmra.mrb[188].mxu0 %v3817_v7  ;;  %v11657_v61 = vld [vmem:[#allocation155_spill] sm:$0xff]  ;;  %v11658_v19 = vld [vmem:[#allocation158_spill] sm:$0xff] }
 0x359   : > { %4011 = vmatprep.mubr.bf16.mxu1 %v3866_v48  ;;  %v3211_v47 = vsub.f32 %v11654_v2, %v3151_v30  ;;  %v3212_v60 = vsub.f32 %v11655_v13, %v3151_v30  ;;  %v3403_v26 = vsub.f32 %v11656_v36, %v3151_v30  ;;  %v10129_v1 = vpop.eup %7343  ;;  %7363 = vpow2.f32 %v3329_v17 }
 0x35a   : > { %11652 = vst [vmem:[#allocation48_spill] sm:$0xff] %v10118_v53  ;;  %11653 = vst [vmem:[#allocation68_spill] sm:$0xff] %v10122_v57  ;;  %4012 = vmatmul.mubr.bf16.gmra.mrb[188].mxu1 %v3865_v46  ;;  %v3404_v9 = vsub.f32 %v11657_v61, %v3151_v30  ;;  %v3213_v40 = vsub.f32 %v11658_v19, %v3152_v24  ;;  %v11659_v57 = vld [vmem:[#allocation160_spill] sm:$0xff]  ;;  %v10135_v7 = vpop.eup %7345  ;;  %7365 = vpow2.f32 %v3519_v3 }
 0x35b   : > { %v3214_v53 = vsub.f32 %v11659_v57, %v3152_v24  ;;  %v3331_v14 = vmul.f32 1.442695, %v3211_v47  ;;  %v3333_v48 = vmul.f32 1.442695, %v3212_v60  ;;  %v3523_v2 = vmul.f32 1.442695, %v3403_v26  ;;  %v10137_v13 = vpop.eup %7347  ;;  %v3119_v47 = vpop.xlane.xlu0 %3118  ;;  %3672 = vadd.xlane.f32.xlu0 %v9929_v20 }
 0x35c   : > { %7367 = vpow2.f32 %v3521_v16  ;;  %v3525_v36 = vmul.f32 1.442695, %v3404_v9  ;;  %v3335_v17 = vmul.f32 1.442695, %v3213_v40  ;;  %v10140_v30 = vpop.eup %7349  ;;  %v11661_v57 = vld [vmem:[#allocation157_spill] sm:$0xff]  ;;  %v3406_v19 = vsub.f32 %v11662_v31, %v3152_v24  ;;  %v11664_v31 = vld [vmem:[#allocation166_spill] sm:$0xff] }
 0x35d   : > { %v3337_v46 = vmul.f32 1.442695, %v3214_v53  ;;  %3543 = vadd.xlane.f32.xlu1 %v9723_v62  ;;  %11660 = vst [vmem:[#allocation70_spill] sm:$0xff] %v10140_v30  ;;  %7369 = vpow2.f32 %v3331_v14  ;;  %v3405_v61 = vsub.f32 %v11661_v57, %v3152_v24  ;;  %v3820_v3 = vpack.c.bf16 %v10137_v13, %v10114_v32  ;;  %v10146_v60 = vpop.eup %7351  ;;  %v11665_v32 = vld [vmem:[#allocation163_spill] sm:$0xff] }
 0x35e   : > { %7371 = vpow2.f32 %v3333_v48  ;;  %v3867_v16 = vpack.c.bf16 %v10140_v30, %v10124_v28  ;;  %v3819_v62 = vpack.c.bf16 %v10135_v7, %v10110_v44  ;;  %v3153_v53 = vmax.f32 %v3023_v6, %v3119_v47  ;;  %v7354_v26 = vpop.eup %7353  ;;  %v11663_v48 = vld [vmem:[#allocation164_spill] sm:$0xff]  ;;  %v11666_v6 = vld [vmem:[#allocation165_spill] sm:$0xff] }
 0x35f   : > { %7373 = vpow2.f32 %v3523_v2  ;;  %v3527_v9 = vmul.f32 1.442695, %v3405_v61  ;;  %v3529_v24 = vmul.f32 1.442695, %v3406_v19  ;;  %v3868_v40 = vpack.c.bf16 %v10146_v60, %v10129_v1  ;;  %4180 = vmatprep.mubr.bf16.mxu0 %v3820_v3  ;;  %v7356_v14 = vpop.eup %7355  ;;  %3579 = vadd.xlane.f32.xlu0 %v9955_v51 }
 0x360   : > { %7375 = vpow2.f32 %v3525_v36  ;;  %v3215_v57 = vsub.f32 %v11663_v48, %v3153_v53  ;;  %v3216_v30 = vsub.f32 %v11664_v31, %v3153_v53  ;;  %v3407_v38 = vsub.f32 %v11665_v32, %v3153_v53  ;;  %v7358_v20 = vpop.eup %7357  ;;  %4181 = vmatmul.mubr.bf16.gmra.mrb[192].mxu0 %v3819_v62 }
 0x361   : > { %3639 = vadd.xlane.f32.xlu1 %v9725_v58  ;;  %7377 = vpow2.f32 %v3335_v17  ;;  %4019 = vmatprep.mubr.bf16.mxu1 %v3868_v40  ;;  %v3408_v2 = vsub.f32 %v11666_v6, %v3153_v53  ;;  %v10162_v61 = vadd.f32 %v10046_v59, %v10041_v34  ;;  %v7360_v19 = vpop.eup %7359  ;;  %v10167_v17 = vadd.f32 %v10054_v43, %v10052_v22  ;;  %v11676_v40 = vld [vmem:[#allocation2_spill] sm:$0xff] }
 0x362   : > { %7379 = vpow2.f32 %v3337_v46  ;;  %4020 = vmatmul.mubr.bf16.gmra.mrb[192].mxu1 %v3867_v16  ;;  %v3339_v36 = vmul.f32 1.442695, %v3215_v57  ;;  %v3341_v3 = vmul.f32 1.442695, %v3216_v30  ;;  %v3531_v47 = vmul.f32 1.442695, %v3407_v38  ;;  %v7362_v32 = vpop.eup %7361 }
 0x363   : > { %7381 = vpow2.f32 %v3527_v9  ;;  %v3533_v58 = vmul.f32 1.442695, %v3408_v2  ;;  %v10171_v62 = vadd.f32 %v9870_v0, %v9866_v37  ;;  %v7364_v34 = vpop.eup %7363  ;;  %v3821_v59 = vpack.c.bf16 %v7362_v32, %v7354_v26  ;;  %3582 = vadd.xlane.f32.xlu0 %v9961_v45  ;;  %v11672_v30 = vld [vmem:[#allocation65_spill] sm:$0xff]  ;;  %v11674_v9 = vld [vmem:[#allocation66_spill] sm:$0xff] }
 0x364   : > { %7383 = vpow2.f32 %v3529_v24  ;;  %v10176_v38 = vadd.f32 %v10073_v33, %v10069_v21  ;;  %v10180_v51 = vadd.f32 %v9880_v29, %v9877_v54  ;;  %v7366_v46 = vpop.eup %7365  ;;  %v3822_v22 = vpack.c.bf16 %v7364_v34, %v7356_v14  ;;  %v11677_v48 = vld [vmem:[#allocation70_spill] sm:$0xff] }
 0x365   : > { %3549 = vadd.xlane.f32.xlu1 %v9757_v56  ;;  %7385 = vpow2.f32 %v3339_v36  ;;  %v10184_v37 = vadd.f32 %v10085_v63, %v10078_v10  ;;  %v10188_v0 = vadd.f32 %v9890_v12, %v9883_v25  ;;  %v3869_v43 = vpack.c.bf16 %v7366_v46, %v7358_v20  ;;  %v11678_v36 = vld [vmem:[#allocation18_spill] sm:$0xff] }
 0x366   : > { %v7368_v56 = vpop.eup %7367  ;;  %7387 = vpow2.f32 %v3341_v3  ;;  %v10193_v54 = vadd.f32 %v10129_v1, %v10124_v28  ;;  %v10197_v29 = vadd.f32 %v9916_v49, %v9909_v23  ;;  %4188 = vmatprep.mubr.bf16.mxu0 %v3822_v22  ;;  %v10201_v25 = vadd.f32 %v10137_v13, %v10135_v7  ;;  %v11670_v13 = vld [vmem:[#allocation55_spill] sm:$0xff]  ;;  %v11680_v22 = vld [vmem:[#allocation58_spill] sm:$0xff] }
 0x367   : > { %v7370_v21 = vpop.eup %7369  ;;  %7389 = vpow2.f32 %v3531_v47  ;;  %v3870_v33 = vpack.c.bf16 %v7368_v56, %v7360_v19  ;;  %v10205_v12 = vadd.f32 %v9936_v39, %v9932_v5  ;;  %v10208_v10 = vadd.f32 %v7356_v14, %v7354_v26  ;;  %v11667_v5 = vld [vmem:[#allocation42_spill] sm:$0xff]  ;;  %v11668_v39 = vld [vmem:[#allocation47_spill] sm:$0xff] }
 0x368   : > { %v7372_v45 = vpop.eup %7371  ;;  %7391 = vpow2.f32 %v3533_v58  ;;  %v10212_v23 = vadd.f32 %v9946_v41, %v9943_v50  ;;  %v10214_v49 = vadd.f32 %v7360_v19, %v7358_v20  ;;  %4189 = vmatmul.mubr.bf16.gmra.mrb[196].mxu0 %v3821_v59  ;;  %v10218_v28 = vadd.f32 %v9957_v11, %v9950_v52  ;;  %v11669_v50 = vld [vmem:[#allocation7_spill] sm:$0xff] }
 0x369   : > { %3645 = vadd.xlane.f32.xlu1 %v9791_v18  ;;  %v7374_v63 = vpop.eup %7373  ;;  %4027 = vmatprep.mubr.bf16.mxu1 %v3870_v33  ;;  %v10222_v1 = vadd.f32 %v11668_v39, %v11667_v5  ;;  %v10226_v18 = vadd.f32 %v10008_v4, %v10004_v42  ;;  %v10231_v41 = vadd.f32 %v10018_v27, %v10014_v55  ;;  %v11671_v11 = vld [vmem:[#allocation3_spill] sm:$0xff]  ;;  %v11673_v42 = vld [vmem:[#allocation50_spill] sm:$0xff]  ;;  %v11683_v33 = vld [vmem:[#allocation57_spill] sm:$0xff]  ;;  %v10293_v5 = vpop.permute.xlu0 %4357 }
 0x36a   : > { %v7376_v7 = vpop.eup %7375  ;;  %4028 = vmatmul.mubr.bf16.gmra.mrb[196].mxu1 %v3869_v43  ;;  %3678 = vadd.xlane.f32.xlu0 %v11669_v50  ;;  %v10235_v52 = vadd.f32 %v11670_v13, %v10023_v35  ;;  %v10239_v16 = vadd.f32 %v11672_v30, %v11671_v11  ;;  %v10245_v4 = vadd.f32 %v11673_v42, %v10088_v15  ;;  %v11675_v55 = vld [vmem:[#allocation43_spill] sm:$0xff]  ;;  %v11681_v43 = vld [vmem:[#allocation62_spill] sm:$0xff]  ;;  %v11685_v39 = vld [vmem:[#allocation48_spill] sm:$0xff]  ;;  %v10307_v42 = vpop.permute.xlu1 %4362 }
 0x36b   : > { %v7378_v53 = vpop.eup %7377  ;;  %v10241_v26 = vadd.f32 %v7376_v7, %v7374_v63  ;;  %v10249_v24 = vadd.f32 %v11674_v9, %v10101_v8  ;;  %v10253_v27 = vadd.f32 %v11675_v55, %v10110_v44  ;;  %v10258_v57 = vadd.f32 %v10146_v60, %v11677_v48  ;;  %v11679_v58 = vld [vmem:[#allocation63_spill] sm:$0xff]  ;;  %v11687_v50 = vld [vmem:[#allocation21_spill] sm:$0xff] }
 0x36c   : > { %v7380_v35 = vpop.eup %7379  ;;  %v3823_v14 = vpack.c.bf16 %v7378_v53, %v7370_v21  ;;  %v10260_v31 = vadd.f32 %v7364_v34, %v7362_v32  ;;  %v10264_v8 = vadd.f32 %v7368_v56, %v7366_v46  ;;  %v10266_v2 = vadd.f32 %v7372_v45, %v7370_v21  ;;  %v11682_v21 = vld [vmem:[#allocation64_spill] sm:$0xff]  ;;  %v11688_v13 = vld [vmem:[#allocation49_spill] sm:$0xff]  ;;  %v11690_v55 = vld [vmem:[#allocation171_spill] sm:$0xff] }
 0x36d   : > { %3555 = vadd.xlane.f32.xlu1 %v11676_v40  ;;  %v7382_v15 = vpop.eup %7381  ;;  %v3824_v20 = vpack.c.bf16 %v7380_v35, %v7372_v45  ;;  %v10262_v6 = vadd.f32 %v7380_v35, %v7378_v53  ;;  %v11684_v45 = vld [vmem:[#allocation44_spill] sm:$0xff]  ;;  %v3662_v11 = vadd.f32 %v11688_v13, %v11687_v50  ;;  %v10300_v30 = vpop.permute.xlu0 %4964  ;;  %v11691_v40 = vld [vmem:[#allocation167_spill] sm:$0xff]  ;;  %v11692_v48 = vld [vmem:[#allocation169_spill] sm:$0xff] }
 0x36e   : > { %v7384_v44 = vpop.eup %7383  ;;  %v3871_v19 = vpack.c.bf16 %v7382_v15, %v7374_v63  ;;  %3684 = vadd.xlane.f32.xlu0 %v11678_v36  ;;  %v3656_v63 = vadd.f32 %v11684_v45, %v11683_v33 }
 0x36f   : > { %v10269_v3 = vpop.eup %7385  ;;  %v3872_v47 = vpack.c.bf16 %v7384_v44, %v7376_v7  ;;  %4196 = vmatprep.mubr.bf16.mxu0 %v3824_v20  ;;  %v10271_v60 = vadd.f32 %v7384_v44, %v7382_v15  ;;  %v11686_v7 = vld [vmem:[#allocation68_spill] sm:$0xff] }
 0x370   : > { %v10273_v32 = vpop.eup %7387  ;;  %4197 = vmatmul.mubr.bf16.gmra.mrb[200].mxu0 %v3823_v14 }
 0x371   : > { %3651 = vadd.xlane.f32.xlu1 %v11679_v58  ;;  %v10276_v34 = vpop.eup %7389  ;;  %4035 = vmatprep.mubr.bf16.mxu1 %v3872_v47  ;;  %v10280_v59 = vadd.f32 %v10273_v32, %v10269_v3  ;;  %v10304_v53 = vpop.permute.xlu0 %4372 }
 0x372   : > { %v10282_v46 = vpop.eup %7391  ;;  %4036 = vmatmul.mubr.bf16.gmra.mrb[200].mxu1 %v3871_v19  ;;  %3591 = vadd.xlane.f32.xlu0 %v11680_v22 }
 0x373   : > { %v10287_v56 = vadd.f32 %v10282_v46, %v10276_v34 }
 0x375   : > { %3561 = vadd.xlane.f32.xlu1 %v11681_v43 }
 0x376   : > { %3594 = vadd.xlane.f32.xlu0 %v11682_v21 }
 0x379   : > { %3657 = vadd.xlane.f32.xlu1 %v3656_v63 }
 0x37a   : > { %3690 = vadd.xlane.f32.xlu0 %v11685_v39 }
 0x37d   : > { %3567 = vadd.xlane.f32.xlu1 %v11686_v7 }
 0x37e   : > { %3696 = vadd.xlane.f32.xlu0 %v10162_v61  ;;  %v10311_v61 = vpop.permute.xlu0 %4974 }
 0x381   : > { %3663 = vadd.xlane.f32.xlu1 %v3662_v11 }
 0x382   : > { %3603 = vadd.xlane.f32.xlu0 %v10167_v17  ;;  %v6950_v17 = vld [vmem:[%s11014_s10 + $0x8] sm:$0xff]  }
 0x383   : > { %6706 = vmatprep.subr.bf16.mxu1 %v6950_v17  ;;  %6778 = vmatprep.subr.bf16.mxu0 %v6950_v17 }
 0x384   : > { %6707 = vmatpush3.bf16.msra.mxu1 %v6950_v17  ;;  %6779 = vmatpush3.bf16.msra.mxu0 %v6950_v17 }
 0x385   : > { %3573 = vadd.xlane.f32.xlu1 %v10171_v62 }
 0x386   : > { %3606 = vadd.xlane.f32.xlu0 %v10176_v38 }
 0x389   : > { %3669 = vadd.xlane.f32.xlu1 %v10180_v51  ;;  %v10319_v51 = vpop.permute.xlu0 %4382 }
 0x38a   : > { %3702 = vadd.xlane.f32.xlu0 %v10184_v37  ;;  %v11689_v37 = vld [vmem:[#allocation168_spill] sm:$0xff] }
 0x38c   : > { %v3026_v9 = vpop.xlane.xlu1 %3025 }
 0x38d   : > { %3576 = vadd.xlane.f32.xlu1 %v10188_v0  ;;  %v10328_v19 = vpop.permute.xlu0 %4984 }
 0x38e   : > { %3708 = vadd.xlane.f32.xlu0 %v10193_v54 }
 0x391   : > { %3675 = vadd.xlane.f32.xlu1 %v10197_v29  ;;  %v3122_v62 = vpop.xlane.xlu1 %3121 }
 0x392   : > { %v3154_v38 = vmax.f32 %v3026_v9, %v3122_v62  ;;  %3615 = vadd.xlane.f32.xlu0 %v10201_v25  ;;  %v10333_v25 = vpop.permute.xlu0 %4392 }
 0x394   : > { %v3217_v0 = vsub.f32 %v11689_v37, %v3154_v38  ;;  %v3218_v35 = vsub.f32 %v11690_v55, %v3154_v38  ;;  %v3409_v14 = vsub.f32 %v11691_v40, %v3154_v38  ;;  %v3410_v54 = vsub.f32 %v11692_v48, %v3154_v38  ;;  %v10399_v37 = vld [vmem:[%s11013_s9] sm:$0xff]  }
 0x395   : > { %3585 = vadd.xlane.f32.xlu1 %v10205_v12  ;;  %6740 = vmatprep.subr.bf16.mxu1 %v10399_v37 }
 0x396   : > { %v3343_v15 = vmul.f32 1.442695, %v3217_v0  ;;  %v3345_v20 = vmul.f32 1.442695, %v3218_v35  ;;  %v3535_v29 = vmul.f32 1.442695, %v3409_v14  ;;  %3618 = vadd.xlane.f32.xlu0 %v10208_v10  ;;  %6812 = vmatprep.subr.bf16.mxu0 %v10399_v37 }
 0x397   : > { %v3537_v44 = vmul.f32 1.442695, %v3410_v54 }
 0x398   : > { %7393 = vpow2.f32 %v3343_v15 }
 0x399   : > { %7395 = vpow2.f32 %v3345_v20  ;;  %3681 = vadd.xlane.f32.xlu1 %v10212_v23 }
 0x39a   : > { %7397 = vpow2.f32 %v3535_v29  ;;  %3714 = vadd.xlane.f32.xlu0 %v10214_v49  ;;  %v10340_v49 = vpop.permute.xlu0 %4994 }
 0x39b   : > { %7399 = vpow2.f32 %v3537_v44 }
 0x39d   : > { %3588 = vadd.xlane.f32.xlu1 %v10218_v28 }
 0x39e   : > { %3720 = vadd.xlane.f32.xlu0 %v10241_v26 }
 0x3a1   : > { %3687 = vadd.xlane.f32.xlu1 %v10222_v1 }
 0x3a2   : > { %v7394_v12 = vpop.eup %7393  ;;  %3627 = vadd.xlane.f32.xlu0 %v10262_v6  ;;  %v10347_v6 = vpop.permute.xlu0 %4402 }
 0x3a3   : > { %v7396_v10 = vpop.eup %7395  ;;  %v3825_v36 = vpack.c.bf16 %v7394_v12, %v10269_v3  ;;  %v10349_v3 = vpop.permute.xlu1 %4959 }
 0x3a4   : > { %v7398_v47 = vpop.eup %7397  ;;  %v3826_v23 = vpack.c.bf16 %v7396_v10, %v10273_v32  ;;  %v3632_v58 = vadd.f32 %v7396_v10, %v7394_v12 }
 0x3a5   : > { %v7400_v22 = vpop.eup %7399  ;;  %3597 = vadd.xlane.f32.xlu1 %v10226_v18  ;;  %v3873_v28 = vpack.c.bf16 %v7398_v47, %v10276_v34 }
 0x3a6   : > { %v3874_v26 = vpack.c.bf16 %v7400_v22, %v10282_v46  ;;  %4204 = vmatprep.mubr.bf16.mxu0 %v3826_v23  ;;  %v3728_v1 = vadd.f32 %v7400_v22, %v7398_v47  ;;  %3630 = vadd.xlane.f32.xlu0 %v10280_v59  ;;  %v10353_v18 = vpop.permute.xlu0 %5004 }
 0x3a7   : > { %4205 = vmatmul.mubr.bf16.gmra.mrb[204].mxu0 %v3825_v36  ;;  %11693 = vst [vmem:[#allocation67_spill] sm:$0xff] %v10353_v18  ;;  %v10355_v32 = vpop.permute.xlu1 %4367 }
 0x3a8   : > { %4043 = vmatprep.mubr.bf16.mxu1 %v3874_v26 }
 0x3a9   : > { %4044 = vmatmul.mubr.bf16.gmra.mrb[204].mxu1 %v3873_v28  ;;  %3693 = vadd.xlane.f32.xlu1 %v10231_v41 }
 0x3aa   : > { %3726 = vadd.xlane.f32.xlu0 %v10287_v56  ;;  %v10359_v34 = vpop.permute.xlu0 %4412  ;;  %v11696_v56 = vld [vmem:[#allocation180_spill] sm:$0xff] }
 0x3ab   : > { %11694 = vst [vmem:[#allocation69_spill] sm:$0xff] %v10359_v34  ;;  %v10361_v59 = vpop.permute.xlu1 %4969 }
 0x3ad   : > { %3600 = vadd.xlane.f32.xlu1 %v10235_v52  ;;  %v11695_v52 = vld [vmem:[#allocation176_spill] sm:$0xff] }
 0x3ae   : > { %v1067_v43 = vmul.f32 %v11696_v56, %v11695_v52 }
 0x3af   : > { %v10366_v46 = vpop.permute.xlu1 %4377 }
 0x3b1   : > { %3699 = vadd.xlane.f32.xlu1 %v10239_v16 }
 0x3b3   : > { %v10374_v16 = vpop.permute.xlu1 %4979 }
 0x3b5   : > { %3609 = vadd.xlane.f32.xlu1 %v10245_v4 }
 0x3b7   : > { %v10381_v33 = vpop.permute.xlu1 %4387 }
 0x3b8   : > { %v10364_v41 = vpop.xlane.xlu0 %3540 }
 0x3b9   : > { %3705 = vadd.xlane.f32.xlu1 %v10249_v24 }
 0x3bb   : > { %v10387_v45 = vpop.permute.xlu1 %4989 }
 0x3bc   : > { %v10371_v21 = vpop.xlane.xlu0 %3636 }
 0x3bd   : > { %3612 = vadd.xlane.f32.xlu1 %v10253_v27 }
 0x3c0   : > { %5014 = vperm.xlu0 %6941, %v1067_v43   ;;  %v10376_v4 = vpop.xlane.xlu0 %3546 }
 0x3c1   : > { %3711 = vadd.xlane.f32.xlu1 %v10258_v57 }
 0x3c4   : > { %v10379_v24 = vpop.xlane.xlu0 %3642 }
 0x3c5   : > { %3621 = vadd.xlane.f32.xlu1 %v10260_v31 }
 0x3c8   : > { %v10384_v27 = vpop.xlane.xlu0 %3552 }
 0x3c9   : > { %3717 = vadd.xlane.f32.xlu1 %v10264_v8 }
 0x3cc   : > { %v10389_v57 = vpop.xlane.xlu0 %3648 }
 0x3cd   : > { %3624 = vadd.xlane.f32.xlu1 %v10266_v2  ;;  %v6356_v63 = vpop.f32.mrb[144].mxu0  ;;  %v10394_v2 = vpop.permute.xlu1 %4397 }
 0x3ce   : > { %v6357_v39 = vpop.f32.mrb[145].mxu0 }
 0x3cf   : > { %v6358_v7 = vadd.f32 %v6357_v39, %v6356_v63  ;;  %v6359_v31 = vpop.f32.mrb[146].mxu0  ;;  %v11699_v39 = vld [vmem:[#allocation179_spill] sm:$0xff] }
 0x3d0   : > { %v6244_v50 = vpop.f32.mrb[144].mxu1  ;;  %v6360_v13 = vpop.f32.mrb[147].mxu0 }
 0x3d1   : > { %3723 = vadd.xlane.f32.xlu1 %v10271_v60  ;;  %v6245_v11 = vpop.f32.mrb[145].mxu1  ;;  %v6361_v9 = vadd.f32 %v6360_v13, %v6359_v31  ;;  %v10392_v17 = vpop.xlane.xlu0 %3558 }
 0x3d2   : > { %v6246_v8 = vadd.f32 %v6245_v11, %v6244_v50  ;;  %v6247_v62 = vpop.f32.mrb[146].mxu1  ;;  %v10409_v40 = vpop.permute.xlu1 %4999 }
 0x3d3   : > { %v6248_v38 = vpop.f32.mrb[147].mxu1  ;;  %11697 = vst [vmem:[#allocation74_spill] sm:$0xff] %v10409_v40 }
 0x3d4   : > { %v10401_v60 = vadd.f32 %v6358_v7, %v6246_v8  ;;  %v6249_v0 = vadd.f32 %v6248_v38, %v6247_v62  ;;  %v11700_v7 = vld [vmem:[#allocation181_spill] sm:$0xff] }
 0x3d5   : > { %3633 = vadd.xlane.f32.xlu1 %v3632_v58  ;;  %v10403_v55 = vpop.xlane.xlu0 %3654  ;;  %v1066_v31 = vmul.f32 %v11700_v7, %v11699_v39 }
 0x3d6   : > { %v10407_v35 = vadd.f32 %v6361_v9, %v6249_v0 }
 0x3d9   : > { %3729 = vadd.xlane.f32.xlu1 %v3728_v1  ;;  %v10411_v14 = vpop.xlane.xlu0 %3564  ;;  %v10419_v1 = vpop.permute.xlu1 %4407 }
 0x3da   : > { %v6362_v54 = vpop.f32.mrb[148].mxu0  ;;  %11698 = vst [vmem:[#allocation76_spill] sm:$0xff] %v10419_v1  ;;  %v11704_v1 = vld [vmem:[#allocation53_spill] sm:$0xff] }
 0x3db   : > { %v6250_v48 = vpop.f32.mrb[148].mxu1  ;;  %v6363_v20 = vpop.f32.mrb[149].mxu0 }
 0x3dc   : > { %v6251_v15 = vpop.f32.mrb[149].mxu1  ;;  %v6364_v44 = vadd.f32 %v6363_v20, %v6362_v54  ;;  %v6365_v10 = vpop.f32.mrb[150].mxu0 }
 0x3dd   : > { %v6252_v29 = vadd.f32 %v6251_v15, %v6250_v48  ;;  %v6253_v12 = vpop.f32.mrb[150].mxu1  ;;  %v6366_v47 = vpop.f32.mrb[151].mxu0 }
 0x3de   : > { %v6254_v36 = vpop.f32.mrb[151].mxu1  ;;  %v6367_v22 = vadd.f32 %v6366_v47, %v6365_v10  ;;  %v10415_v28 = vpop.xlane.xlu0 %3660  ;;  %v3731_v10 = vadd.f32 %v10371_v21, %v10364_v41 }
 0x3df   : > { %v10413_v23 = vadd.f32 %v6364_v44, %v6252_v29  ;;  %v6255_v58 = vadd.f32 %v6254_v36, %v6253_v12 }
 0x3e0   : > { %7401 = vrcp.f32 %v3731_v10 }
 0x3e1   : > { %v10417_v26 = vadd.f32 %v6367_v22, %v6255_v58 }
 0x3e2   : > { %v6368_v56 = vpop.f32.mrb[152].mxu0  ;;  %v10423_v8 = vpop.xlane.xlu0 %3570 }
 0x3e3   : > { %v6256_v52 = vpop.f32.mrb[152].mxu1  ;;  %v6369_v63 = vpop.f32.mrb[153].mxu0 }
 0x3e4   : > { %v6257_v43 = vpop.f32.mrb[153].mxu1  ;;  %v6370_v13 = vadd.f32 %v6369_v63, %v6368_v56  ;;  %v6371_v9 = vpop.f32.mrb[154].mxu0 }
 0x3e5   : > { %v6258_v50 = vadd.f32 %v6257_v43, %v6256_v52  ;;  %v6259_v11 = vpop.f32.mrb[154].mxu1  ;;  %v6372_v48 = vpop.f32.mrb[155].mxu0 }
 0x3e6   : > { %v6260_v62 = vpop.f32.mrb[155].mxu1  ;;  %v6373_v54 = vadd.f32 %v6372_v48, %v6371_v9  ;;  %v10429_v29 = vpop.xlane.xlu0 %3666 }
 0x3e7   : > { %v10425_v38 = vadd.f32 %v6370_v13, %v6258_v50  ;;  %v6261_v0 = vadd.f32 %v6260_v62, %v6259_v11 }
 0x3e9   : > { %v10427_v20 = vadd.f32 %v6373_v54, %v6261_v0  ;;  %v3733_v0 = vadd.f32 %v10379_v24, %v10376_v4 }
 0x3ea   : > { %5009 = vperm.xlu1 %6942, %v1066_v31   ;;  %v3544_v15 = vpop.xlane.xlu1 %3543  ;;  %v6374_v12 = vpop.f32.mrb[156].mxu0 }
 0x3eb   : > { %v6262_v44 = vpop.f32.mrb[156].mxu1  ;;  %v6375_v47 = vpop.f32.mrb[157].mxu0 }
 0x3ec   : > { %v6263_v36 = vpop.f32.mrb[157].mxu1  ;;  %v6376_v22 = vadd.f32 %v6375_v47, %v6374_v12  ;;  %v6377_v56 = vpop.f32.mrb[158].mxu0 }
 0x3ed   : > { %v6264_v58 = vadd.f32 %v6263_v36, %v6262_v44  ;;  %v6265_v52 = vpop.f32.mrb[158].mxu1  ;;  %v10433_v43 = vpop.xlane.xlu0 %3672 }
 0x3ee   : > { %v6266_v63 = vpop.f32.mrb[159].mxu1  ;;  %v6378_v31 = vpop.f32.mrb[159].mxu0 }
 0x3ef   : > { %v10435_v39 = vadd.f32 %v6376_v22, %v6264_v58  ;;  %v6267_v7 = vadd.f32 %v6266_v63, %v6265_v52  ;;  %v3640_v50 = vpop.xlane.xlu1 %3639  ;;  %v6379_v13 = vadd.f32 %v6378_v31, %v6377_v56 }
 0x3f0   : > { %v3732_v11 = vadd.f32 %v3640_v50, %v3544_v15  ;;  %v7402_v50 = vpop.eup %7401 }
 0x3f1   : > { %v10437_v9 = vadd.f32 %v6379_v13, %v6267_v7  ;;  %v10439_v41 = vpop.xlane.xlu0 %3579  ;;  %v4213_v13 = vmul.f32 %v7402_v50, %v10401_v60  ;;  %v11703_v50 = vld [vmem:[#allocation59_spill] sm:$0xff] }
 0x3f2   : > { %7403 = vrcp.f32 %v3732_v11 }
 0x3f3   : > { %v6380_v21 = vpop.f32.mrb[160].mxu0  ;;  %v3550_v62 = vpop.xlane.xlu1 %3549  ;;  %7405 = vrcp.f32 %v3733_v0  ;;  %v3735_v0 = vadd.f32 %v10389_v57, %v10384_v27 }
 0x3f4   : > { %v6381_v54 = vpop.f32.mrb[161].mxu0 }
 0x3f5   : > { %v6268_v48 = vpop.f32.mrb[160].mxu1  ;;  %v6382_v12 = vadd.f32 %v6381_v54, %v6380_v21  ;;  %v6383_v36 = vpop.f32.mrb[162].mxu0 }
 0x3f6   : > { %v6269_v44 = vpop.f32.mrb[161].mxu1  ;;  %v10443_v10 = vpop.xlane.xlu0 %3582 }
 0x3f7   : > { %v6270_v47 = vadd.f32 %v6269_v44, %v6268_v48  ;;  %v6271_v58 = vpop.f32.mrb[162].mxu1  ;;  %v6384_v22 = vpop.f32.mrb[163].mxu0 }
 0x3f8   : > { %v6272_v15 = vpop.f32.mrb[163].mxu1  ;;  %v6385_v63 = vadd.f32 %v6384_v22, %v6383_v36  ;;  %v3646_v7 = vpop.xlane.xlu1 %3645  ;;  %v11701_v22 = vld [vmem:[#allocation17_spill] sm:$0xff] }
 0x3f9   : > { %v10445_v52 = vadd.f32 %v6382_v12, %v6270_v47  ;;  %v6273_v56 = vadd.f32 %v6272_v15, %v6271_v58  ;;  %v3734_v31 = vadd.f32 %v3646_v7, %v3550_v62 }
 0x3fa   : > { %v10449_v24 = vpop.xlane.xlu0 %3678 }
 0x3fb   : > { %v10447_v4 = vadd.f32 %v6385_v63, %v6273_v56  ;;  %7407 = vrcp.f32 %v3734_v31  ;;  %v6386_v11 = vpop.f32.mrb[164].mxu0  ;;  %v4415_v56 = vmul.f32 %v11701_v22, %v4213_v13  ;;  %v11702_v63 = vld [vmem:[#allocation56_spill] sm:$0xff] }
 0x3fc   : > { %v7404_v21 = vpop.eup %7403  ;;  %v6387_v54 = vpop.f32.mrb[165].mxu0  ;;  %v5017_v60 = vmul.f32 %v11702_v63, %v4213_v13  ;;  %7409 = vrcp.f32 %v3735_v0 }
 0x3fd   : > { %v6274_v48 = vpop.f32.mrb[164].mxu1  ;;  %v6388_v12 = vadd.f32 %v6387_v54, %v6386_v11  ;;  %v3556_v36 = vpop.xlane.xlu1 %3555  ;;  %v4214_v62 = vmul.f32 %v7404_v21, %v10407_v35 }
 0x3fe   : > { %v6275_v44 = vpop.f32.mrb[165].mxu1  ;;  %v6389_v15 = vpop.f32.mrb[166].mxu0 }
 0x3ff   : > { %v6276_v47 = vadd.f32 %v6275_v44, %v6274_v48  ;;  %v6277_v58 = vpop.f32.mrb[166].mxu1  ;;  %v10457_v7 = vpop.xlane.xlu0 %3684  ;;  %v4416_v34 = vmul.f32 %v11703_v50, %v4214_v62  ;;  %v5018_v18 = vmul.f32 %v11704_v1, %v4214_v62 }
 0x400   : > { %v6278_v31 = vpop.f32.mrb[167].mxu1  ;;  %v6390_v11 = vpop.f32.mrb[167].mxu0 }
 0x401   : > { %v10461_v27 = vadd.f32 %v6388_v12, %v6276_v47  ;;  %v6279_v57 = vadd.f32 %v6278_v31, %v6277_v58  ;;  %v6391_v35 = vadd.f32 %v6390_v11, %v6389_v15  ;;  %v3652_v21 = vpop.xlane.xlu1 %3651  ;;  %v4447_v48 = vpack.c.bf16 %v4416_v34, %v4415_v56  ;;  %v7406_v44 = vpop.eup %7405  ;;  %v11705_v56 = vld [vmem:[#allocation60_spill] sm:$0xff] }
 0x402   : > { %v5049_v54 = vpack.c.bf16 %v5018_v18, %v5017_v60  ;;  %v3736_v22 = vadd.f32 %v3652_v21, %v3556_v36  ;;  %v4215_v13 = vmul.f32 %v7406_v44, %v10413_v23  ;;  %v3737_v18 = vadd.f32 %v10403_v55, %v10392_v17  ;;  %v11706_v31 = vld [vmem:[#allocation52_spill] sm:$0xff] }
 0x403   : > { %v10464_v63 = vadd.f32 %v6391_v35, %v6279_v57  ;;  %v10466_v40 = vpop.xlane.xlu0 %3591  ;;  %v6392_v50 = vpop.f32.mrb[168].mxu0  ;;  %6708 = vmatprep.mubr.msk.bf16.mxu1 %vm1164_vm0, %v4447_v48  ;;  %v11707_v35 = vld [vmem:[#allocation61_spill] sm:$0xff]  ;;  %v11708_v48 = vld [vmem:[#allocation54_spill] sm:$0xff] }
 0x404   : > { %6780 = vmatprep.mubr.msk.bf16.mxu0 %vm1164_vm0, %v5049_v54  ;;  %7411 = vrcp.f32 %v3736_v22  ;;  %v6393_v0 = vpop.f32.mrb[169].mxu0  ;;  %v4417_v60 = vmul.f32 %v11705_v56, %v4215_v13  ;;  %v5019_v57 = vmul.f32 %v11706_v31, %v4215_v13 }
 0x405   : > { %v6280_v1 = vpop.f32.mrb[168].mxu1  ;;  %v7408_v12 = vpop.eup %7407  ;;  %v6394_v36 = vadd.f32 %v6393_v0, %v6392_v50  ;;  %7413 = vrcp.f32 %v3737_v18 }
 0x406   : > { %v6281_v34 = vpop.f32.mrb[169].mxu1  ;;  %v3562_v62 = vpop.xlane.xlu1 %3561  ;;  %v4216_v23 = vmul.f32 %v7408_v12, %v10417_v26  ;;  %v6952_v12 = vld [vmem:[%s11013_s9 + $0x8] sm:$0xff]  }
 0x407   : > { %v6282_v47 = vadd.f32 %v6281_v34, %v6280_v1  ;;  %v6283_v58 = vpop.f32.mrb[170].mxu1  ;;  %v6395_v15 = vpop.f32.mrb[170].mxu0 }
 0x408   : > { %v6284_v11 = vpop.f32.mrb[171].mxu1  ;;  %v4418_v21 = vmul.f32 %v11707_v35, %v4216_v23  ;;  %v5020_v54 = vmul.f32 %v11708_v48, %v4216_v23  ;;  %v6396_v55 = vpop.f32.mrb[171].mxu0  ;;  %v11709_v48 = vld [vmem:[#allocation51_spill] sm:$0xff] }
 0x409   : > { %v10477_v44 = vadd.f32 %v6394_v36, %v6282_v47  ;;  %v6285_v17 = vadd.f32 %v6284_v11, %v6283_v58  ;;  %v6397_v22 = vadd.f32 %v6396_v55, %v6395_v15  ;;  %v7410_v13 = vpop.eup %7409  ;;  %v10482_v34 = vpop.xlane.xlu0 %3594 }
 0x40a   : > { %v3658_v50 = vpop.xlane.xlu1 %3657  ;;  %v4448_v26 = vpack.c.bf16 %v4418_v21, %v4417_v60  ;;  %v5050_v1 = vpack.c.bf16 %v5020_v54, %v5019_v57  ;;  %v4217_v36 = vmul.f32 %v7410_v13, %v10425_v38 }
 0x40b   : > { %v3738_v0 = vadd.f32 %v3658_v50, %v3562_v62  ;;  %v10484_v56 = vadd.f32 %v6397_v22, %v6285_v17  ;;  %v6398_v23 = vpop.f32.mrb[172].mxu0  ;;  %v3739_v62 = vadd.f32 %v10415_v28, %v10411_v14  ;;  %v11710_v17 = vld [vmem:[#allocation46_spill] sm:$0xff] }
 0x40c   : > { %v6399_v18 = vpop.f32.mrb[173].mxu0  ;;  %6709 = vmatmul.mubr.msk.bf16.vlgmr.msra.gmra.mrb[208].mxu1 %vm1164_vm0, %v4448_v26  ;;  %6781 = vmatmul.mubr.msk.bf16.vlgmr.msra.gmra.mrb[208].mxu0 %vm1164_vm0, %v5050_v1  ;;  %v4419_v54 = vmul.f32 %v11709_v48, %v4217_v36  ;;  %v5021_v14 = vmul.f32 %v11710_v17, %v4217_v36  ;;  %v11711_v26 = vld [vmem:[#allocation5_spill] sm:$0xff] }
 0x40d   : > { %7415 = vrcp.f32 %v3738_v0  ;;  %v6286_v47 = vpop.f32.mrb[172].mxu1  ;;  %v6400_v15 = vadd.f32 %v6399_v18, %v6398_v23  ;;  %6741 = vmatpush3.bf16.msra.mxu1 %v10399_v37  ;;  %6813 = vmatpush3.bf16.msra.mxu0 %v10399_v37  ;;  %v6401_v11 = vpop.f32.mrb[174].mxu0  ;;  %v11712_v0 = vld [vmem:[#allocation45_spill] sm:$0xff] }
 0x40e   : > { %v6287_v58 = vpop.f32.mrb[173].mxu1  ;;  %v3568_v60 = vpop.xlane.xlu1 %3567  ;;  %6742 = vmatprep.subr.bf16.mxu1 %v6952_v12  ;;  %6814 = vmatprep.subr.bf16.mxu0 %v6952_v12  ;;  %7417 = vrcp.f32 %v3739_v62  ;;  %v3741_v62 = vadd.f32 %v10429_v29, %v10423_v8  ;;  %v11713_v8 = vld [vmem:[#allocation22_spill] sm:$0xff] }
 0x40f   : > { %v7412_v31 = vpop.eup %7411  ;;  %v6288_v57 = vadd.f32 %v6287_v58, %v6286_v47  ;;  %v6289_v38 = vpop.f32.mrb[174].mxu1 }
 0x410   : > { %v6290_v35 = vpop.f32.mrb[175].mxu1  ;;  %v4218_v21 = vmul.f32 %v7412_v31, %v10427_v20  ;;  %v6402_v22 = vpop.f32.mrb[175].mxu0 }
 0x411   : > { %v10496_v28 = vadd.f32 %v6400_v15, %v6288_v57  ;;  %v6291_v55 = vadd.f32 %v6290_v35, %v6289_v38  ;;  %v6403_v50 = vadd.f32 %v6402_v22, %v6401_v11  ;;  %6743 = vmatpush3.bf16.msra.mxu1 %v6952_v12  ;;  %6815 = vmatpush3.bf16.msra.mxu0 %v6952_v12  ;;  %v7414_v47 = vpop.eup %7413  ;;  %v10500_v20 = vpop.xlane.xlu0 %3690 }
 0x412   : > { %v3664_v37 = vpop.xlane.xlu1 %3663  ;;  %v4420_v1 = vmul.f32 %v11711_v26, %v4218_v21  ;;  %v5022_v13 = vmul.f32 %v11712_v0, %v4218_v21  ;;  %v4219_v31 = vmul.f32 %v7414_v47, %v10435_v39  ;;  %v11715_v0 = vld [vmem:[#allocation72_spill] sm:$0xff] }
 0x413   : > { %v3740_v23 = vadd.f32 %v3664_v37, %v3568_v60  ;;  %v10502_v18 = vadd.f32 %v6403_v50, %v6291_v55  ;;  %v6404_v36 = vpop.f32.mrb[176].mxu0  ;;  %v11714_v50 = vld [vmem:[#allocation71_spill] sm:$0xff] }
 0x414   : > { %v4449_v58 = vpack.c.bf16 %v4420_v1, %v4419_v54  ;;  %v5051_v15 = vpack.c.bf16 %v5022_v13, %v5021_v14  ;;  %v6405_v38 = vpop.f32.mrb[177].mxu0  ;;  %v4421_v29 = vmul.f32 %v11713_v8, %v4219_v31  ;;  %v5023_v37 = vmul.f32 %v11714_v50, %v4219_v31 }
 0x415   : > { %7419 = vrcp.f32 %v3740_v23  ;;  %v6292_v57 = vpop.f32.mrb[176].mxu1  ;;  %v6406_v35 = vadd.f32 %v6405_v38, %v6404_v36  ;;  %v6407_v54 = vpop.f32.mrb[178].mxu0  ;;  %v11716_v23 = vld [vmem:[#allocation82_spill] sm:$0xff] }
 0x416   : > { %v6293_v11 = vpop.f32.mrb[177].mxu1  ;;  %v3574_v12 = vpop.xlane.xlu1 %3573  ;;  %6712 = vmatprep.mubr.msk.bf16.mxu1 %vm1164_vm0, %v4449_v58  ;;  %6784 = vmatprep.mubr.msk.bf16.mxu0 %vm1164_vm0, %v5051_v15  ;;  %7421 = vrcp.f32 %v3741_v62 }
 0x417   : > { %v7416_v60 = vpop.eup %7415  ;;  %v6294_v21 = vadd.f32 %v6293_v11, %v6292_v57  ;;  %v6295_v48 = vpop.f32.mrb[178].mxu1 }
 0x418   : > { %v6296_v17 = vpop.f32.mrb[179].mxu1  ;;  %v4220_v14 = vmul.f32 %v7416_v60, %v10437_v9  ;;  %v6408_v22 = vpop.f32.mrb[179].mxu0 }
 0x419   : > { %v10511_v39 = vadd.f32 %v6406_v35, %v6294_v21  ;;  %v6297_v55 = vadd.f32 %v6296_v17, %v6295_v48  ;;  %v6409_v26 = vadd.f32 %v6408_v22, %v6407_v54  ;;  %v7418_v58 = vpop.eup %7417  ;;  %v10516_v15 = vpop.xlane.xlu0 %3696 }
 0x41a   : > { %v3670_v1 = vpop.xlane.xlu1 %3669  ;;  %v4422_v13 = vmul.f32 %v11715_v0, %v4220_v14  ;;  %v5024_v47 = vmul.f32 %v11716_v23, %v4220_v14  ;;  %v4221_v11 = vmul.f32 %v7418_v58, %v10445_v52  ;;  %v11717_v52 = vld [vmem:[#allocation92_spill] sm:$0xff]  ;;  %v11720_v58 = vld [vmem:[#allocation102_spill] sm:$0xff] }
 0x41b   : > { %v3742_v36 = vadd.f32 %v3670_v1, %v3574_v12  ;;  %v10518_v9 = vadd.f32 %v6409_v26, %v6297_v55  ;;  %v6410_v62 = vpop.f32.mrb[180].mxu0  ;;  %v11718_v1 = vld [vmem:[#allocation91_spill] sm:$0xff] }
 0x41c   : > { %v4450_v57 = vpack.c.bf16 %v4422_v13, %v4421_v29  ;;  %v5052_v38 = vpack.c.bf16 %v5024_v47, %v5023_v37  ;;  %v6411_v31 = vpop.f32.mrb[181].mxu0  ;;  %v4423_v22 = vmul.f32 %v11717_v52, %v4221_v11  ;;  %v5025_v0 = vmul.f32 %v11718_v1, %v4221_v11  ;;  %v11719_v47 = vld [vmem:[#allocation81_spill] sm:$0xff]  ;;  %v11722_v1 = vld [vmem:[#allocation111_spill] sm:$0xff] }
 0x41d   : > { %7423 = vrcp.f32 %v3742_v36  ;;  %v6298_v35 = vpop.f32.mrb[180].mxu1  ;;  %v6412_v21 = vadd.f32 %v6411_v31, %v6410_v62  ;;  %v6413_v8 = vpop.f32.mrb[182].mxu0 }
 0x41e   : > { %v6299_v60 = vpop.f32.mrb[181].mxu1  ;;  %v3577_v48 = vpop.xlane.xlu1 %3576  ;;  %6713 = vmatmul.mubr.msk.bf16.gmra.mrb[212].mxu1 %vm1164_vm0, %v4450_v57  ;;  %6785 = vmatmul.mubr.msk.bf16.gmra.mrb[212].mxu0 %vm1164_vm0, %v5052_v38 }
 0x41f   : > { %v7420_v12 = vpop.eup %7419  ;;  %v6300_v54 = vadd.f32 %v6299_v60, %v6298_v35  ;;  %v6301_v17 = vpop.f32.mrb[182].mxu1  ;;  %v3743_v14 = vadd.f32 %v10433_v43, %v3577_v48 }
 0x420   : > { %v6302_v29 = vpop.f32.mrb[183].mxu1  ;;  %v4222_v55 = vmul.f32 %v7420_v12, %v10447_v4  ;;  %v6414_v26 = vpop.f32.mrb[183].mxu0 }
 0x421   : > { %v10526_v50 = vadd.f32 %v6412_v21, %v6300_v54  ;;  %7425 = vrcp.f32 %v3743_v14  ;;  %v6303_v37 = vadd.f32 %v6302_v29, %v6301_v17  ;;  %v6415_v13 = vadd.f32 %v6414_v26, %v6413_v8  ;;  %v7422_v43 = vpop.eup %7421  ;;  %v10532_v38 = vpop.xlane.xlu0 %3603 }
 0x422   : > { %v3676_v23 = vpop.xlane.xlu1 %3675  ;;  %v4424_v36 = vmul.f32 %v11719_v47, %v4222_v55  ;;  %v5026_v62 = vmul.f32 %v11720_v58, %v4222_v55  ;;  %v3745_v21 = vadd.f32 %v10449_v24, %v10443_v10  ;;  %v4223_v11 = vmul.f32 %v7422_v43, %v10461_v27  ;;  %v11721_v10 = vld [vmem:[#allocation101_spill] sm:$0xff]  ;;  %v11723_v47 = vld [vmem:[#allocation112_spill] sm:$0xff]  ;;  %v11724_v58 = vld [vmem:[#allocation122_spill] sm:$0xff] }
 0x423   : > { %v3744_v57 = vadd.f32 %v3676_v23, %v10439_v41  ;;  %v10534_v4 = vadd.f32 %v6415_v13, %v6303_v37  ;;  %v6416_v35 = vpop.f32.mrb[184].mxu0 }
 0x424   : > { %v4451_v31 = vpack.c.bf16 %v4424_v36, %v4423_v22  ;;  %v5053_v60 = vpack.c.bf16 %v5026_v62, %v5025_v0  ;;  %v6417_v12 = vpop.f32.mrb[185].mxu0  ;;  %v4425_v24 = vmul.f32 %v11721_v10, %v4223_v11  ;;  %v5027_v0 = vmul.f32 %v11722_v1, %v4223_v11 }
 0x425   : > { %7427 = vrcp.f32 %v3744_v57  ;;  %v6304_v48 = vpop.f32.mrb[184].mxu1  ;;  %v6418_v17 = vadd.f32 %v6417_v12, %v6416_v35  ;;  %v6419_v55 = vpop.f32.mrb[186].mxu0 }
 0x426   : > { %v6305_v54 = vpop.f32.mrb[185].mxu1  ;;  %v3586_v14 = vpop.xlane.xlu1 %3585  ;;  %6716 = vmatprep.mubr.msk.bf16.mxu1 %vm1164_vm0, %v4451_v31  ;;  %6788 = vmatprep.mubr.msk.bf16.mxu0 %vm1164_vm0, %v5053_v60  ;;  %7429 = vrcp.f32 %v3745_v21 }
 0x427   : > { %v7424_v41 = vpop.eup %7423  ;;  %v6306_v8 = vadd.f32 %v6305_v54, %v6304_v48  ;;  %v6307_v29 = vpop.f32.mrb[186].mxu1 }
 0x428   : > { %v6308_v52 = vpop.f32.mrb[187].mxu1  ;;  %v4224_v22 = vmul.f32 %v7424_v41, %v10464_v63  ;;  %v6420_v26 = vpop.f32.mrb[187].mxu0 }
 0x429   : > { %v10543_v27 = vadd.f32 %v6418_v17, %v6306_v8  ;;  %v6309_v37 = vadd.f32 %v6308_v52, %v6307_v29  ;;  %v6421_v13 = vadd.f32 %v6420_v26, %v6419_v55  ;;  %v10548_v35 = vpop.xlane.xlu0 %3606  ;;  %v11725_v26 = vld [vmem:[#allocation132_spill] sm:$0xff] }
 0x42a   : > { %v3682_v23 = vpop.xlane.xlu1 %3681  ;;  %v4426_v36 = vmul.f32 %v11723_v47, %v4224_v22  ;;  %v5028_v62 = vmul.f32 %v11724_v58, %v4224_v22 }
 0x42b   : > { %v7426_v43 = vpop.eup %7425  ;;  %v3746_v57 = vadd.f32 %v3682_v23, %v3586_v14  ;;  %v10550_v63 = vadd.f32 %v6421_v13, %v6309_v37  ;;  %v6422_v31 = vpop.f32.mrb[188].mxu0  ;;  %v11726_v23 = vld [vmem:[#allocation121_spill] sm:$0xff] }
 0x42c   : > { %v4452_v60 = vpack.c.bf16 %v4426_v36, %v4425_v24  ;;  %v5054_v21 = vpack.c.bf16 %v5028_v62, %v5027_v0  ;;  %v6423_v12 = vpop.f32.mrb[189].mxu0  ;;  %v4225_v11 = vmul.f32 %v7426_v43, %v10477_v44  ;;  %v11727_v36 = vld [vmem:[#allocation131_spill] sm:$0xff]  ;;  %v11728_v62 = vld [vmem:[#allocation142_spill] sm:$0xff] }
 0x42d   : > { %7431 = vrcp.f32 %v3746_v57  ;;  %v6310_v48 = vpop.f32.mrb[188].mxu1  ;;  %v6424_v17 = vadd.f32 %v6423_v12, %v6422_v31  ;;  %v6425_v52 = vpop.f32.mrb[190].mxu0 }
 0x42e   : > { %v6311_v54 = vpop.f32.mrb[189].mxu1  ;;  %v3589_v41 = vpop.xlane.xlu1 %3588  ;;  %6717 = vmatmul.mubr.msk.bf16.gmra.mrb[216].mxu1 %vm1164_vm0, %v4452_v60  ;;  %6789 = vmatmul.mubr.msk.bf16.gmra.mrb[216].mxu0 %vm1164_vm0, %v5054_v21  ;;  %v4427_v1 = vmul.f32 %v11725_v26, %v4225_v11  ;;  %v5029_v58 = vmul.f32 %v11727_v36, %v4225_v11  ;;  %v11731_v36 = vld [vmem:[#allocation152_spill] sm:$0xff] }
 0x42f   : > { %v7428_v14 = vpop.eup %7427  ;;  %v6312_v8 = vadd.f32 %v6311_v54, %v6310_v48  ;;  %v6313_v29 = vpop.f32.mrb[190].mxu1  ;;  %v3747_v55 = vadd.f32 %v10457_v7, %v3589_v41 }
 0x430   : > { %v6314_v22 = vpop.f32.mrb[191].mxu1  ;;  %v4226_v10 = vmul.f32 %v7428_v14, %v10484_v56  ;;  %v6426_v37 = vpop.f32.mrb[191].mxu0 }
 0x431   : > { %v10557_v24 = vadd.f32 %v6424_v17, %v6312_v8  ;;  %7433 = vrcp.f32 %v3747_v55  ;;  %v6315_v44 = vadd.f32 %v6314_v22, %v6313_v29  ;;  %v6427_v0 = vadd.f32 %v6426_v37, %v6425_v52  ;;  %v7430_v7 = vpop.eup %7429  ;;  %v10564_v31 = vpop.xlane.xlu0 %3702 }
 0x432   : > { %v3688_v13 = vpop.xlane.xlu1 %3687  ;;  %v4428_v47 = vmul.f32 %v11726_v23, %v4226_v10  ;;  %v5030_v43 = vmul.f32 %v11728_v62, %v4226_v10  ;;  %v4227_v12 = vmul.f32 %v7430_v7, %v10496_v28  ;;  %v3749_v8 = vadd.f32 %v10500_v20, %v10482_v34  ;;  %v11729_v10 = vld [vmem:[#allocation141_spill] sm:$0xff] }
 0x433   : > { %v3748_v57 = vadd.f32 %v3688_v13, %v10466_v40  ;;  %v10566_v56 = vadd.f32 %v6427_v0, %v6315_v44  ;;  %v6428_v60 = vpop.f32.mrb[192].mxu0  ;;  %v11730_v0 = vld [vmem:[#allocation151_spill] sm:$0xff]  ;;  %v11732_v62 = vld [vmem:[#allocation161_spill] sm:$0xff] }
 0x434   : > { %v4453_v21 = vpack.c.bf16 %v4428_v47, %v4427_v1  ;;  %v5055_v48 = vpack.c.bf16 %v5030_v43, %v5029_v58  ;;  %v6429_v17 = vpop.f32.mrb[193].mxu0  ;;  %v4429_v44 = vmul.f32 %v11729_v10, %v4227_v12  ;;  %v5031_v13 = vmul.f32 %v11730_v0, %v4227_v12  ;;  %v11733_v0 = vld [vmem:[#allocation170_spill] sm:$0xff] }
 0x435   : > { %7435 = vrcp.f32 %v3748_v57  ;;  %v6316_v54 = vpop.f32.mrb[192].mxu1  ;;  %v6430_v14 = vadd.f32 %v6429_v17, %v6428_v60  ;;  %v6431_v52 = vpop.f32.mrb[194].mxu0 }
 0x436   : > { %v6317_v41 = vpop.f32.mrb[193].mxu1  ;;  %v3598_v11 = vpop.xlane.xlu1 %3597  ;;  %6720 = vmatprep.mubr.msk.bf16.mxu1 %vm1164_vm0, %v4453_v21  ;;  %6792 = vmatprep.mubr.msk.bf16.mxu0 %vm1164_vm0, %v5055_v48  ;;  %7437 = vrcp.f32 %v3749_v8 }
 0x437   : > { %v7432_v40 = vpop.eup %7431  ;;  %v6318_v29 = vadd.f32 %v6317_v41, %v6316_v54  ;;  %v6319_v55 = vpop.f32.mrb[194].mxu1 }
 0x438   : > { %v6320_v22 = vpop.f32.mrb[195].mxu1  ;;  %v4228_v28 = vmul.f32 %v7432_v40, %v10502_v18  ;;  %v6432_v1 = vpop.f32.mrb[195].mxu0 }
 0x439   : > { %v10575_v37 = vadd.f32 %v6430_v14, %v6318_v29  ;;  %v6321_v26 = vadd.f32 %v6320_v22, %v6319_v55  ;;  %v6433_v23 = vadd.f32 %v6432_v1, %v6431_v52  ;;  %v10580_v7 = vpop.xlane.xlu0 %3708 }
 0x43a   : > { %v3694_v47 = vpop.xlane.xlu1 %3693  ;;  %v4430_v58 = vmul.f32 %v11731_v36, %v4228_v28  ;;  %v5032_v34 = vmul.f32 %v11732_v62, %v4228_v28 }
 0x43b   : > { %v7434_v20 = vpop.eup %7433  ;;  %v3750_v43 = vadd.f32 %v3694_v47, %v3598_v11  ;;  %v10582_v18 = vadd.f32 %v6433_v23, %v6321_v26  ;;  %v6434_v57 = vpop.f32.mrb[196].mxu0  ;;  %v11734_v23 = vld [vmem:[#allocation162_spill] sm:$0xff]  ;;  %v11735_v47 = vld [vmem:[#allocation172_spill] sm:$0xff] }
 0x43c   : > { %v4454_v60 = vpack.c.bf16 %v4430_v58, %v4429_v44  ;;  %v5056_v21 = vpack.c.bf16 %v5032_v34, %v5031_v13  ;;  %v6435_v54 = vpop.f32.mrb[197].mxu0  ;;  %v4229_v14 = vmul.f32 %v7434_v20, %v10511_v39  ;;  %v11736_v58 = vld [vmem:[#allocation173_spill] sm:$0xff] }
 0x43d   : > { %7439 = vrcp.f32 %v3750_v43  ;;  %v6322_v48 = vpop.f32.mrb[196].mxu1  ;;  %v6436_v17 = vadd.f32 %v6435_v54, %v6434_v57  ;;  %v6437_v55 = vpop.f32.mrb[198].mxu0 }
 0x43e   : > { %v6323_v12 = vpop.f32.mrb[197].mxu1  ;;  %v3601_v41 = vpop.xlane.xlu1 %3600  ;;  %6721 = vmatmul.mubr.msk.bf16.gmra.mrb[220].mxu1 %vm1164_vm0, %v4454_v60  ;;  %6793 = vmatmul.mubr.msk.bf16.gmra.mrb[220].mxu0 %vm1164_vm0, %v5056_v21  ;;  %v4431_v13 = vmul.f32 %v11733_v0, %v4229_v14  ;;  %v5033_v36 = vmul.f32 %v11735_v47, %v4229_v14  ;;  %v11740_v47 = vld [vmem:[#allocation178_spill] sm:$0xff] }
 0x43f   : > { %v7436_v11 = vpop.eup %7435  ;;  %v6324_v40 = vadd.f32 %v6323_v12, %v6322_v48  ;;  %v6325_v8 = vpop.f32.mrb[198].mxu1  ;;  %v3751_v29 = vadd.f32 %v10516_v15, %v3601_v41 }
 0x440   : > { %v6326_v52 = vpop.f32.mrb[199].mxu1  ;;  %v6438_v22 = vpop.f32.mrb[199].mxu0  ;;  %v4230_v28 = vmul.f32 %v7436_v11, %v10518_v9 }
 0x441   : > { %v10589_v10 = vadd.f32 %v6436_v17, %v6324_v40  ;;  %7441 = vrcp.f32 %v3751_v29  ;;  %v6327_v44 = vadd.f32 %v6326_v52, %v6325_v8  ;;  %v6439_v26 = vadd.f32 %v6438_v22, %v6437_v55  ;;  %v3616_v20 = vpop.xlane.xlu0 %3615  ;;  %v7438_v60 = vpop.eup %7437 }
 0x442   : > { %v3700_v1 = vpop.xlane.xlu1 %3699  ;;  %v4432_v39 = vmul.f32 %v11734_v23, %v4230_v28  ;;  %v5034_v62 = vmul.f32 %v11736_v58, %v4230_v28  ;;  %v4231_v54 = vmul.f32 %v7438_v60, %v10526_v50  ;;  %v11739_v23 = vld [vmem:[#allocation175_spill] sm:$0xff] }
 0x443   : > { %v10595_v15 = vadd.f32 %v6439_v26, %v6327_v44  ;;  %v3752_v34 = vadd.f32 %v3700_v1, %v10532_v38  ;;  %v6440_v9 = vpop.f32.mrb[200].mxu0  ;;  %v3753_v38 = vadd.f32 %v10564_v31, %v10548_v35  ;;  %v11737_v44 = vld [vmem:[#allocation174_spill] sm:$0xff]  ;;  %v11738_v1 = vld [vmem:[#allocation177_spill] sm:$0xff] }
 0x444   : > { %v4455_v43 = vpack.c.bf16 %v4432_v39, %v4431_v13  ;;  %v5057_v57 = vpack.c.bf16 %v5034_v62, %v5033_v36  ;;  %v6441_v48 = vpop.f32.mrb[201].mxu0  ;;  %v4433_v26 = vmul.f32 %v11737_v44, %v4231_v54  ;;  %v5035_v0 = vmul.f32 %v11738_v1, %v4231_v54 }
 0x445   : > { %7443 = vrcp.f32 %v3752_v34  ;;  %v6328_v21 = vpop.f32.mrb[200].mxu1  ;;  %v6442_v17 = vadd.f32 %v6441_v48, %v6440_v9  ;;  %v6443_v8 = vpop.f32.mrb[202].mxu0 }
 0x446   : > { %v6329_v12 = vpop.f32.mrb[201].mxu1  ;;  %v3610_v41 = vpop.xlane.xlu1 %3609  ;;  %6724 = vmatprep.mubr.msk.bf16.mxu1 %vm1164_vm0, %v4455_v43  ;;  %6796 = vmatprep.mubr.msk.bf16.mxu0 %vm1164_vm0, %v5057_v57  ;;  %7445 = vrcp.f32 %v3753_v38 }
 0x447   : > { %v7440_v14 = vpop.eup %7439  ;;  %v6330_v11 = vadd.f32 %v6329_v12, %v6328_v21  ;;  %v6331_v40 = vpop.f32.mrb[202].mxu1 }
 0x448   : > { %v6332_v29 = vpop.f32.mrb[203].mxu1  ;;  %v6444_v55 = vpop.f32.mrb[203].mxu0  ;;  %v4232_v52 = vmul.f32 %v7440_v14, %v10534_v4 }
 0x449   : > { %v10604_v22 = vadd.f32 %v6442_v17, %v6330_v11  ;;  %v6333_v50 = vadd.f32 %v6332_v29, %v6331_v40  ;;  %v6445_v28 = vadd.f32 %v6444_v55, %v6443_v8  ;;  %v3619_v34 = vpop.xlane.xlu0 %3618 }
 0x44a   : > { %v3706_v13 = vpop.xlane.xlu1 %3705  ;;  %v4434_v39 = vmul.f32 %v11739_v23, %v4232_v52  ;;  %v5036_v35 = vmul.f32 %v11740_v47, %v4232_v52 }
 0x44b   : > { %v7442_v31 = vpop.eup %7441  ;;  %v10610_v36 = vadd.f32 %v6445_v28, %v6333_v50  ;;  %v3754_v58 = vadd.f32 %v3706_v13, %v3610_v41 }
 0x44c   : > { %v4456_v62 = vpack.c.bf16 %v4434_v39, %v4433_v26  ;;  %v5058_v4 = vpack.c.bf16 %v5036_v35, %v5035_v0  ;;  %v4233_v43 = vmul.f32 %v7442_v31, %v10543_v27 }
 0x44d   : > { %7447 = vrcp.f32 %v3754_v58  ;;  %v3715_v38 = vpop.xlane.xlu0 %3714 }
 0x44e   : > { %v3613_v9 = vpop.xlane.xlu1 %3612  ;;  %6725 = vmatmul.mubr.msk.bf16.gmra.mrb[224].mxu1 %vm1164_vm0, %v4456_v62  ;;  %6797 = vmatmul.mubr.msk.bf16.gmra.mrb[224].mxu0 %vm1164_vm0, %v5058_v4  ;;  %v4435_v54 = vmul.f32 %v10293_v5, %v4233_v43  ;;  %v5037_v17 = vmul.f32 %v10349_v3, %v4233_v43 }
 0x44f   : > { %v7444_v57 = vpop.eup %7443  ;;  %v3755_v60 = vadd.f32 %v10580_v7, %v3613_v9 }
 0x450   : > { %v4234_v21 = vmul.f32 %v7444_v57, %v10550_v63  ;;  %v7446_v27 = vpop.eup %7445  ;;  %v3757_v63 = vadd.f32 %v3715_v38, %v3619_v34 }
 0x451   : > { %7449 = vrcp.f32 %v3755_v60  ;;  %v4235_v7 = vmul.f32 %v7446_v27, %v10557_v24  ;;  %v3721_v50 = vpop.xlane.xlu0 %3720 }
 0x452   : > { %v3712_v48 = vpop.xlane.xlu1 %3711  ;;  %v4436_v12 = vmul.f32 %v10307_v42, %v4234_v21  ;;  %v5038_v41 = vmul.f32 %v10300_v30, %v4234_v21 }
 0x453   : > { %v3756_v14 = vadd.f32 %v3712_v48, %v3616_v20  ;;  %v4437_v3 = vmul.f32 %v10355_v32, %v4235_v7  ;;  %v5039_v30 = vmul.f32 %v10361_v59, %v4235_v7  ;;  %v11741_v48 = vld [vmem:[#allocation74_spill] sm:$0xff] }
 0x454   : > { %v4457_v11 = vpack.c.bf16 %v4436_v12, %v4435_v54  ;;  %v5059_v40 = vpack.c.bf16 %v5038_v41, %v5037_v17  ;;  %v11742_v12 = vld [vmem:[#allocation67_spill] sm:$0xff] }
 0x455   : > { %7451 = vrcp.f32 %v3756_v14 }
 0x456   : > { %v3622_v8 = vpop.xlane.xlu1 %3621  ;;  %6728 = vmatprep.mubr.msk.bf16.mxu1 %vm1164_vm0, %v4457_v11  ;;  %6800 = vmatprep.mubr.msk.bf16.mxu0 %vm1164_vm0, %v5059_v40  ;;  %7453 = vrcp.f32 %v3757_v63 }
 0x457   : > { %v7448_v5 = vpop.eup %7447 }
 0x458   : > { %v4236_v42 = vmul.f32 %v7448_v5, %v10566_v56 }
 0x45a   : > { %v3718_v20 = vpop.xlane.xlu1 %3717  ;;  %v4438_v29 = vmul.f32 %v10304_v53, %v4236_v42  ;;  %v5040_v55 = vmul.f32 %v10311_v61, %v4236_v42  ;;  %v3628_v61 = vpop.xlane.xlu0 %3627 }
 0x45b   : > { %v7450_v52 = vpop.eup %7449  ;;  %v3758_v24 = vadd.f32 %v3718_v20, %v3622_v8 }
 0x45c   : > { %v4458_v28 = vpack.c.bf16 %v4438_v29, %v4437_v3  ;;  %v5060_v44 = vpack.c.bf16 %v5040_v55, %v5039_v30  ;;  %v4237_v32 = vmul.f32 %v7450_v52, %v10575_v37 }
 0x45d   : > { %7455 = vrcp.f32 %v3758_v24 }
 0x45e   : > { %v3625_v26 = vpop.xlane.xlu1 %3624  ;;  %6729 = vmatmul.mubr.msk.bf16.gmra.mrb[228].mxu1 %vm1164_vm0, %v4458_v28  ;;  %6801 = vmatmul.mubr.msk.bf16.gmra.mrb[228].mxu0 %vm1164_vm0, %v5060_v44  ;;  %v4439_v0 = vmul.f32 %v10366_v46, %v4237_v32  ;;  %v5041_v23 = vmul.f32 %v10374_v16, %v4237_v32  ;;  %v3631_v62 = vpop.xlane.xlu0 %3630  ;;  %v11743_v28 = vld [vmem:[#allocation76_spill] sm:$0xff]  ;;  %v11744_v32 = vld [vmem:[#allocation69_spill] sm:$0xff] }
 0x45f   : > { %v7452_v59 = vpop.eup %7451  ;;  %v3759_v56 = vadd.f32 %v3721_v50, %v3625_v26 }
 0x460   : > { %v4238_v53 = vmul.f32 %v7452_v59, %v10582_v18  ;;  %v7454_v58 = vpop.eup %7453 }
 0x461   : > { %7457 = vrcp.f32 %v3759_v56  ;;  %v4239_v37 = vmul.f32 %v7454_v58, %v10589_v10  ;;  %v11753_v58 = vld [vmem:[#allocation12_spill] sm:$0xff] }
 0x462   : > { %v3724_v1 = vpop.xlane.xlu1 %3723  ;;  %v4440_v13 = vmul.f32 %v10319_v51, %v4238_v53  ;;  %v5042_v39 = vmul.f32 %v10328_v19, %v4238_v53  ;;  %v3727_v57 = vpop.xlane.xlu0 %3726 }
 0x463   : > { %v3760_v47 = vadd.f32 %v3724_v1, %v3628_v61  ;;  %v4441_v51 = vmul.f32 %v10381_v33, %v4239_v37  ;;  %v5043_v16 = vmul.f32 %v10387_v45, %v4239_v37  ;;  %v3761_v21 = vadd.f32 %v3727_v57, %v3631_v62  ;;  %v11745_v1 = vld [vmem:[#allocation36_spill] sm:$0xff]  ;;  %v11754_v37 = vld [vmem:[#allocation11_spill] sm:$0xff]  ;;  %v11756_v62 = vld [vmem:[#allocation9_spill] sm:$0xff] }
 0x464   : > { %v4459_v35 = vpack.c.bf16 %v4440_v13, %v4439_v0  ;;  %v5061_v31 = vpack.c.bf16 %v5042_v39, %v5041_v23  ;;  %v11746_v0 = vld [vmem:[#allocation35_spill] sm:$0xff]  ;;  %v11747_v13 = vld [vmem:[#allocation38_spill] sm:$0xff]  ;;  %v11748_v23 = vld [vmem:[#allocation37_spill] sm:$0xff] }
 0x465   : > { %7459 = vrcp.f32 %v3760_v47  ;;  %v11749_v39 = vld [vmem:[#allocation40_spill] sm:$0xff]  ;;  %v11750_v47 = vld [vmem:[#allocation39_spill] sm:$0xff]  ;;  %v11766_v57 = vld [vmem:[#allocation25_spill] sm:$0xff] }
 0x466   : > { %6732 = vmatprep.mubr.msk.bf16.mxu1 %vm1164_vm0, %v4459_v35  ;;  %6804 = vmatprep.mubr.msk.bf16.mxu0 %vm1164_vm0, %v5061_v31  ;;  %v3634_v9 = vpop.xlane.xlu1 %3633  ;;  %7461 = vrcp.f32 %v3761_v21  ;;  %v5015_v24 = vpop.permute.xlu0 %5014  ;;  %v11751_v35 = vld [vmem:[#allocation8_spill] sm:$0xff]  ;;  %v11752_v31 = vld [vmem:[#allocation41_spill] sm:$0xff] }
 0x467   : > { %v7456_v18 = vpop.eup %7455  ;;  %v11770_v21 = vld [vmem:[#allocation29_spill] sm:$0xff] }
 0x468   : > { %v4240_v46 = vmul.f32 %v7456_v18, %v10595_v15  ;;  %v11755_v18 = vld [vmem:[#allocation10_spill] sm:$0xff] }
 0x46a   : > { %v4442_v19 = vmul.f32 %v10333_v25, %v4240_v46  ;;  %v5044_v4 = vmul.f32 %v10340_v49, %v4240_v46  ;;  %v3730_v45 = vpop.xlane.xlu1 %3729  ;;  %v11757_v46 = vld [vmem:[#allocation16_spill] sm:$0xff] }
 0x46b   : > { %v7458_v34 = vpop.eup %7457  ;;  %v3762_v41 = vadd.f32 %v3730_v45, %v3634_v9  ;;  %v11763_v9 = vld [vmem:[#allocation4_spill] sm:$0xff] }
 0x46c   : > { %v4460_v43 = vpack.c.bf16 %v4442_v19, %v4441_v51  ;;  %v5062_v10 = vpack.c.bf16 %v5044_v4, %v5043_v16  ;;  %v4241_v60 = vmul.f32 %v7458_v34, %v10604_v22  ;;  %v11758_v51 = vld [vmem:[#allocation15_spill] sm:$0xff]  ;;  %v11760_v19 = vld [vmem:[#allocation13_spill] sm:$0xff]  ;;  %v11761_v4 = vld [vmem:[#allocation20_spill] sm:$0xff] }
 0x46d   : > { %7463 = vrcp.f32 %v3762_v41  ;;  %v11759_v16 = vld [vmem:[#allocation19_spill] sm:$0xff]  ;;  %v11762_v34 = vld [vmem:[#allocation14_spill] sm:$0xff]  ;;  %v11771_v45 = vld [vmem:[#allocation28_spill] sm:$0xff] }
 0x46e   : > { %6733 = vmatmul.mubr.msk.bf16.gmra.mrb[232].mxu1 %vm1164_vm0, %v4460_v43  ;;  %6805 = vmatmul.mubr.msk.bf16.gmra.mrb[232].mxu0 %vm1164_vm0, %v5062_v10  ;;  %v4443_v25 = vmul.f32 %v10394_v2, %v4241_v60  ;;  %v5045_v54 = vmul.f32 %v11741_v48, %v4241_v60  ;;  %v5010_v50 = vpop.permute.xlu1 %5009  ;;  %v11764_v43 = vld [vmem:[#allocation23_spill] sm:$0xff]  ;;  %v11765_v10 = vld [vmem:[#allocation6_spill] sm:$0xff]  ;;  %v11767_v60 = vld [vmem:[#allocation24_spill] sm:$0xff] }
 0x46f   : > { %v7460_v15 = vpop.eup %7459  ;;  %v11774_v48 = vld [vmem:[#allocation33_spill] sm:$0xff]  ;;  %v10733_v41 = vld [vmem:[%s11016_s12] ss:$0 sm:$0xff] }
 0x470   : > { %v4242_v33 = vmul.f32 %v7460_v15, %v10610_v36  ;;  %v7462_v30 = vpop.eup %7461  ;;  %v11768_v15 = vld [vmem:[#allocation26_spill] sm:$0xff] }
 0x472   : > { %v4444_v49 = vmul.f32 %v10347_v6, %v4242_v33  ;;  %v5046_v17 = vmul.f32 %v11742_v12, %v4242_v33  ;;  %v11769_v33 = vld [vmem:[#allocation27_spill] sm:$0xff]  ;;  %v11776_v12 = vld [vmem:[#allocation34_spill] sm:$0xff] }
 0x474   : > { %v4461_v14 = vpack.c.bf16 %v4444_v49, %v4443_v25  ;;  %v5063_v38 = vpack.c.bf16 %v5046_v17, %v5045_v54  ;;  %v11772_v25 = vld [vmem:[#allocation30_spill] sm:$0xff]  ;;  %v11773_v49 = vld [vmem:[#allocation31_spill] sm:$0xff]  ;;  %v11775_v54 = vld [vmem:[#allocation32_spill] sm:$0xff] }
 0x475   : > { %v10728_v17 = vld [vmem:[%s11015_s11] ss:$0 sm:$0xff] }
 0x476   : > { %6736 = vmatprep.mubr.msk.bf16.mxu1 %vm1164_vm0, %v4461_v14  ;;  %6808 = vmatprep.mubr.msk.bf16.mxu0 %vm1164_vm0, %v5063_v38 }
 0x477   : > { %v7464_v55 = vpop.eup %7463 }
 0x47a   : > { %v6446_v22 = vpop.f32.mrb[204].mxu0 }
 0x47b   : > { %v6447_v36 = vpop.f32.mrb[205].mxu0 }
 0x47c   : > { %v6334_v11 = vpop.f32.mrb[204].mxu1  ;;  %v6448_v40 = vadd.f32 %v6447_v36, %v6446_v22  ;;  %v6449_v2 = vpop.f32.mrb[206].mxu0 }
 0x47d   : > { %v6335_v27 = vpop.f32.mrb[205].mxu1  ;;  %v6450_v6 = vpop.f32.mrb[207].mxu0 }
 0x47e   : > { %v6336_v7 = vadd.f32 %v6335_v27, %v6334_v11  ;;  %v6337_v8 = vpop.f32.mrb[206].mxu1  ;;  %v6451_v5 = vadd.f32 %v6450_v6, %v6449_v2 }
 0x47f   : > { %v6338_v63 = vpop.f32.mrb[207].mxu1 }
 0x480   : > { %v4207_v42 = vadd.f32 %v6448_v40, %v6336_v7  ;;  %v6339_v3 = vadd.f32 %v6338_v63, %v6337_v8 }
 0x482   : > { %v4243_v20 = vmul.f32 %v7462_v30, %v4207_v42  ;;  %v4210_v29 = vadd.f32 %v6451_v5, %v6339_v3 }
 0x484   : > { %v4244_v52 = vmul.f32 %v7464_v55, %v4210_v29  ;;  %v4445_v44 = vmul.f32 %v11743_v28, %v4243_v20  ;;  %v5047_v26 = vmul.f32 %v5010_v50, %v4243_v20 }
 0x486   : > { %v4446_v59 = vmul.f32 %v11744_v32, %v4244_v52  ;;  %v5048_v56 = vmul.f32 %v5015_v24, %v4244_v52 }
 0x488   : > { %v4462_v53 = vpack.c.bf16 %v4446_v59, %v4445_v44  ;;  %v5064_v61 = vpack.c.bf16 %v5048_v56, %v5047_v26 }
 0x48a   : > { %6737 = vmatmul.mubr.msk.bf16.gmra.mrb[236].mxu1 %vm1164_vm0, %v4462_v53  ;;  %6809 = vmatmul.mubr.msk.bf16.gmra.mrb[236].mxu0 %vm1164_vm0, %v5064_v61 }
 0x48b   : > { %6744 = vmatprep.mubr.msk.bf16.mxu1 %vm1164_vm0, %v11745_v1  ;;  %6816 = vmatprep.mubr.msk.bf16.mxu0 %vm1164_vm0, %v11746_v0 }
 0x492   : > { %6745 = vmatmul.mubr.msk.bf16.vlgmr.msra.gmra.mrb[208].mxu1 %vm1164_vm0, %v11747_v13  ;;  %6817 = vmatmul.mubr.msk.bf16.vlgmr.msra.gmra.mrb[208].mxu0 %vm1164_vm0, %v11748_v23 }
 0x493   : > { %6748 = vmatprep.mubr.msk.bf16.mxu1 %vm1164_vm0, %v11749_v39  ;;  %6820 = vmatprep.mubr.msk.bf16.mxu0 %vm1164_vm0, %v11750_v47 }
 0x49a   : > { %6749 = vmatmul.mubr.msk.bf16.gmra.mrb[212].mxu1 %vm1164_vm0, %v11751_v35  ;;  %6821 = vmatmul.mubr.msk.bf16.gmra.mrb[212].mxu0 %vm1164_vm0, %v11752_v31 }
 0x49b   : > { %6752 = vmatprep.mubr.msk.bf16.mxu1 %vm1164_vm0, %v11753_v58  ;;  %6824 = vmatprep.mubr.msk.bf16.mxu0 %vm1164_vm0, %v11754_v37 }
 0x4a2   : > { %6753 = vmatmul.mubr.msk.bf16.gmra.mrb[216].mxu1 %vm1164_vm0, %v11755_v18  ;;  %6825 = vmatmul.mubr.msk.bf16.gmra.mrb[216].mxu0 %vm1164_vm0, %v11756_v62 }
 0x4a3   : > { %6756 = vmatprep.mubr.msk.bf16.mxu1 %vm1164_vm0, %v11757_v46  ;;  %6828 = vmatprep.mubr.msk.bf16.mxu0 %vm1164_vm0, %v11758_v51 }
 0x4aa   : > { %6757 = vmatmul.mubr.msk.bf16.gmra.mrb[220].mxu1 %vm1164_vm0, %v11759_v16  ;;  %6829 = vmatmul.mubr.msk.bf16.gmra.mrb[220].mxu0 %vm1164_vm0, %v11760_v19 }
 0x4ab   : > { %6760 = vmatprep.mubr.msk.bf16.mxu1 %vm1164_vm0, %v11761_v4  ;;  %6832 = vmatprep.mubr.msk.bf16.mxu0 %vm1164_vm0, %v11762_v34 }
 0x4b2   : > { %6761 = vmatmul.mubr.msk.bf16.gmra.mrb[224].mxu1 %vm1164_vm0, %v11763_v9  ;;  %6833 = vmatmul.mubr.msk.bf16.gmra.mrb[224].mxu0 %vm1164_vm0, %v11764_v43 }
 0x4b3   : > { %6764 = vmatprep.mubr.msk.bf16.mxu1 %vm1164_vm0, %v11765_v10  ;;  %6836 = vmatprep.mubr.msk.bf16.mxu0 %vm1164_vm0, %v11766_v57 }
 0x4ba   : > { %6765 = vmatmul.mubr.msk.bf16.gmra.mrb[228].mxu1 %vm1164_vm0, %v11767_v60  ;;  %6837 = vmatmul.mubr.msk.bf16.gmra.mrb[228].mxu0 %vm1164_vm0, %v11768_v15 }
 0x4bb   : > { %6768 = vmatprep.mubr.msk.bf16.mxu1 %vm1164_vm0, %v11769_v33  ;;  %6840 = vmatprep.mubr.msk.bf16.mxu0 %vm1164_vm0, %v11770_v21 }
 0x4c2   : > { %6769 = vmatmul.mubr.msk.bf16.gmra.mrb[232].mxu1 %vm1164_vm0, %v11771_v45  ;;  %6841 = vmatmul.mubr.msk.bf16.gmra.mrb[232].mxu0 %vm1164_vm0, %v11772_v25 }
 0x4c3   : > { %6772 = vmatprep.mubr.msk.bf16.mxu1 %vm1164_vm0, %v11773_v49  ;;  %6844 = vmatprep.mubr.msk.bf16.mxu0 %vm1164_vm0, %v11774_v48 }
 0x4ca   : > { %6773 = vmatmul.mubr.msk.bf16.gmra.mrb[236].mxu1 %vm1164_vm0, %v11775_v54  ;;  %6845 = vmatmul.mubr.msk.bf16.gmra.mrb[236].mxu0 %vm1164_vm0, %v11776_v12 }
 0x565   : > { %v6746_v14 = vpop.f32.mrb[208].mxu1  ;;  %v6818_v38 = vpop.f32.mrb[208].mxu0 }
 0x566   : > { %v5443_v22 = vmul.f32 %v6746_v14, %v10728_v17  ;;  %v5577_v36 = vmul.f32 %v6818_v38, %v10728_v17  ;;  %v4730_v11 = vpop.f32.mrb[209].mxu1  ;;  %v5308_v40 = vpop.f32.mrb[209].mxu0 }
 0x567   : > { %v5441_v2 = vmul.f32 %v10728_v17, %v4730_v11  ;;  %v5575_v27 = vmul.f32 %v10728_v17, %v5308_v40  ;;  %v6747_v6 = vpop.f32.mrb[210].mxu1  ;;  %v6819_v7 = vpop.f32.mrb[210].mxu0 }
 0x568   : > { %v5481_v8 = vadd.f32 %v10733_v41, %v5443_v22  ;;  %v5609_v5 = vadd.f32 %v10733_v41, %v5577_v36  ;;  %v5444_v63 = vmul.f32 %v6747_v6, %v10728_v17  ;;  %v5578_v42 = vmul.f32 %v6819_v7, %v10728_v17  ;;  %v4733_v3 = vpop.f32.mrb[211].mxu1  ;;  %v5311_v30 = vpop.f32.mrb[211].mxu0 }
 0x569   : > { %v5479_v20 = vadd.f32 %v10733_v41, %v5441_v2  ;;  %v5607_v29 = vadd.f32 %v10733_v41, %v5575_v27  ;;  %v5442_v55 = vmul.f32 %v10728_v17, %v4733_v3  ;;  %v5576_v52 = vmul.f32 %v10728_v17, %v5311_v30 }
 0x56a   : > { %v5513_v24 = vmax.f32 %v5481_v8, 0.0  ;;  %v5641_v50 = vmax.f32 %v5609_v5, 0.0  ;;  %v5482_v28 = vadd.f32 %v10733_v41, %v5444_v63  ;;  %v5610_v44 = vadd.f32 %v10733_v41, %v5578_v42 }
 0x56b   : > { %v5511_v26 = vmax.f32 %v5479_v20, 0.0  ;;  %v5639_v32 = vmax.f32 %v5607_v29, 0.0  ;;  %v5480_v59 = vadd.f32 %v10733_v41, %v5442_v55  ;;  %v5608_v56 = vadd.f32 %v10733_v41, %v5576_v52 }
 0x56c   : > { %5545 = vst.msk [vmem:[%s10746_s22 + $0x10] sm:$0xff] %vm1164_vm0, %v5513_v24  ;;  %5673 = vst.msk [vmem:[%s10751_s25 + $0x10] sm:$0xff] %vm1164_vm0, %v5641_v50  ;;  %v5514_v53 = vmax.f32 %v5482_v28, 0.0  ;;  %v5642_v61 = vmax.f32 %v5610_v44, 0.0 }
 0x56d   : > { %5543 = vst.msk [vmem:[%s10746_s22] sm:$0xff] %vm1164_vm0, %v5511_v26  ;;  %5671 = vst.msk [vmem:[%s10751_s25] sm:$0xff] %vm1164_vm0, %v5639_v32  ;;  %v5512_v1 = vmax.f32 %v5480_v59, 0.0  ;;  %v5640_v0 = vmax.f32 %v5608_v56, 0.0  ;;  %v6750_v13 = vpop.f32.mrb[212].mxu1  ;;  %v6822_v23 = vpop.f32.mrb[212].mxu0 }
 0x56e   : > { %5546 = vst.msk [vmem:[%s10746_s22 + $0x18] sm:$0xff] %vm1164_vm0, %v5514_v53  ;;  %5674 = vst.msk [vmem:[%s10751_s25 + $0x18] sm:$0xff] %vm1164_vm0, %v5642_v61  ;;  %v5447_v39 = vmul.f32 %v6750_v13, %v10728_v17  ;;  %v5581_v47 = vmul.f32 %v6822_v23, %v10728_v17  ;;  %v4746_v35 = vpop.f32.mrb[213].mxu1  ;;  %v5324_v31 = vpop.f32.mrb[213].mxu0 }
 0x56f   : > { %5544 = vst.msk [vmem:[%s10746_s22 + $0x8] sm:$0xff] %vm1164_vm0, %v5512_v1  ;;  %5672 = vst.msk [vmem:[%s10751_s25 + $0x8] sm:$0xff] %vm1164_vm0, %v5640_v0  ;;  %v5445_v58 = vmul.f32 %v10728_v17, %v4746_v35  ;;  %v5579_v37 = vmul.f32 %v10728_v17, %v5324_v31  ;;  %v6751_v18 = vpop.f32.mrb[214].mxu1  ;;  %v6823_v62 = vpop.f32.mrb[214].mxu0 }
 0x570   : > { %v5485_v46 = vadd.f32 %v10733_v41, %v5447_v39  ;;  %v5613_v51 = vadd.f32 %v10733_v41, %v5581_v47  ;;  %v5448_v16 = vmul.f32 %v6751_v18, %v10728_v17  ;;  %v5582_v19 = vmul.f32 %v6823_v62, %v10728_v17  ;;  %v4749_v4 = vpop.f32.mrb[215].mxu1  ;;  %v5327_v34 = vpop.f32.mrb[215].mxu0 }
 0x571   : > { %v5483_v9 = vadd.f32 %v10733_v41, %v5445_v58  ;;  %v5611_v43 = vadd.f32 %v10733_v41, %v5579_v37  ;;  %v5446_v10 = vmul.f32 %v10728_v17, %v4749_v4  ;;  %v5580_v57 = vmul.f32 %v10728_v17, %v5327_v34 }
 0x572   : > { %v5517_v60 = vmax.f32 %v5485_v46, 0.0  ;;  %v5645_v15 = vmax.f32 %v5613_v51, 0.0  ;;  %v5486_v33 = vadd.f32 %v10733_v41, %v5448_v16  ;;  %v5614_v21 = vadd.f32 %v10733_v41, %v5582_v19 }
 0x573   : > { %v5515_v45 = vmax.f32 %v5483_v9, 0.0  ;;  %v5643_v25 = vmax.f32 %v5611_v43, 0.0  ;;  %v5484_v49 = vadd.f32 %v10733_v41, %v5446_v10  ;;  %v5612_v48 = vadd.f32 %v10733_v41, %v5580_v57 }
 0x574   : > { %5549 = vst.msk [vmem:[%s10746_s22 + $0x30] sm:$0xff] %vm1164_vm0, %v5517_v60  ;;  %5677 = vst.msk [vmem:[%s10751_s25 + $0x30] sm:$0xff] %vm1164_vm0, %v5645_v15  ;;  %v5518_v54 = vmax.f32 %v5486_v33, 0.0  ;;  %v5646_v12 = vmax.f32 %v5614_v21, 0.0 }
 0x575   : > { %5547 = vst.msk [vmem:[%s10746_s22 + $0x20] sm:$0xff] %vm1164_vm0, %v5515_v45  ;;  %5675 = vst.msk [vmem:[%s10751_s25 + $0x20] sm:$0xff] %vm1164_vm0, %v5643_v25  ;;  %v5516_v14 = vmax.f32 %v5484_v49, 0.0  ;;  %v5644_v38 = vmax.f32 %v5612_v48, 0.0  ;;  %v6754_v22 = vpop.f32.mrb[216].mxu1  ;;  %v6826_v36 = vpop.f32.mrb[216].mxu0 }
 0x576   : > { %5550 = vst.msk [vmem:[%s10746_s22 + $0x38] sm:$0xff] %vm1164_vm0, %v5518_v54  ;;  %5678 = vst.msk [vmem:[%s10751_s25 + $0x38] sm:$0xff] %vm1164_vm0, %v5646_v12  ;;  %v5451_v11 = vmul.f32 %v6754_v22, %v10728_v17  ;;  %v5585_v40 = vmul.f32 %v6826_v36, %v10728_v17  ;;  %v4762_v2 = vpop.f32.mrb[217].mxu1  ;;  %v5340_v27 = vpop.f32.mrb[217].mxu0 }
 0x577   : > { %5548 = vst.msk [vmem:[%s10746_s22 + $0x28] sm:$0xff] %vm1164_vm0, %v5516_v14  ;;  %5676 = vst.msk [vmem:[%s10751_s25 + $0x28] sm:$0xff] %vm1164_vm0, %v5644_v38  ;;  %v5449_v6 = vmul.f32 %v10728_v17, %v4762_v2  ;;  %v5583_v7 = vmul.f32 %v10728_v17, %v5340_v27  ;;  %v6755_v8 = vpop.f32.mrb[218].mxu1  ;;  %v6827_v5 = vpop.f32.mrb[218].mxu0 }
 0x578   : > { %v5489_v63 = vadd.f32 %v10733_v41, %v5451_v11  ;;  %v5617_v42 = vadd.f32 %v10733_v41, %v5585_v40  ;;  %v5452_v3 = vmul.f32 %v6755_v8, %v10728_v17  ;;  %v5586_v30 = vmul.f32 %v6827_v5, %v10728_v17  ;;  %v4765_v20 = vpop.f32.mrb[219].mxu1  ;;  %v5343_v29 = vpop.f32.mrb[219].mxu0 }
 0x579   : > { %v5487_v55 = vadd.f32 %v10733_v41, %v5449_v6  ;;  %v5615_v52 = vadd.f32 %v10733_v41, %v5583_v7  ;;  %v5450_v24 = vmul.f32 %v10728_v17, %v4765_v20  ;;  %v5584_v50 = vmul.f32 %v10728_v17, %v5343_v29 }
 0x57a   : > { %v5521_v28 = vmax.f32 %v5489_v63, 0.0  ;;  %v5649_v44 = vmax.f32 %v5617_v42, 0.0  ;;  %v5490_v26 = vadd.f32 %v10733_v41, %v5452_v3  ;;  %v5618_v32 = vadd.f32 %v10733_v41, %v5586_v30 }
 0x57b   : > { %v5519_v59 = vmax.f32 %v5487_v55, 0.0  ;;  %v5647_v56 = vmax.f32 %v5615_v52, 0.0  ;;  %v5488_v53 = vadd.f32 %v10733_v41, %v5450_v24  ;;  %v5616_v61 = vadd.f32 %v10733_v41, %v5584_v50 }
 0x57c   : > { %5553 = vst.msk [vmem:[%s10746_s22 + $0x50] sm:$0xff] %vm1164_vm0, %v5521_v28  ;;  %5681 = vst.msk [vmem:[%s10751_s25 + $0x50] sm:$0xff] %vm1164_vm0, %v5649_v44  ;;  %v5522_v1 = vmax.f32 %v5490_v26, 0.0  ;;  %v5650_v0 = vmax.f32 %v5618_v32, 0.0 }
 0x57d   : > { %5551 = vst.msk [vmem:[%s10746_s22 + $0x40] sm:$0xff] %vm1164_vm0, %v5519_v59  ;;  %5679 = vst.msk [vmem:[%s10751_s25 + $0x40] sm:$0xff] %vm1164_vm0, %v5647_v56  ;;  %v5520_v13 = vmax.f32 %v5488_v53, 0.0  ;;  %v5648_v23 = vmax.f32 %v5616_v61, 0.0  ;;  %v6758_v39 = vpop.f32.mrb[220].mxu1  ;;  %v6830_v47 = vpop.f32.mrb[220].mxu0 }
 0x57e   : > { %5554 = vst.msk [vmem:[%s10746_s22 + $0x58] sm:$0xff] %vm1164_vm0, %v5522_v1  ;;  %5682 = vst.msk [vmem:[%s10751_s25 + $0x58] sm:$0xff] %vm1164_vm0, %v5650_v0  ;;  %v5455_v35 = vmul.f32 %v6758_v39, %v10728_v17  ;;  %v5589_v31 = vmul.f32 %v6830_v47, %v10728_v17  ;;  %v4778_v58 = vpop.f32.mrb[221].mxu1  ;;  %v5356_v37 = vpop.f32.mrb[221].mxu0 }
 0x57f   : > { %5552 = vst.msk [vmem:[%s10746_s22 + $0x48] sm:$0xff] %vm1164_vm0, %v5520_v13  ;;  %5680 = vst.msk [vmem:[%s10751_s25 + $0x48] sm:$0xff] %vm1164_vm0, %v5648_v23  ;;  %v5453_v18 = vmul.f32 %v10728_v17, %v4778_v58  ;;  %v5587_v62 = vmul.f32 %v10728_v17, %v5356_v37  ;;  %v6759_v46 = vpop.f32.mrb[222].mxu1  ;;  %v6831_v51 = vpop.f32.mrb[222].mxu0 }
 0x580   : > { %v5493_v16 = vadd.f32 %v10733_v41, %v5455_v35  ;;  %v5621_v19 = vadd.f32 %v10733_v41, %v5589_v31  ;;  %v5456_v4 = vmul.f32 %v6759_v46, %v10728_v17  ;;  %v5590_v34 = vmul.f32 %v6831_v51, %v10728_v17  ;;  %v4781_v9 = vpop.f32.mrb[223].mxu1  ;;  %v5359_v43 = vpop.f32.mrb[223].mxu0 }
 0x581   : > { %v5491_v10 = vadd.f32 %v10733_v41, %v5453_v18  ;;  %v5619_v57 = vadd.f32 %v10733_v41, %v5587_v62  ;;  %v5454_v60 = vmul.f32 %v10728_v17, %v4781_v9  ;;  %v5588_v15 = vmul.f32 %v10728_v17, %v5359_v43 }
 0x582   : > { %v5525_v33 = vmax.f32 %v5493_v16, 0.0  ;;  %v5653_v21 = vmax.f32 %v5621_v19, 0.0  ;;  %v5494_v45 = vadd.f32 %v10733_v41, %v5456_v4  ;;  %v5622_v25 = vadd.f32 %v10733_v41, %v5590_v34 }
 0x583   : > { %v5523_v49 = vmax.f32 %v5491_v10, 0.0  ;;  %v5651_v48 = vmax.f32 %v5619_v57, 0.0  ;;  %v5492_v54 = vadd.f32 %v10733_v41, %v5454_v60  ;;  %v5620_v12 = vadd.f32 %v10733_v41, %v5588_v15 }
 0x584   : > { %5557 = vst.msk [vmem:[%s10746_s22 + $0x70] sm:$0xff] %vm1164_vm0, %v5525_v33  ;;  %5685 = vst.msk [vmem:[%s10751_s25 + $0x70] sm:$0xff] %vm1164_vm0, %v5653_v21  ;;  %v5526_v14 = vmax.f32 %v5494_v45, 0.0  ;;  %v5654_v38 = vmax.f32 %v5622_v25, 0.0 }
 0x585   : > { %5555 = vst.msk [vmem:[%s10746_s22 + $0x60] sm:$0xff] %vm1164_vm0, %v5523_v49  ;;  %5683 = vst.msk [vmem:[%s10751_s25 + $0x60] sm:$0xff] %vm1164_vm0, %v5651_v48  ;;  %v5524_v22 = vmax.f32 %v5492_v54, 0.0  ;;  %v5652_v36 = vmax.f32 %v5620_v12, 0.0  ;;  %v6762_v11 = vpop.f32.mrb[224].mxu1  ;;  %v6834_v40 = vpop.f32.mrb[224].mxu0 }
 0x586   : > { %5558 = vst.msk [vmem:[%s10746_s22 + $0x78] sm:$0xff] %vm1164_vm0, %v5526_v14  ;;  %5686 = vst.msk [vmem:[%s10751_s25 + $0x78] sm:$0xff] %vm1164_vm0, %v5654_v38  ;;  %v5459_v2 = vmul.f32 %v6762_v11, %v10728_v17  ;;  %v5593_v27 = vmul.f32 %v6834_v40, %v10728_v17  ;;  %v4794_v6 = vpop.f32.mrb[225].mxu1  ;;  %v5372_v7 = vpop.f32.mrb[225].mxu0 }
 0x587   : > { %5556 = vst.msk [vmem:[%s10746_s22 + $0x68] sm:$0xff] %vm1164_vm0, %v5524_v22  ;;  %5684 = vst.msk [vmem:[%s10751_s25 + $0x68] sm:$0xff] %vm1164_vm0, %v5652_v36  ;;  %v5457_v8 = vmul.f32 %v10728_v17, %v4794_v6  ;;  %v5591_v5 = vmul.f32 %v10728_v17, %v5372_v7  ;;  %v6763_v63 = vpop.f32.mrb[226].mxu1  ;;  %v6835_v42 = vpop.f32.mrb[226].mxu0 }
 0x588   : > { %v5497_v3 = vadd.f32 %v10733_v41, %v5459_v2  ;;  %v5625_v30 = vadd.f32 %v10733_v41, %v5593_v27  ;;  %v5460_v20 = vmul.f32 %v6763_v63, %v10728_v17  ;;  %v5594_v29 = vmul.f32 %v6835_v42, %v10728_v17  ;;  %v4797_v55 = vpop.f32.mrb[227].mxu1  ;;  %v5375_v52 = vpop.f32.mrb[227].mxu0 }
 0x589   : > { %v5495_v24 = vadd.f32 %v10733_v41, %v5457_v8  ;;  %v5623_v50 = vadd.f32 %v10733_v41, %v5591_v5  ;;  %v5458_v28 = vmul.f32 %v10728_v17, %v4797_v55  ;;  %v5592_v44 = vmul.f32 %v10728_v17, %v5375_v52 }
 0x58a   : > { %v5529_v26 = vmax.f32 %v5497_v3, 0.0  ;;  %v5657_v32 = vmax.f32 %v5625_v30, 0.0  ;;  %v5498_v59 = vadd.f32 %v10733_v41, %v5460_v20  ;;  %v5626_v56 = vadd.f32 %v10733_v41, %v5594_v29 }
 0x58b   : > { %v5527_v53 = vmax.f32 %v5495_v24, 0.0  ;;  %v5655_v61 = vmax.f32 %v5623_v50, 0.0  ;;  %v5496_v1 = vadd.f32 %v10733_v41, %v5458_v28  ;;  %v5624_v0 = vadd.f32 %v10733_v41, %v5592_v44 }
 0x58c   : > { %5561 = vst.msk [vmem:[%s10746_s22 + $0x90] sm:$0xff] %vm1164_vm0, %v5529_v26  ;;  %5689 = vst.msk [vmem:[%s10751_s25 + $0x90] sm:$0xff] %vm1164_vm0, %v5657_v32  ;;  %v5530_v13 = vmax.f32 %v5498_v59, 0.0  ;;  %v5658_v23 = vmax.f32 %v5626_v56, 0.0 }
 0x58d   : > { %5559 = vst.msk [vmem:[%s10746_s22 + $0x80] sm:$0xff] %vm1164_vm0, %v5527_v53  ;;  %5687 = vst.msk [vmem:[%s10751_s25 + $0x80] sm:$0xff] %vm1164_vm0, %v5655_v61  ;;  %v5528_v39 = vmax.f32 %v5496_v1, 0.0  ;;  %v5656_v47 = vmax.f32 %v5624_v0, 0.0  ;;  %v6766_v35 = vpop.f32.mrb[228].mxu1  ;;  %v6838_v31 = vpop.f32.mrb[228].mxu0 }
 0x58e   : > { %5562 = vst.msk [vmem:[%s10746_s22 + $0x98] sm:$0xff] %vm1164_vm0, %v5530_v13  ;;  %5690 = vst.msk [vmem:[%s10751_s25 + $0x98] sm:$0xff] %vm1164_vm0, %v5658_v23  ;;  %v5463_v58 = vmul.f32 %v6766_v35, %v10728_v17  ;;  %v5597_v37 = vmul.f32 %v6838_v31, %v10728_v17  ;;  %v4810_v18 = vpop.f32.mrb[229].mxu1  ;;  %v5388_v62 = vpop.f32.mrb[229].mxu0 }
 0x58f   : > { %5560 = vst.msk [vmem:[%s10746_s22 + $0x88] sm:$0xff] %vm1164_vm0, %v5528_v39  ;;  %5688 = vst.msk [vmem:[%s10751_s25 + $0x88] sm:$0xff] %vm1164_vm0, %v5656_v47  ;;  %v5461_v46 = vmul.f32 %v10728_v17, %v4810_v18  ;;  %v5595_v51 = vmul.f32 %v10728_v17, %v5388_v62  ;;  %v6767_v16 = vpop.f32.mrb[230].mxu1  ;;  %v6839_v19 = vpop.f32.mrb[230].mxu0 }
 0x590   : > { %v5501_v4 = vadd.f32 %v10733_v41, %v5463_v58  ;;  %v5629_v34 = vadd.f32 %v10733_v41, %v5597_v37  ;;  %v5464_v9 = vmul.f32 %v6767_v16, %v10728_v17  ;;  %v5598_v43 = vmul.f32 %v6839_v19, %v10728_v17  ;;  %v4813_v10 = vpop.f32.mrb[231].mxu1  ;;  %v5391_v57 = vpop.f32.mrb[231].mxu0 }
 0x591   : > { %v5499_v60 = vadd.f32 %v10733_v41, %v5461_v46  ;;  %v5627_v15 = vadd.f32 %v10733_v41, %v5595_v51  ;;  %v5462_v33 = vmul.f32 %v10728_v17, %v4813_v10  ;;  %v5596_v21 = vmul.f32 %v10728_v17, %v5391_v57 }
 0x592   : > { %v5533_v45 = vmax.f32 %v5501_v4, 0.0  ;;  %v5661_v25 = vmax.f32 %v5629_v34, 0.0  ;;  %v5502_v49 = vadd.f32 %v10733_v41, %v5464_v9  ;;  %v5630_v48 = vadd.f32 %v10733_v41, %v5598_v43 }
 0x593   : > { %v5531_v54 = vmax.f32 %v5499_v60, 0.0  ;;  %v5659_v12 = vmax.f32 %v5627_v15, 0.0  ;;  %v5500_v14 = vadd.f32 %v10733_v41, %v5462_v33  ;;  %v5628_v38 = vadd.f32 %v10733_v41, %v5596_v21 }
 0x594   : > { %5565 = vst.msk [vmem:[%s10746_s22 + $0xb0] sm:$0xff] %vm1164_vm0, %v5533_v45  ;;  %5693 = vst.msk [vmem:[%s10751_s25 + $0xb0] sm:$0xff] %vm1164_vm0, %v5661_v25  ;;  %v5534_v22 = vmax.f32 %v5502_v49, 0.0  ;;  %v5662_v36 = vmax.f32 %v5630_v48, 0.0 }
 0x595   : > { %5563 = vst.msk [vmem:[%s10746_s22 + $0xa0] sm:$0xff] %vm1164_vm0, %v5531_v54  ;;  %5691 = vst.msk [vmem:[%s10751_s25 + $0xa0] sm:$0xff] %vm1164_vm0, %v5659_v12  ;;  %v5532_v11 = vmax.f32 %v5500_v14, 0.0  ;;  %v5660_v40 = vmax.f32 %v5628_v38, 0.0  ;;  %v6770_v2 = vpop.f32.mrb[232].mxu1  ;;  %v6842_v27 = vpop.f32.mrb[232].mxu0 }
 0x596   : > { %5566 = vst.msk [vmem:[%s10746_s22 + $0xb8] sm:$0xff] %vm1164_vm0, %v5534_v22  ;;  %5694 = vst.msk [vmem:[%s10751_s25 + $0xb8] sm:$0xff] %vm1164_vm0, %v5662_v36  ;;  %v5467_v6 = vmul.f32 %v6770_v2, %v10728_v17  ;;  %v5601_v7 = vmul.f32 %v6842_v27, %v10728_v17  ;;  %v4826_v8 = vpop.f32.mrb[233].mxu1  ;;  %v5404_v5 = vpop.f32.mrb[233].mxu0 }
 0x597   : > { %5564 = vst.msk [vmem:[%s10746_s22 + $0xa8] sm:$0xff] %vm1164_vm0, %v5532_v11  ;;  %5692 = vst.msk [vmem:[%s10751_s25 + $0xa8] sm:$0xff] %vm1164_vm0, %v5660_v40  ;;  %v5465_v63 = vmul.f32 %v10728_v17, %v4826_v8  ;;  %v5599_v42 = vmul.f32 %v10728_v17, %v5404_v5  ;;  %v6771_v3 = vpop.f32.mrb[234].mxu1  ;;  %v6843_v30 = vpop.f32.mrb[234].mxu0 }
 0x598   : > { %v5505_v20 = vadd.f32 %v10733_v41, %v5467_v6  ;;  %v5633_v29 = vadd.f32 %v10733_v41, %v5601_v7  ;;  %v5468_v55 = vmul.f32 %v6771_v3, %v10728_v17  ;;  %v5602_v52 = vmul.f32 %v6843_v30, %v10728_v17  ;;  %v4829_v24 = vpop.f32.mrb[235].mxu1  ;;  %v5407_v50 = vpop.f32.mrb[235].mxu0 }
 0x599   : > { %v5503_v28 = vadd.f32 %v10733_v41, %v5465_v63  ;;  %v5631_v44 = vadd.f32 %v10733_v41, %v5599_v42  ;;  %v5466_v26 = vmul.f32 %v10728_v17, %v4829_v24  ;;  %v5600_v32 = vmul.f32 %v10728_v17, %v5407_v50 }
 0x59a   : > { %v5537_v59 = vmax.f32 %v5505_v20, 0.0  ;;  %v5665_v56 = vmax.f32 %v5633_v29, 0.0  ;;  %v5506_v53 = vadd.f32 %v10733_v41, %v5468_v55  ;;  %v5634_v61 = vadd.f32 %v10733_v41, %v5602_v52 }
 0x59b   : > { %v5535_v1 = vmax.f32 %v5503_v28, 0.0  ;;  %v5663_v0 = vmax.f32 %v5631_v44, 0.0  ;;  %v5504_v13 = vadd.f32 %v10733_v41, %v5466_v26  ;;  %v5632_v23 = vadd.f32 %v10733_v41, %v5600_v32 }
 0x59c   : > { %5569 = vst.msk [vmem:[%s10746_s22 + $0xd0] sm:$0xff] %vm1164_vm0, %v5537_v59  ;;  %5697 = vst.msk [vmem:[%s10751_s25 + $0xd0] sm:$0xff] %vm1164_vm0, %v5665_v56  ;;  %v5538_v39 = vmax.f32 %v5506_v53, 0.0  ;;  %v5666_v47 = vmax.f32 %v5634_v61, 0.0 }
 0x59d   : > { %5567 = vst.msk [vmem:[%s10746_s22 + $0xc0] sm:$0xff] %vm1164_vm0, %v5535_v1  ;;  %5695 = vst.msk [vmem:[%s10751_s25 + $0xc0] sm:$0xff] %vm1164_vm0, %v5663_v0  ;;  %v5536_v35 = vmax.f32 %v5504_v13, 0.0  ;;  %v5664_v31 = vmax.f32 %v5632_v23, 0.0  ;;  %v6774_v58 = vpop.f32.mrb[236].mxu1  ;;  %v6846_v37 = vpop.f32.mrb[236].mxu0 }
 0x59e   : > { %5570 = vst.msk [vmem:[%s10746_s22 + $0xd8] sm:$0xff] %vm1164_vm0, %v5538_v39  ;;  %5698 = vst.msk [vmem:[%s10751_s25 + $0xd8] sm:$0xff] %vm1164_vm0, %v5666_v47  ;;  %v5471_v18 = vmul.f32 %v6774_v58, %v10728_v17  ;;  %v5605_v62 = vmul.f32 %v6846_v37, %v10728_v17  ;;  %v4842_v46 = vpop.f32.mrb[237].mxu1  ;;  %v5420_v51 = vpop.f32.mrb[237].mxu0 }
 0x59f   : > { %5568 = vst.msk [vmem:[%s10746_s22 + $0xc8] sm:$0xff] %vm1164_vm0, %v5536_v35  ;;  %5696 = vst.msk [vmem:[%s10751_s25 + $0xc8] sm:$0xff] %vm1164_vm0, %v5664_v31  ;;  %v5469_v16 = vmul.f32 %v10728_v17, %v4842_v46  ;;  %v5603_v19 = vmul.f32 %v10728_v17, %v5420_v51  ;;  %v6775_v4 = vpop.f32.mrb[238].mxu1  ;;  %v6847_v34 = vpop.f32.mrb[238].mxu0 }
 0x5a0   : > { %v5509_v9 = vadd.f32 %v10733_v41, %v5471_v18  ;;  %v5637_v43 = vadd.f32 %v10733_v41, %v5605_v62  ;;  %v5472_v10 = vmul.f32 %v6775_v4, %v10728_v17  ;;  %v5606_v57 = vmul.f32 %v6847_v34, %v10728_v17  ;;  %v4845_v60 = vpop.f32.mrb[239].mxu1  ;;  %v5423_v15 = vpop.f32.mrb[239].mxu0 }
 0x5a1   : > { %v5507_v33 = vadd.f32 %v10733_v41, %v5469_v16  ;;  %v5635_v21 = vadd.f32 %v10733_v41, %v5603_v19  ;;  %v5470_v45 = vmul.f32 %v10728_v17, %v4845_v60  ;;  %v5604_v25 = vmul.f32 %v10728_v17, %v5423_v15 }
 0x5a2   : > { %v5541_v49 = vmax.f32 %v5509_v9, 0.0  ;;  %v5669_v48 = vmax.f32 %v5637_v43, 0.0  ;;  %v5510_v54 = vadd.f32 %v10733_v41, %v5472_v10  ;;  %v5638_v12 = vadd.f32 %v10733_v41, %v5606_v57 }
 0x5a3   : > { %v5539_v14 = vmax.f32 %v5507_v33, 0.0  ;;  %v5667_v38 = vmax.f32 %v5635_v21, 0.0  ;;  %v5508_v22 = vadd.f32 %v10733_v41, %v5470_v45  ;;  %v5636_v36 = vadd.f32 %v10733_v41, %v5604_v25 }
 0x5a4   : > { %5573 = vst.msk [vmem:[%s10746_s22 + $0xf0] sm:$0xff] %vm1164_vm0, %v5541_v49  ;;  %5701 = vst.msk [vmem:[%s10751_s25 + $0xf0] sm:$0xff] %vm1164_vm0, %v5669_v48  ;;  %v5542_v17 = vmax.f32 %v5510_v54, 0.0  ;;  %v5670_v11 = vmax.f32 %v5638_v12, 0.0 }
 0x5a5   : > { %5571 = vst.msk [vmem:[%s10746_s22 + $0xe0] sm:$0xff] %vm1164_vm0, %v5539_v14  ;;  %5699 = vst.msk [vmem:[%s10751_s25 + $0xe0] sm:$0xff] %vm1164_vm0, %v5667_v38  ;;  %v5540_v40 = vmax.f32 %v5508_v22, 0.0  ;;  %v5668_v2 = vmax.f32 %v5636_v36, 0.0 }
 0x5a6   : > { %5574 = vst.msk [vmem:[%s10746_s22 + $0xf8] sm:$0xff] %vm1164_vm0, %v5542_v17  ;;  %5702 = vst.msk [vmem:[%s10751_s25 + $0xf8] sm:$0xff] %vm1164_vm0, %v5670_v11 }
 0x5a7   : > { %5572 = vst.msk [vmem:[%s10746_s22 + $0xe8] sm:$0xff] %vm1164_vm0, %v5540_v40  ;;  %5700 = vst.msk [vmem:[%s10751_s25 + $0xe8] sm:$0xff] %vm1164_vm0, %v5668_v2 }
 0x5a8 PF: > { %s25_s29 = sadd.s32 1, %s7471_s29  }
 0x5a9   : > { %p22_p6 = scmp.ge.s32.totalorder %s25_s29, 4  }
 0x5ab   :  { %24 = sbr.rel (!%p22_p6) target bundleno = 1 (0x1), region = 123 }

</bundles_post_ra>
